<compile_context>
chip_gen: v6e
topology: v6e:2x2x1
jax: 0.10.0
libtpu: 0.0.40
codegen_flags: <defaults>
</compile_context>

<pallas_src>
import math
import functools

import jax
import jax.numpy as jnp
from jax.experimental import pallas as pl
from jax.experimental.pallas import tpu as pltpu


# ----------------------------------------------------------------------------
# Model config
# ----------------------------------------------------------------------------

COORD_DIM = 2
CLASS_VOCAB = 10
CLASS_EMBED_DIM = 4
EMBED_DIM = 128
NUM_HEADS = 4
NUM_LAYERS = 4
NUM_CLASSES = 10
DIM_FEEDFORWARD = 2048          # nn.TransformerEncoderLayer default
MAX_LEN = 5000
HEAD_DIM = EMBED_DIM // NUM_HEADS
FC_PAD = 128                    # lane-dense padded classifier width
LN_EPS = 1e-5


# ----------------------------------------------------------------------------
# Fused Pallas kernel
# ----------------------------------------------------------------------------

def _layer_norm(x, w, b, eps=LN_EPS):
    mu = jnp.mean(x, axis=-1, keepdims=True)
    var = jnp.mean(jnp.square(x - mu), axis=-1, keepdims=True)
    return (x - mu) * jax.lax.rsqrt(var + eps) * w + b


def _fused_transformer_kernel(
    # constant (block index fixed across the grid -> DMA'd once)
    coords_ref, cls_ref, pe_ref,
    cw_ref, cb_ref, ew_ref, eb_ref,
    # per-layer stacked weights (leading axis selected by index_map)
    wqkv_ref, bqkv_ref, wo_ref, bo_ref, ln1w_ref, ln1b_ref,
    w1_ref, b1_ref, w2_ref, b2_ref, ln2w_ref, ln2b_ref,
    # final head
    nw_ref, nb_ref, fw_ref, fb_ref,
    # output + scratch
    out_ref,
    x_scr,
    *, batch, seq, d_model, n_heads):
    l = pl.program_id(0)
    n_layers = pl.num_programs(0)
    head_dim = d_model // n_heads
    m = batch * seq

    # ---- embedding + positional encoding (only at layer 0; x stays in VMEM) ----
    @pl.when(l == 0)
    def _():
        coord = jnp.dot(coords_ref[...], cw_ref[...],
                        preferred_element_type=jnp.float32) + cb_ref[...]
        cls = jnp.dot(cls_ref[...], ew_ref[...],
                      preferred_element_type=jnp.float32) + eb_ref[...]
        pe = jnp.tile(pe_ref[...], (batch, 1))                        # [M, D]
        x_scr[...] = coord + cls + pe

    x = x_scr[...]                                                    # [M, D] f32

    # ---- fused QKV projection (bf16 weights, f32 accumulation) ----
    qkv = jnp.dot(x.astype(jnp.bfloat16), wqkv_ref[0],
                  preferred_element_type=jnp.float32) + bqkv_ref[0]   # [M, 3D]
    q = qkv[:, :d_model]            # 1/sqrt(head_dim) already folded into Wq/bq
    k = qkv[:, d_model:2 * d_model]
    v = qkv[:, 2 * d_model:]

    # ---- multi-head attention (heads unrolled, batch as einsum batch dim) ----
    head_outs = []
    for h in range(n_heads):
        lo, hi = h * head_dim, (h + 1) * head_dim
        qh = q[:, lo:hi].reshape(batch, seq, head_dim)
        kh = k[:, lo:hi].reshape(batch, seq, head_dim)
        vh = v[:, lo:hi].reshape(batch, seq, head_dim)
        s = jnp.einsum('bqd,bkd->bqk', qh, kh,
                       preferred_element_type=jnp.float32)            # [B, S, S]
        s_max = jnp.max(s, axis=-1, keepdims=True)
        p = jnp.exp(s - s_max)
        p = p * pl.reciprocal(jnp.sum(p, axis=-1, keepdims=True), approx=True)
        oh = jnp.einsum('bqk,bkd->bqd', p, vh,
                        preferred_element_type=jnp.float32)           # [B, S, Dh]
        head_outs.append(oh.reshape(m, head_dim))
    attn = jnp.concatenate(head_outs, axis=-1)                        # [M, D]
    attn = jnp.dot(attn.astype(jnp.bfloat16), wo_ref[0],
                   preferred_element_type=jnp.float32) + bo_ref[0]

    # ---- add & norm 1 (post-norm, like PyTorch default) ----
    x = _layer_norm(x + attn, ln1w_ref[0], ln1b_ref[0])

    # ---- feed-forward (ReLU) ----
    hdn = jnp.dot(x.astype(jnp.bfloat16), w1_ref[0],
                  preferred_element_type=jnp.float32) + b1_ref[0]     # [M, F]
    hdn = jnp.maximum(hdn, 0.0)
    ff = jnp.dot(hdn.astype(jnp.bfloat16), w2_ref[0],
                 preferred_element_type=jnp.float32) + b2_ref[0]      # [M, D]

    # ---- add & norm 2 ----
    x = _layer_norm(x + ff, ln2w_ref[0], ln2b_ref[0])
    x_scr[...] = x

    # ---- final head: mean over seq -> LayerNorm -> classifier (last layer) ----
    @pl.when(l == n_layers - 1)
    def _():
        pooled = jnp.mean(x.reshape(batch, seq, d_model), axis=1)     # [B, D]
        normed = _layer_norm(pooled, nw_ref[...], nb_ref[...])
        logits = jnp.dot(normed.astype(jnp.bfloat16), fw_ref[...],
                         preferred_element_type=jnp.float32) + fb_ref[...]
        out_ref[...] = logits                                         # [B, 128]


# ----------------------------------------------------------------------------
# Wrapper
# ----------------------------------------------------------------------------

def fused_forward(fp, coords, class_tokens):
    B, S, _ = coords.shape
    D = EMBED_DIM
    M = B * S

    # Embedding-table gather (glue) + positional-encoding slice (glue).
    class_emb = jnp.take(fp["class_table"], class_tokens, axis=0)     # [B, S, 4]
    coords2d = coords.reshape(M, COORD_DIM)
    cls2d = class_emb.reshape(M, CLASS_EMBED_DIM)
    pe = fp["pe_table"][:S]                                           # [S, D]

    kern = functools.partial(_fused_transformer_kernel,
                             batch=B, seq=S, d_model=D, n_heads=NUM_HEADS)

    def const2d(shape):
        return pl.BlockSpec(shape, lambda l: (0, 0))

    def stacked(shape):
        return pl.BlockSpec((1,) + shape, lambda l: (l, 0, 0))

    out = pl.pallas_call(
        kern,
        out_shape=jax.ShapeDtypeStruct((B, FC_PAD), jnp.float32),
        grid=(NUM_LAYERS,),
        in_specs=[
            const2d((M, COORD_DIM)),
            const2d((M, CLASS_EMBED_DIM)),
            const2d((S, D)),
            const2d((COORD_DIM, D)), const2d((1, D)),
            const2d((CLASS_EMBED_DIM, D)), const2d((1, D)),
            stacked((D, 3 * D)), stacked((1, 3 * D)),
            stacked((D, D)), stacked((1, D)),
            stacked((1, D)), stacked((1, D)),
            stacked((D, DIM_FEEDFORWARD)), stacked((1, DIM_FEEDFORWARD)),
            stacked((DIM_FEEDFORWARD, D)), stacked((1, D)),
            stacked((1, D)), stacked((1, D)),
            const2d((1, D)), const2d((1, D)),
            const2d((D, FC_PAD)), const2d((1, FC_PAD)),
        ],
        out_specs=pl.BlockSpec((B, FC_PAD), lambda l: (0, 0)),
        scratch_shapes=[pltpu.VMEM((M, D), jnp.float32)],
        compiler_params=pltpu.CompilerParams(
            dimension_semantics=("arbitrary",)),
    )(
        coords2d, cls2d, pe,
        fp["coord_w"], fp["coord_b"], fp["class_w"], fp["class_b"],
        fp["wqkv"], fp["bqkv"], fp["wo"], fp["bo"], fp["ln1_w"], fp["ln1_b"],
        fp["w1"], fp["b1"], fp["w2"], fp["b2"], fp["ln2_w"], fp["ln2_b"],
        fp["norm_w"], fp["norm_b"], fp["fc_w_pad"], fp["fc_b_pad"],
    )
    return out[:, :NUM_CLASSES]


formation_transformer_forward = jax.jit(fused_forward)


# ----------------------------------------------------------------------------
# Parameters
# ----------------------------------------------------------------------------

def make_positional_encoding(d_model, max_len=MAX_LEN):
    position = jnp.arange(max_len, dtype=jnp.float32)[:, None]
    div_term = jnp.exp(jnp.arange(0, d_model, 2, dtype=jnp.float32)
                       * (-math.log(10000.0) / d_model))
    ang = position * div_term
    pe = jnp.zeros((max_len, d_model), jnp.float32)
    pe = pe.at[:, 0::2].set(jnp.sin(ang))
    pe = pe.at[:, 1::2].set(jnp.cos(ang))
    return pe


def init_params(key):
    keys = iter(jax.random.split(key, 8 + NUM_LAYERS * 8))

    def w(shape, scale=0.02):
        return (scale * jax.random.normal(next(keys), shape)).astype(jnp.float32)

    params = {
        "coord_w": w((COORD_DIM, EMBED_DIM)),
        "coord_b": jnp.zeros((1, EMBED_DIM), jnp.float32),
        "class_table": w((CLASS_VOCAB, CLASS_EMBED_DIM), scale=1.0),
        "class_w": w((CLASS_EMBED_DIM, EMBED_DIM)),
        "class_b": jnp.zeros((1, EMBED_DIM), jnp.float32),
        "norm_w": jnp.ones((1, EMBED_DIM), jnp.float32),
        "norm_b": jnp.zeros((1, EMBED_DIM), jnp.float32),
        "fc_w": w((EMBED_DIM, NUM_CLASSES)),
        "fc_b": jnp.zeros((1, NUM_CLASSES), jnp.float32),
        "layers": [],
    }
    for _ in range(NUM_LAYERS):
        params["layers"].append({
            "wq": w((EMBED_DIM, EMBED_DIM)), "bq": jnp.zeros((1, EMBED_DIM), jnp.float32),
            "wk": w((EMBED_DIM, EMBED_DIM)), "bk": jnp.zeros((1, EMBED_DIM), jnp.float32),
            "wv": w((EMBED_DIM, EMBED_DIM)), "bv": jnp.zeros((1, EMBED_DIM), jnp.float32),
            "wo": w((EMBED_DIM, EMBED_DIM)), "bo": jnp.zeros((1, EMBED_DIM), jnp.float32),
            "ln1_w": jnp.ones((1, EMBED_DIM), jnp.float32),
            "ln1_b": jnp.zeros((1, EMBED_DIM), jnp.float32),
            "w1": w((EMBED_DIM, DIM_FEEDFORWARD)),
            "b1": jnp.zeros((1, DIM_FEEDFORWARD), jnp.float32),
            "w2": w((DIM_FEEDFORWARD, EMBED_DIM)),
            "b2": jnp.zeros((1, EMBED_DIM), jnp.float32),
            "ln2_w": jnp.ones((1, EMBED_DIM), jnp.float32),
            "ln2_b": jnp.zeros((1, EMBED_DIM), jnp.float32),
        })
    return params


def prepare_fused_params(params):
    """Stack per-layer weights on a leading axis, fold the attention scale into
    Wq/bq, cast matmul weights to bf16, pad the classifier to 128 lanes."""
    scale = 1.0 / math.sqrt(HEAD_DIM)
    wqkv, bqkv = [], []
    for p in params["layers"]:
        wqkv.append(jnp.concatenate([p["wq"] * scale, p["wk"], p["wv"]], axis=1))
        bqkv.append(jnp.concatenate([p["bq"] * scale, p["bk"], p["bv"]], axis=1))

    def stack(name):
        return jnp.stack([p[name] for p in params["layers"]], axis=0)

    fc_w_pad = jnp.zeros((EMBED_DIM, FC_PAD), jnp.float32)
    fc_w_pad = fc_w_pad.at[:, :NUM_CLASSES].set(params["fc_w"])
    fc_b_pad = jnp.zeros((1, FC_PAD), jnp.float32)
    fc_b_pad = fc_b_pad.at[:, :NUM_CLASSES].set(params["fc_b"])

    return {
        "class_table": params["class_table"],
        "pe_table": make_positional_encoding(EMBED_DIM),
        "coord_w": params["coord_w"], "coord_b": params["coord_b"],
        "class_w": params["class_w"], "class_b": params["class_b"],
        "wqkv": jnp.stack(wqkv).astype(jnp.bfloat16),
        "bqkv": jnp.stack(bqkv),
        "wo": stack("wo").astype(jnp.bfloat16), "bo": stack("bo"),
        "ln1_w": stack("ln1_w"), "ln1_b": stack("ln1_b"),
        "w1": stack("w1").astype(jnp.bfloat16), "b1": stack("b1"),
        "w2": stack("w2").astype(jnp.bfloat16), "b2": stack("b2"),
        "ln2_w": stack("ln2_w"), "ln2_b": stack("ln2_b"),
        "norm_w": params["norm_w"], "norm_b": params["norm_b"],
        "fc_w_pad": fc_w_pad.astype(jnp.bfloat16),
        "fc_b_pad": fc_b_pad,
    }


# ----------------------------------------------------------------------------
# Demo
# ----------------------------------------------------------------------------

if __name__ == "__main__":
    B, S = 2, 8
    key = jax.random.PRNGKey(0)
    k_coords, k_tokens = jax.random.split(key)
    coords = jax.random.uniform(k_coords, (B, S, COORD_DIM), dtype=jnp.float32)
    class_tokens = jax.random.randint(k_tokens, (B, S), 0, CLASS_VOCAB)

    params = init_params(jax.random.PRNGKey(42))
    fused = prepare_fused_params(params)

    out = formation_transformer_forward(fused, coords, class_tokens)
    out = jax.block_until_ready(out)
    assert out.shape == (B, NUM_CLASSES) and out.dtype == jnp.float32
    print("KERNEL_OK")
</pallas_src>

<mosaic_0001>
module attributes {stable_mosaic.version = 11 : i64} {
  func.func @_fused_transformer_kernel(%arg0: i32, %arg1: memref<16x2xf32, #tpu.memory_space<vmem>>, %arg2: memref<16x4xf32, #tpu.memory_space<vmem>>, %arg3: memref<8x128xf32, #tpu.memory_space<vmem>>, %arg4: memref<2x128xf32, #tpu.memory_space<vmem>>, %arg5: memref<1x128xf32, #tpu.memory_space<vmem>>, %arg6: memref<4x128xf32, #tpu.memory_space<vmem>>, %arg7: memref<1x128xf32, #tpu.memory_space<vmem>>, %arg8: memref<1x128x384xbf16, #tpu.memory_space<vmem>>, %arg9: memref<1x1x384xf32, #tpu.memory_space<vmem>>, %arg10: memref<1x128x128xbf16, #tpu.memory_space<vmem>>, %arg11: memref<1x1x128xf32, #tpu.memory_space<vmem>>, %arg12: memref<1x1x128xf32, #tpu.memory_space<vmem>>, %arg13: memref<1x1x128xf32, #tpu.memory_space<vmem>>, %arg14: memref<1x128x2048xbf16, #tpu.memory_space<vmem>>, %arg15: memref<1x1x2048xf32, #tpu.memory_space<vmem>>, %arg16: memref<1x2048x128xbf16, #tpu.memory_space<vmem>>, %arg17: memref<1x1x128xf32, #tpu.memory_space<vmem>>, %arg18: memref<1x1x128xf32, #tpu.memory_space<vmem>>, %arg19: memref<1x1x128xf32, #tpu.memory_space<vmem>>, %arg20: memref<1x128xf32, #tpu.memory_space<vmem>>, %arg21: memref<1x128xf32, #tpu.memory_space<vmem>>, %arg22: memref<128x128xbf16, #tpu.memory_space<vmem>>, %arg23: memref<1x128xf32, #tpu.memory_space<vmem>>, %arg24: memref<2x128xf32, #tpu.memory_space<vmem>>, %arg25: memref<16x128xf32, #tpu.memory_space<vmem>>) attributes {dimension_semantics = [#tpu.dimension_semantics<arbitrary>], iteration_bounds = array<i64: 4>, scalar_prefetch = 0 : i64, scratch_operands = 1 : i64, tpu.core_type = #tpu.core_type<tc>, window_params = [{pipeline_mode = #tpu.pipeline_mode<synchronous>, transform_indices = @transform_0, window_bounds = array<i64: 16, 2>}, {pipeline_mode = #tpu.pipeline_mode<synchronous>, transform_indices = @transform_1, window_bounds = array<i64: 16, 4>}, {pipeline_mode = #tpu.pipeline_mode<synchronous>, transform_indices = @transform_2, window_bounds = array<i64: 8, 128>}, {pipeline_mode = #tpu.pipeline_mode<synchronous>, transform_indices = @transform_3, window_bounds = array<i64: 2, 128>}, {pipeline_mode = #tpu.pipeline_mode<synchronous>, transform_indices = @transform_4, window_bounds = array<i64: 1, 128>}, {pipeline_mode = #tpu.pipeline_mode<synchronous>, transform_indices = @transform_5, window_bounds = array<i64: 4, 128>}, {pipeline_mode = #tpu.pipeline_mode<synchronous>, transform_indices = @transform_6, window_bounds = array<i64: 1, 128>}, {transform_indices = @transform_7, window_bounds = array<i64: 1, 128, 384>}, {transform_indices = @transform_8, window_bounds = array<i64: 1, 1, 384>}, {transform_indices = @transform_9, window_bounds = array<i64: 1, 128, 128>}, {transform_indices = @transform_10, window_bounds = array<i64: 1, 1, 128>}, {transform_indices = @transform_11, window_bounds = array<i64: 1, 1, 128>}, {transform_indices = @transform_12, window_bounds = array<i64: 1, 1, 128>}, {transform_indices = @transform_13, window_bounds = array<i64: 1, 128, 2048>}, {transform_indices = @transform_14, window_bounds = array<i64: 1, 1, 2048>}, {transform_indices = @transform_15, window_bounds = array<i64: 1, 2048, 128>}, {transform_indices = @transform_16, window_bounds = array<i64: 1, 1, 128>}, {transform_indices = @transform_17, window_bounds = array<i64: 1, 1, 128>}, {transform_indices = @transform_18, window_bounds = array<i64: 1, 1, 128>}, {pipeline_mode = #tpu.pipeline_mode<synchronous>, transform_indices = @transform_19, window_bounds = array<i64: 1, 128>}, {pipeline_mode = #tpu.pipeline_mode<synchronous>, transform_indices = @transform_20, window_bounds = array<i64: 1, 128>}, {pipeline_mode = #tpu.pipeline_mode<synchronous>, transform_indices = @transform_21, window_bounds = array<i64: 128, 128>}, {pipeline_mode = #tpu.pipeline_mode<synchronous>, transform_indices = @transform_22, window_bounds = array<i64: 1, 128>}, {pipeline_mode = #tpu.pipeline_mode<synchronous>, transform_indices = @transform_23, window_bounds = array<i64: 2, 128>}]} {
    %c0_i32 = arith.constant 0 : i32
    %0 = arith.cmpi eq, %arg0, %c0_i32 : i32
    %1 = arith.extui %0 : i1 to i32
    %c0_i32_0 = arith.constant 0 : i32
    %2 = arith.cmpi ne, %1, %c0_i32_0 : i32
    scf.if %2 {
      %c0_71 = arith.constant 0 : index
      %c0_72 = arith.constant 0 : index
      %176 = vector.load %arg1[%c0_71, %c0_72] : memref<16x2xf32, #tpu.memory_space<vmem>>, vector<16x2xf32>
      %c0_73 = arith.constant 0 : index
      %c0_74 = arith.constant 0 : index
      %177 = vector.load %arg4[%c0_73, %c0_74] : memref<2x128xf32, #tpu.memory_space<vmem>>, vector<2x128xf32>
      %cst_75 = arith.constant dense<0.000000e+00> : vector<16x128xf32>
      %178 = tpu.matmul %176, %177, %cst_75 {dimension_numbers = #tpu.dot_dimension_numbers<[1], [0], [0], [1], [0, 0, 1, 1], [], []>} : vector<16x2xf32>, vector<2x128xf32>, vector<16x128xf32> -> vector<16x128xf32>
      %c0_76 = arith.constant 0 : index
      %c0_77 = arith.constant 0 : index
      %179 = vector.load %arg5[%c0_76, %c0_77] : memref<1x128xf32, #tpu.memory_space<vmem>>, vector<1x128xf32>
      %180 = vector.broadcast %179 : vector<1x128xf32> to vector<16x128xf32>
      %181 = arith.addf %178, %180 : vector<16x128xf32>
      %c0_78 = arith.constant 0 : index
      %c0_79 = arith.constant 0 : index
      %182 = vector.load %arg2[%c0_78, %c0_79] : memref<16x4xf32, #tpu.memory_space<vmem>>, vector<16x4xf32>
      %c0_80 = arith.constant 0 : index
      %c0_81 = arith.constant 0 : index
      %183 = vector.load %arg6[%c0_80, %c0_81] : memref<4x128xf32, #tpu.memory_space<vmem>>, vector<4x128xf32>
      %cst_82 = arith.constant dense<0.000000e+00> : vector<16x128xf32>
      %184 = tpu.matmul %182, %183, %cst_82 {dimension_numbers = #tpu.dot_dimension_numbers<[1], [0], [0], [1], [0, 0, 1, 1], [], []>} : vector<16x4xf32>, vector<4x128xf32>, vector<16x128xf32> -> vector<16x128xf32>
      %c0_83 = arith.constant 0 : index
      %c0_84 = arith.constant 0 : index
      %185 = vector.load %arg7[%c0_83, %c0_84] : memref<1x128xf32, #tpu.memory_space<vmem>>, vector<1x128xf32>
      %186 = vector.broadcast %185 : vector<1x128xf32> to vector<16x128xf32>
      %187 = arith.addf %184, %186 : vector<16x128xf32>
      %c0_85 = arith.constant 0 : index
      %c0_86 = arith.constant 0 : index
      %188 = vector.load %arg3[%c0_85, %c0_86] : memref<8x128xf32, #tpu.memory_space<vmem>>, vector<8x128xf32>
      %189 = tpu.concatenate %188, %188 in 0 : vector<8x128xf32>, vector<8x128xf32> -> vector<16x128xf32>
      %190 = arith.addf %181, %187 : vector<16x128xf32>
      %191 = arith.addf %190, %189 : vector<16x128xf32>
      %c0_87 = arith.constant 0 : index
      %c0_88 = arith.constant 0 : index
      %192 = vector.load %arg25[%c0_87, %c0_88] : memref<16x128xf32, #tpu.memory_space<vmem>>, vector<16x128xf32>
      tpu.vector_store %arg25[%c0_87, %c0_88], %191 {strides = array<i32>} : memref<16x128xf32, #tpu.memory_space<vmem>>, vector<16x128xf32>,
    } else {
    }
    %c0 = arith.constant 0 : index
    %c0_1 = arith.constant 0 : index
    %3 = vector.load %arg25[%c0, %c0_1] : memref<16x128xf32, #tpu.memory_space<vmem>>, vector<16x128xf32>
    %4 = arith.truncf %3 : vector<16x128xf32> to vector<16x128xbf16>
    %c0_2 = arith.constant 0 : index
    %c0_3 = arith.constant 0 : index
    %c0_4 = arith.constant 0 : index
    %5 = vector.load %arg8[%c0_2, %c0_3, %c0_4] : memref<1x128x384xbf16, #tpu.memory_space<vmem>>, vector<1x128x384xbf16>
    %6 = vector.shape_cast %5 : vector<1x128x384xbf16> to vector<128x384xbf16>
    %cst = arith.constant dense<0.000000e+00> : vector<16x384xf32>
    %7 = tpu.matmul %4, %6, %cst {dimension_numbers = #tpu.dot_dimension_numbers<[1], [0], [0], [1], [0, 0, 1, 1], [], []>} : vector<16x128xbf16>, vector<128x384xbf16>, vector<16x384xf32> -> vector<16x384xf32>
    %c0_5 = arith.constant 0 : index
    %c0_6 = arith.constant 0 : index
    %c0_7 = arith.constant 0 : index
    %8 = vector.load %arg9[%c0_5, %c0_6, %c0_7] : memref<1x1x384xf32, #tpu.memory_space<vmem>>, vector<1x1x384xf32>
    %9 = vector.shape_cast %8 : vector<1x1x384xf32> to vector<1x384xf32>
    %10 = vector.broadcast %9 : vector<1x384xf32> to vector<16x384xf32>
    %11 = arith.addf %7, %10 : vector<16x384xf32>
    %12 = vector.extract_strided_slice %11 {offsets = [0, 0], sizes = [16, 128], strides = [1, 1]} : vector<16x384xf32> to vector<16x128xf32>
    %13 = vector.extract_strided_slice %11 {offsets = [0, 128], sizes = [16, 128], strides = [1, 1]} : vector<16x384xf32> to vector<16x128xf32>
    %14 = vector.extract_strided_slice %11 {offsets = [0, 256], sizes = [16, 128], strides = [1, 1]} : vector<16x384xf32> to vector<16x128xf32>
    %15 = vector.extract_strided_slice %12 {offsets = [0, 0], sizes = [16, 32], strides = [1, 1]} : vector<16x128xf32> to vector<16x32xf32>
    %16 = vector.shape_cast %15 : vector<16x32xf32> to vector<2x8x32xf32>
    %17 = vector.extract_strided_slice %13 {offsets = [0, 0], sizes = [16, 32], strides = [1, 1]} : vector<16x128xf32> to vector<16x32xf32>
    %18 = vector.shape_cast %17 : vector<16x32xf32> to vector<2x8x32xf32>
    %19 = vector.extract_strided_slice %14 {offsets = [0, 0], sizes = [16, 32], strides = [1, 1]} : vector<16x128xf32> to vector<16x32xf32>
    %20 = vector.shape_cast %19 : vector<16x32xf32> to vector<2x8x32xf32>
    "tpu.trace_start"() <{level = 10 : i32, message = "bqd,bkd->bqk"}> : () -> ()
    %cst_8 = arith.constant dense<0.000000e+00> : vector<2x8x8xf32>
    %21 = tpu.matmul %16, %18, %cst_8 {dimension_numbers = #tpu.dot_dimension_numbers<[2], [2], [1], [1], [0, 0, 0, 1, 1, 1], [0], [0]>} : vector<2x8x32xf32>, vector<2x8x32xf32>, vector<2x8x8xf32> -> vector<2x8x8xf32>
    "tpu.trace_stop"() : () -> ()
    %cst_9 = arith.constant dense<0xFF800000> : vector<2x8xf32>
    %22 = vector.multi_reduction <maximumf>, %21, %cst_9 [2] : vector<2x8x8xf32> to vector<2x8xf32>
    %23 = vector.shape_cast %22 : vector<2x8xf32> to vector<2x8x1xf32>
    %24 = vector.broadcast %23 : vector<2x8x1xf32> to vector<2x8x8xf32>
    %25 = arith.subf %21, %24 : vector<2x8x8xf32>
    %26 = math.exp %25 : vector<2x8x8xf32>
    %cst_10 = arith.constant dense<0.000000e+00> : vector<2x8xf32>
    %27 = vector.multi_reduction <add>, %26, %cst_10 [2] : vector<2x8x8xf32> to vector<2x8xf32>
    %28 = vector.shape_cast %27 : vector<2x8xf32> to vector<2x8x1xf32>
    %29 = tpu.reciprocal %28 {approx = true} : vector<2x8x1xf32> -> vector<2x8x1xf32>
    %30 = vector.broadcast %29 : vector<2x8x1xf32> to vector<2x8x8xf32>
    %31 = arith.mulf %26, %30 : vector<2x8x8xf32>
    "tpu.trace_start"() <{level = 10 : i32, message = "bqk,bkd->bqd"}> : () -> ()
    %cst_11 = arith.constant dense<0.000000e+00> : vector<2x8x32xf32>
    %32 = tpu.matmul %31, %20, %cst_11 {dimension_numbers = #tpu.dot_dimension_numbers<[2], [1], [1], [2], [0, 0, 0, 1, 1, 2], [0], [0]>} : vector<2x8x8xf32>, vector<2x8x32xf32>, vector<2x8x32xf32> -> vector<2x8x32xf32>
    "tpu.trace_stop"() : () -> ()
    %33 = vector.shape_cast %32 : vector<2x8x32xf32> to vector<16x32xf32>
    %34 = vector.extract_strided_slice %12 {offsets = [0, 32], sizes = [16, 32], strides = [1, 1]} : vector<16x128xf32> to vector<16x32xf32>
    %35 = vector.shape_cast %34 : vector<16x32xf32> to vector<2x8x32xf32>
    %36 = vector.extract_strided_slice %13 {offsets = [0, 32], sizes = [16, 32], strides = [1, 1]} : vector<16x128xf32> to vector<16x32xf32>
    %37 = vector.shape_cast %36 : vector<16x32xf32> to vector<2x8x32xf32>
    %38 = vector.extract_strided_slice %14 {offsets = [0, 32], sizes = [16, 32], strides = [1, 1]} : vector<16x128xf32> to vector<16x32xf32>
    %39 = vector.shape_cast %38 : vector<16x32xf32> to vector<2x8x32xf32>
    "tpu.trace_start"() <{level = 10 : i32, message = "bqd,bkd->bqk"}> : () -> ()
    %cst_12 = arith.constant dense<0.000000e+00> : vector<2x8x8xf32>
    %40 = tpu.matmul %35, %37, %cst_12 {dimension_numbers = #tpu.dot_dimension_numbers<[2], [2], [1], [1], [0, 0, 0, 1, 1, 1], [0], [0]>} : vector<2x8x32xf32>, vector<2x8x32xf32>, vector<2x8x8xf32> -> vector<2x8x8xf32>
    "tpu.trace_stop"() : () -> ()
    %cst_13 = arith.constant dense<0xFF800000> : vector<2x8xf32>
    %41 = vector.multi_reduction <maximumf>, %40, %cst_13 [2] : vector<2x8x8xf32> to vector<2x8xf32>
    %42 = vector.shape_cast %41 : vector<2x8xf32> to vector<2x8x1xf32>
    %43 = vector.broadcast %42 : vector<2x8x1xf32> to vector<2x8x8xf32>
    %44 = arith.subf %40, %43 : vector<2x8x8xf32>
    %45 = math.exp %44 : vector<2x8x8xf32>
    %cst_14 = arith.constant dense<0.000000e+00> : vector<2x8xf32>
    %46 = vector.multi_reduction <add>, %45, %cst_14 [2] : vector<2x8x8xf32> to vector<2x8xf32>
    %47 = vector.shape_cast %46 : vector<2x8xf32> to vector<2x8x1xf32>
    %48 = tpu.reciprocal %47 {approx = true} : vector<2x8x1xf32> -> vector<2x8x1xf32>
    %49 = vector.broadcast %48 : vector<2x8x1xf32> to vector<2x8x8xf32>
    %50 = arith.mulf %45, %49 : vector<2x8x8xf32>
    "tpu.trace_start"() <{level = 10 : i32, message = "bqk,bkd->bqd"}> : () -> ()
    %cst_15 = arith.constant dense<0.000000e+00> : vector<2x8x32xf32>
    %51 = tpu.matmul %50, %39, %cst_15 {dimension_numbers = #tpu.dot_dimension_numbers<[2], [1], [1], [2], [0, 0, 0, 1, 1, 2], [0], [0]>} : vector<2x8x8xf32>, vector<2x8x32xf32>, vector<2x8x32xf32> -> vector<2x8x32xf32>
    "tpu.trace_stop"() : () -> ()
    %52 = vector.shape_cast %51 : vector<2x8x32xf32> to vector<16x32xf32>
    %53 = vector.extract_strided_slice %12 {offsets = [0, 64], sizes = [16, 32], strides = [1, 1]} : vector<16x128xf32> to vector<16x32xf32>
    %54 = vector.shape_cast %53 : vector<16x32xf32> to vector<2x8x32xf32>
    %55 = vector.extract_strided_slice %13 {offsets = [0, 64], sizes = [16, 32], strides = [1, 1]} : vector<16x128xf32> to vector<16x32xf32>
    %56 = vector.shape_cast %55 : vector<16x32xf32> to vector<2x8x32xf32>
    %57 = vector.extract_strided_slice %14 {offsets = [0, 64], sizes = [16, 32], strides = [1, 1]} : vector<16x128xf32> to vector<16x32xf32>
    %58 = vector.shape_cast %57 : vector<16x32xf32> to vector<2x8x32xf32>
    "tpu.trace_start"() <{level = 10 : i32, message = "bqd,bkd->bqk"}> : () -> ()
    %cst_16 = arith.constant dense<0.000000e+00> : vector<2x8x8xf32>
    %59 = tpu.matmul %54, %56, %cst_16 {dimension_numbers = #tpu.dot_dimension_numbers<[2], [2], [1], [1], [0, 0, 0, 1, 1, 1], [0], [0]>} : vector<2x8x32xf32>, vector<2x8x32xf32>, vector<2x8x8xf32> -> vector<2x8x8xf32>
    "tpu.trace_stop"() : () -> ()
    %cst_17 = arith.constant dense<0xFF800000> : vector<2x8xf32>
    %60 = vector.multi_reduction <maximumf>, %59, %cst_17 [2] : vector<2x8x8xf32> to vector<2x8xf32>
    %61 = vector.shape_cast %60 : vector<2x8xf32> to vector<2x8x1xf32>
    %62 = vector.broadcast %61 : vector<2x8x1xf32> to vector<2x8x8xf32>
    %63 = arith.subf %59, %62 : vector<2x8x8xf32>
    %64 = math.exp %63 : vector<2x8x8xf32>
    %cst_18 = arith.constant dense<0.000000e+00> : vector<2x8xf32>
    %65 = vector.multi_reduction <add>, %64, %cst_18 [2] : vector<2x8x8xf32> to vector<2x8xf32>
    %66 = vector.shape_cast %65 : vector<2x8xf32> to vector<2x8x1xf32>
    %67 = tpu.reciprocal %66 {approx = true} : vector<2x8x1xf32> -> vector<2x8x1xf32>
    %68 = vector.broadcast %67 : vector<2x8x1xf32> to vector<2x8x8xf32>
    %69 = arith.mulf %64, %68 : vector<2x8x8xf32>
    "tpu.trace_start"() <{level = 10 : i32, message = "bqk,bkd->bqd"}> : () -> ()
    %cst_19 = arith.constant dense<0.000000e+00> : vector<2x8x32xf32>
    %70 = tpu.matmul %69, %58, %cst_19 {dimension_numbers = #tpu.dot_dimension_numbers<[2], [1], [1], [2], [0, 0, 0, 1, 1, 2], [0], [0]>} : vector<2x8x8xf32>, vector<2x8x32xf32>, vector<2x8x32xf32> -> vector<2x8x32xf32>
    "tpu.trace_stop"() : () -> ()
    %71 = vector.shape_cast %70 : vector<2x8x32xf32> to vector<16x32xf32>
    %72 = vector.extract_strided_slice %12 {offsets = [0, 96], sizes = [16, 32], strides = [1, 1]} : vector<16x128xf32> to vector<16x32xf32>
    %73 = vector.shape_cast %72 : vector<16x32xf32> to vector<2x8x32xf32>
    %74 = vector.extract_strided_slice %13 {offsets = [0, 96], sizes = [16, 32], strides = [1, 1]} : vector<16x128xf32> to vector<16x32xf32>
    %75 = vector.shape_cast %74 : vector<16x32xf32> to vector<2x8x32xf32>
    %76 = vector.extract_strided_slice %14 {offsets = [0, 96], sizes = [16, 32], strides = [1, 1]} : vector<16x128xf32> to vector<16x32xf32>
    %77 = vector.shape_cast %76 : vector<16x32xf32> to vector<2x8x32xf32>
    "tpu.trace_start"() <{level = 10 : i32, message = "bqd,bkd->bqk"}> : () -> ()
    %cst_20 = arith.constant dense<0.000000e+00> : vector<2x8x8xf32>
    %78 = tpu.matmul %73, %75, %cst_20 {dimension_numbers = #tpu.dot_dimension_numbers<[2], [2], [1], [1], [0, 0, 0, 1, 1, 1], [0], [0]>} : vector<2x8x32xf32>, vector<2x8x32xf32>, vector<2x8x8xf32> -> vector<2x8x8xf32>
    "tpu.trace_stop"() : () -> ()
    %cst_21 = arith.constant dense<0xFF800000> : vector<2x8xf32>
    %79 = vector.multi_reduction <maximumf>, %78, %cst_21 [2] : vector<2x8x8xf32> to vector<2x8xf32>
    %80 = vector.shape_cast %79 : vector<2x8xf32> to vector<2x8x1xf32>
    %81 = vector.broadcast %80 : vector<2x8x1xf32> to vector<2x8x8xf32>
    %82 = arith.subf %78, %81 : vector<2x8x8xf32>
    %83 = math.exp %82 : vector<2x8x8xf32>
    %cst_22 = arith.constant dense<0.000000e+00> : vector<2x8xf32>
    %84 = vector.multi_reduction <add>, %83, %cst_22 [2] : vector<2x8x8xf32> to vector<2x8xf32>
    %85 = vector.shape_cast %84 : vector<2x8xf32> to vector<2x8x1xf32>
    %86 = tpu.reciprocal %85 {approx = true} : vector<2x8x1xf32> -> vector<2x8x1xf32>
    %87 = vector.broadcast %86 : vector<2x8x1xf32> to vector<2x8x8xf32>
    %88 = arith.mulf %83, %87 : vector<2x8x8xf32>
    "tpu.trace_start"() <{level = 10 : i32, message = "bqk,bkd->bqd"}> : () -> ()
    %cst_23 = arith.constant dense<0.000000e+00> : vector<2x8x32xf32>
    %89 = tpu.matmul %88, %77, %cst_23 {dimension_numbers = #tpu.dot_dimension_numbers<[2], [1], [1], [2], [0, 0, 0, 1, 1, 2], [0], [0]>} : vector<2x8x8xf32>, vector<2x8x32xf32>, vector<2x8x32xf32> -> vector<2x8x32xf32>
    "tpu.trace_stop"() : () -> ()
    %90 = vector.shape_cast %89 : vector<2x8x32xf32> to vector<16x32xf32>
    %91 = tpu.concatenate %33, %52, %71, %90 in 1 : vector<16x32xf32>, vector<16x32xf32>, vector<16x32xf32>, vector<16x32xf32> -> vector<16x128xf32>
    %92 = arith.truncf %91 : vector<16x128xf32> to vector<16x128xbf16>
    %c0_24 = arith.constant 0 : index
    %c0_25 = arith.constant 0 : index
    %c0_26 = arith.constant 0 : index
    %93 = vector.load %arg10[%c0_24, %c0_25, %c0_26] : memref<1x128x128xbf16, #tpu.memory_space<vmem>>, vector<1x128x128xbf16>
    %94 = vector.shape_cast %93 : vector<1x128x128xbf16> to vector<128x128xbf16>
    %cst_27 = arith.constant dense<0.000000e+00> : vector<16x128xf32>
    %95 = tpu.matmul %92, %94, %cst_27 {dimension_numbers = #tpu.dot_dimension_numbers<[1], [0], [0], [1], [0, 0, 1, 1], [], []>} : vector<16x128xbf16>, vector<128x128xbf16>, vector<16x128xf32> -> vector<16x128xf32>
    %c0_28 = arith.constant 0 : index
    %c0_29 = arith.constant 0 : index
    %c0_30 = arith.constant 0 : index
    %96 = vector.load %arg11[%c0_28, %c0_29, %c0_30] : memref<1x1x128xf32, #tpu.memory_space<vmem>>, vector<1x1x128xf32>
    %97 = vector.shape_cast %96 : vector<1x1x128xf32> to vector<1x128xf32>
    %98 = vector.broadcast %97 : vector<1x128xf32> to vector<16x128xf32>
    %99 = arith.addf %95, %98 : vector<16x128xf32>
    %100 = arith.addf %3, %99 : vector<16x128xf32>
    %c0_31 = arith.constant 0 : index
    %c0_32 = arith.constant 0 : index
    %c0_33 = arith.constant 0 : index
    %101 = vector.load %arg12[%c0_31, %c0_32, %c0_33] : memref<1x1x128xf32, #tpu.memory_space<vmem>>, vector<1x1x128xf32>
    %102 = vector.shape_cast %101 : vector<1x1x128xf32> to vector<1x128xf32>
    %c0_34 = arith.constant 0 : index
    %c0_35 = arith.constant 0 : index
    %c0_36 = arith.constant 0 : index
    %103 = vector.load %arg13[%c0_34, %c0_35, %c0_36] : memref<1x1x128xf32, #tpu.memory_space<vmem>>, vector<1x1x128xf32>
    %104 = vector.shape_cast %103 : vector<1x1x128xf32> to vector<1x128xf32>
    %cst_37 = arith.constant dense<0.000000e+00> : vector<16xf32>
    %105 = vector.multi_reduction <add>, %100, %cst_37 [1] : vector<16x128xf32> to vector<16xf32>
    %106 = vector.shape_cast %105 : vector<16xf32> to vector<16x1xf32>
    %cst_38 = arith.constant 1.280000e+02 : f32
    %107 = vector.broadcast %cst_38 : f32 to vector<16x1xf32>
    %108 = arith.divf %106, %107 : vector<16x1xf32>
    %109 = vector.broadcast %108 : vector<16x1xf32> to vector<16x128xf32>
    %110 = arith.subf %100, %109 : vector<16x128xf32>
    %111 = arith.mulf %110, %110 : vector<16x128xf32>
    %cst_39 = arith.constant dense<0.000000e+00> : vector<16xf32>
    %112 = vector.multi_reduction <add>, %111, %cst_39 [1] : vector<16x128xf32> to vector<16xf32>
    %113 = vector.shape_cast %112 : vector<16xf32> to vector<16x1xf32>
    %cst_40 = arith.constant 1.280000e+02 : f32
    %114 = vector.broadcast %cst_40 : f32 to vector<16x1xf32>
    %115 = arith.divf %113, %114 : vector<16x1xf32>
    %116 = vector.broadcast %108 : vector<16x1xf32> to vector<16x128xf32>
    %117 = arith.subf %100, %116 : vector<16x128xf32>
    %cst_41 = arith.constant 9.99999974E-6 : f32
    %118 = vector.broadcast %cst_41 : f32 to vector<16x1xf32>
    %119 = arith.addf %115, %118 : vector<16x1xf32>
    %120 = math.rsqrt %119 : vector<16x1xf32>
    %121 = vector.broadcast %120 : vector<16x1xf32> to vector<16x128xf32>
    %122 = arith.mulf %117, %121 : vector<16x128xf32>
    %123 = vector.broadcast %102 : vector<1x128xf32> to vector<16x128xf32>
    %124 = arith.mulf %122, %123 : vector<16x128xf32>
    %125 = vector.broadcast %104 : vector<1x128xf32> to vector<16x128xf32>
    %126 = arith.addf %124, %125 : vector<16x128xf32>
    %127 = arith.truncf %126 : vector<16x128xf32> to vector<16x128xbf16>
    %c0_42 = arith.constant 0 : index
    %c0_43 = arith.constant 0 : index
    %c0_44 = arith.constant 0 : index
    %128 = vector.load %arg14[%c0_42, %c0_43, %c0_44] : memref<1x128x2048xbf16, #tpu.memory_space<vmem>>, vector<1x128x2048xbf16>
    %129 = vector.shape_cast %128 : vector<1x128x2048xbf16> to vector<128x2048xbf16>
    %cst_45 = arith.constant dense<0.000000e+00> : vector<16x2048xf32>
    %130 = tpu.matmul %127, %129, %cst_45 {dimension_numbers = #tpu.dot_dimension_numbers<[1], [0], [0], [1], [0, 0, 1, 1], [], []>} : vector<16x128xbf16>, vector<128x2048xbf16>, vector<16x2048xf32> -> vector<16x2048xf32>
    %c0_46 = arith.constant 0 : index
    %c0_47 = arith.constant 0 : index
    %c0_48 = arith.constant 0 : index
    %131 = vector.load %arg15[%c0_46, %c0_47, %c0_48] : memref<1x1x2048xf32, #tpu.memory_space<vmem>>, vector<1x1x2048xf32>
    %132 = vector.shape_cast %131 : vector<1x1x2048xf32> to vector<1x2048xf32>
    %133 = vector.broadcast %132 : vector<1x2048xf32> to vector<16x2048xf32>
    %134 = arith.addf %130, %133 : vector<16x2048xf32>
    %cst_49 = arith.constant 0.000000e+00 : f32
    %135 = vector.broadcast %cst_49 : f32 to vector<16x2048xf32>
    %136 = arith.maximumf %134, %135 : vector<16x2048xf32>
    %137 = arith.truncf %136 : vector<16x2048xf32> to vector<16x2048xbf16>
    %c0_50 = arith.constant 0 : index
    %c0_51 = arith.constant 0 : index
    %c0_52 = arith.constant 0 : index
    %138 = vector.load %arg16[%c0_50, %c0_51, %c0_52] : memref<1x2048x128xbf16, #tpu.memory_space<vmem>>, vector<1x2048x128xbf16>
    %139 = vector.shape_cast %138 : vector<1x2048x128xbf16> to vector<2048x128xbf16>
    %cst_53 = arith.constant dense<0.000000e+00> : vector<16x128xf32>
    %140 = tpu.matmul %137, %139, %cst_53 {dimension_numbers = #tpu.dot_dimension_numbers<[1], [0], [0], [1], [0, 0, 1, 1], [], []>} : vector<16x2048xbf16>, vector<2048x128xbf16>, vector<16x128xf32> -> vector<16x128xf32>
    %c0_54 = arith.constant 0 : index
    %c0_55 = arith.constant 0 : index
    %c0_56 = arith.constant 0 : index
    %141 = vector.load %arg17[%c0_54, %c0_55, %c0_56] : memref<1x1x128xf32, #tpu.memory_space<vmem>>, vector<1x1x128xf32>
    %142 = vector.shape_cast %141 : vector<1x1x128xf32> to vector<1x128xf32>
    %143 = vector.broadcast %142 : vector<1x128xf32> to vector<16x128xf32>
    %144 = arith.addf %140, %143 : vector<16x128xf32>
    %145 = arith.addf %126, %144 : vector<16x128xf32>
    %c0_57 = arith.constant 0 : index
    %c0_58 = arith.constant 0 : index
    %c0_59 = arith.constant 0 : index
    %146 = vector.load %arg18[%c0_57, %c0_58, %c0_59] : memref<1x1x128xf32, #tpu.memory_space<vmem>>, vector<1x1x128xf32>
    %147 = vector.shape_cast %146 : vector<1x1x128xf32> to vector<1x128xf32>
    %c0_60 = arith.constant 0 : index
    %c0_61 = arith.constant 0 : index
    %c0_62 = arith.constant 0 : index
    %148 = vector.load %arg19[%c0_60, %c0_61, %c0_62] : memref<1x1x128xf32, #tpu.memory_space<vmem>>, vector<1x1x128xf32>
    %149 = vector.shape_cast %148 : vector<1x1x128xf32> to vector<1x128xf32>
    %cst_63 = arith.constant dense<0.000000e+00> : vector<16xf32>
    %150 = vector.multi_reduction <add>, %145, %cst_63 [1] : vector<16x128xf32> to vector<16xf32>
    %151 = vector.shape_cast %150 : vector<16xf32> to vector<16x1xf32>
    %cst_64 = arith.constant 1.280000e+02 : f32
    %152 = vector.broadcast %cst_64 : f32 to vector<16x1xf32>
    %153 = arith.divf %151, %152 : vector<16x1xf32>
    %154 = vector.broadcast %153 : vector<16x1xf32> to vector<16x128xf32>
    %155 = arith.subf %145, %154 : vector<16x128xf32>
    %156 = arith.mulf %155, %155 : vector<16x128xf32>
    %cst_65 = arith.constant dense<0.000000e+00> : vector<16xf32>
    %157 = vector.multi_reduction <add>, %156, %cst_65 [1] : vector<16x128xf32> to vector<16xf32>
    %158 = vector.shape_cast %157 : vector<16xf32> to vector<16x1xf32>
    %cst_66 = arith.constant 1.280000e+02 : f32
    %159 = vector.broadcast %cst_66 : f32 to vector<16x1xf32>
    %160 = arith.divf %158, %159 : vector<16x1xf32>
    %161 = vector.broadcast %153 : vector<16x1xf32> to vector<16x128xf32>
    %162 = arith.subf %145, %161 : vector<16x128xf32>
    %cst_67 = arith.constant 9.99999974E-6 : f32
    %163 = vector.broadcast %cst_67 : f32 to vector<16x1xf32>
    %164 = arith.addf %160, %163 : vector<16x1xf32>
    %165 = math.rsqrt %164 : vector<16x1xf32>
    %166 = vector.broadcast %165 : vector<16x1xf32> to vector<16x128xf32>
    %167 = arith.mulf %162, %166 : vector<16x128xf32>
    %168 = vector.broadcast %147 : vector<1x128xf32> to vector<16x128xf32>
    %169 = arith.mulf %167, %168 : vector<16x128xf32>
    %170 = vector.broadcast %149 : vector<1x128xf32> to vector<16x128xf32>
    %171 = arith.addf %169, %170 : vector<16x128xf32>
    %c0_68 = arith.constant 0 : index
    %c0_69 = arith.constant 0 : index
    %172 = vector.load %arg25[%c0_68, %c0_69] : memref<16x128xf32, #tpu.memory_space<vmem>>, vector<16x128xf32>
    tpu.vector_store %arg25[%c0_68, %c0_69], %171 {strides = array<i32>} : memref<16x128xf32, #tpu.memory_space<vmem>>, vector<16x128xf32>,
    %c3_i32 = arith.constant 3 : i32
    %173 = arith.cmpi eq, %arg0, %c3_i32 : i32
    %174 = arith.extui %173 : i1 to i32
    %c0_i32_70 = arith.constant 0 : i32
    %175 = arith.cmpi ne, %174, %c0_i32_70 : i32
    scf.if %175 {
      %176 = vector.shape_cast %171 : vector<16x128xf32> to vector<2x8x128xf32>
      %cst_71 = arith.constant dense<0.000000e+00> : vector<2x128xf32>
      %177 = vector.multi_reduction <add>, %176, %cst_71 [1] : vector<2x8x128xf32> to vector<2x128xf32>
      %cst_72 = arith.constant 8.000000e+00 : f32
      %178 = vector.broadcast %cst_72 : f32 to vector<2x128xf32>
      %179 = arith.divf %177, %178 : vector<2x128xf32>
      %c0_73 = arith.constant 0 : index
      %c0_74 = arith.constant 0 : index
      %180 = vector.load %arg20[%c0_73, %c0_74] : memref<1x128xf32, #tpu.memory_space<vmem>>, vector<1x128xf32>
      %c0_75 = arith.constant 0 : index
      %c0_76 = arith.constant 0 : index
      %181 = vector.load %arg21[%c0_75, %c0_76] : memref<1x128xf32, #tpu.memory_space<vmem>>, vector<1x128xf32>
      %cst_77 = arith.constant dense<0.000000e+00> : vector<2xf32>
      %182 = vector.multi_reduction <add>, %179, %cst_77 [1] : vector<2x128xf32> to vector<2xf32>
      %183 = vector.shape_cast %182 : vector<2xf32> to vector<2x1xf32>
      %cst_78 = arith.constant 1.280000e+02 : f32
      %184 = vector.broadcast %cst_78 : f32 to vector<2x1xf32>
      %185 = arith.divf %183, %184 : vector<2x1xf32>
      %186 = vector.broadcast %185 : vector<2x1xf32> to vector<2x128xf32>
      %187 = arith.subf %179, %186 : vector<2x128xf32>
      %188 = arith.mulf %187, %187 : vector<2x128xf32>
      %cst_79 = arith.constant dense<0.000000e+00> : vector<2xf32>
      %189 = vector.multi_reduction <add>, %188, %cst_79 [1] : vector<2x128xf32> to vector<2xf32>
      %190 = vector.shape_cast %189 : vector<2xf32> to vector<2x1xf32>
      %cst_80 = arith.constant 1.280000e+02 : f32
      %191 = vector.broadcast %cst_80 : f32 to vector<2x1xf32>
      %192 = arith.divf %190, %191 : vector<2x1xf32>
      %193 = vector.broadcast %185 : vector<2x1xf32> to vector<2x128xf32>
      %194 = arith.subf %179, %193 : vector<2x128xf32>
      %cst_81 = arith.constant 9.99999974E-6 : f32
      %195 = vector.broadcast %cst_81 : f32 to vector<2x1xf32>
      %196 = arith.addf %192, %195 : vector<2x1xf32>
      %197 = math.rsqrt %196 : vector<2x1xf32>
      %198 = vector.broadcast %197 : vector<2x1xf32> to vector<2x128xf32>
      %199 = arith.mulf %194, %198 : vector<2x128xf32>
      %200 = vector.broadcast %180 : vector<1x128xf32> to vector<2x128xf32>
      %201 = arith.mulf %199, %200 : vector<2x128xf32>
      %202 = vector.broadcast %181 : vector<1x128xf32> to vector<2x128xf32>
      %203 = arith.addf %201, %202 : vector<2x128xf32>
      %204 = arith.truncf %203 : vector<2x128xf32> to vector<2x128xbf16>
      %c0_82 = arith.constant 0 : index
      %c0_83 = arith.constant 0 : index
      %205 = vector.load %arg22[%c0_82, %c0_83] : memref<128x128xbf16, #tpu.memory_space<vmem>>, vector<128x128xbf16>
      %cst_84 = arith.constant dense<0.000000e+00> : vector<2x128xf32>
      %206 = tpu.matmul %204, %205, %cst_84 {dimension_numbers = #tpu.dot_dimension_numbers<[1], [0], [0], [1], [0, 0, 1, 1], [], []>} : vector<2x128xbf16>, vector<128x128xbf16>, vector<2x128xf32> -> vector<2x128xf32>
      %c0_85 = arith.constant 0 : index
      %c0_86 = arith.constant 0 : index
      %207 = vector.load %arg23[%c0_85, %c0_86] : memref<1x128xf32, #tpu.memory_space<vmem>>, vector<1x128xf32>
      %208 = vector.broadcast %207 : vector<1x128xf32> to vector<2x128xf32>
      %209 = arith.addf %206, %208 : vector<2x128xf32>
      %c0_87 = arith.constant 0 : index
      %c0_88 = arith.constant 0 : index
      %210 = vector.load %arg24[%c0_87, %c0_88] : memref<2x128xf32, #tpu.memory_space<vmem>>, vector<2x128xf32>
      tpu.vector_store %arg24[%c0_87, %c0_88], %209 {strides = array<i32>} : memref<2x128xf32, #tpu.memory_space<vmem>>, vector<2x128xf32>,
    } else {
    }
    return
  }
  func.func @transform_0(%arg0: i32) -> (i32, i32) {
    %c0_i32 = arith.constant 0 : i32
    %c0_i32_0 = arith.constant 0 : i32
    %c0_i32_1 = arith.constant 0 : i32
    return %c0_i32, %c0_i32_0 : i32, i32
  }
  func.func @transform_1(%arg0: i32) -> (i32, i32) {
    %c0_i32 = arith.constant 0 : i32
    %c0_i32_0 = arith.constant 0 : i32
    %c0_i32_1 = arith.constant 0 : i32
    return %c0_i32, %c0_i32_0 : i32, i32
  }
  func.func @transform_2(%arg0: i32) -> (i32, i32) {
    %c0_i32 = arith.constant 0 : i32
    %c0_i32_0 = arith.constant 0 : i32
    %c0_i32_1 = arith.constant 0 : i32
    return %c0_i32, %c0_i32_0 : i32, i32
  }
  func.func @transform_3(%arg0: i32) -> (i32, i32) {
    %c0_i32 = arith.constant 0 : i32
    %c0_i32_0 = arith.constant 0 : i32
    %c0_i32_1 = arith.constant 0 : i32
    return %c0_i32, %c0_i32_0 : i32, i32
  }
  func.func @transform_4(%arg0: i32) -> (i32, i32) {
    %c0_i32 = arith.constant 0 : i32
    %c0_i32_0 = arith.constant 0 : i32
    %c0_i32_1 = arith.constant 0 : i32
    return %c0_i32, %c0_i32_0 : i32, i32
  }
  func.func @transform_5(%arg0: i32) -> (i32, i32) {
    %c0_i32 = arith.constant 0 : i32
    %c0_i32_0 = arith.constant 0 : i32
    %c0_i32_1 = arith.constant 0 : i32
    return %c0_i32, %c0_i32_0 : i32, i32
  }
  func.func @transform_6(%arg0: i32) -> (i32, i32) {
    %c0_i32 = arith.constant 0 : i32
    %c0_i32_0 = arith.constant 0 : i32
    %c0_i32_1 = arith.constant 0 : i32
    return %c0_i32, %c0_i32_0 : i32, i32
  }
  func.func @transform_7(%arg0: i32) -> (i32, i32, i32) {
    %c0_i32 = arith.constant 0 : i32
    %c0_i32_0 = arith.constant 0 : i32
    %c0_i32_1 = arith.constant 0 : i32
    return %arg0, %c0_i32, %c0_i32_0 : i32, i32, i32
  }
  func.func @transform_8(%arg0: i32) -> (i32, i32, i32) {
    %c0_i32 = arith.constant 0 : i32
    %c0_i32_0 = arith.constant 0 : i32
    %c0_i32_1 = arith.constant 0 : i32
    return %arg0, %c0_i32, %c0_i32_0 : i32, i32, i32
  }
  func.func @transform_9(%arg0: i32) -> (i32, i32, i32) {
    %c0_i32 = arith.constant 0 : i32
    %c0_i32_0 = arith.constant 0 : i32
    %c0_i32_1 = arith.constant 0 : i32
    return %arg0, %c0_i32, %c0_i32_0 : i32, i32, i32
  }
  func.func @transform_10(%arg0: i32) -> (i32, i32, i32) {
    %c0_i32 = arith.constant 0 : i32
    %c0_i32_0 = arith.constant 0 : i32
    %c0_i32_1 = arith.constant 0 : i32
    return %arg0, %c0_i32, %c0_i32_0 : i32, i32, i32
  }
  func.func @transform_11(%arg0: i32) -> (i32, i32, i32) {
    %c0_i32 = arith.constant 0 : i32
    %c0_i32_0 = arith.constant 0 : i32
    %c0_i32_1 = arith.constant 0 : i32
    return %arg0, %c0_i32, %c0_i32_0 : i32, i32, i32
  }
  func.func @transform_12(%arg0: i32) -> (i32, i32, i32) {
    %c0_i32 = arith.constant 0 : i32
    %c0_i32_0 = arith.constant 0 : i32
    %c0_i32_1 = arith.constant 0 : i32
    return %arg0, %c0_i32, %c0_i32_0 : i32, i32, i32
  }
  func.func @transform_13(%arg0: i32) -> (i32, i32, i32) {
    %c0_i32 = arith.constant 0 : i32
    %c0_i32_0 = arith.constant 0 : i32
    %c0_i32_1 = arith.constant 0 : i32
    return %arg0, %c0_i32, %c0_i32_0 : i32, i32, i32
  }
  func.func @transform_14(%arg0: i32) -> (i32, i32, i32) {
    %c0_i32 = arith.constant 0 : i32
    %c0_i32_0 = arith.constant 0 : i32
    %c0_i32_1 = arith.constant 0 : i32
    return %arg0, %c0_i32, %c0_i32_0 : i32, i32, i32
  }
  func.func @transform_15(%arg0: i32) -> (i32, i32, i32) {
    %c0_i32 = arith.constant 0 : i32
    %c0_i32_0 = arith.constant 0 : i32
    %c0_i32_1 = arith.constant 0 : i32
    return %arg0, %c0_i32, %c0_i32_0 : i32, i32, i32
  }
  func.func @transform_16(%arg0: i32) -> (i32, i32, i32) {
    %c0_i32 = arith.constant 0 : i32
    %c0_i32_0 = arith.constant 0 : i32
    %c0_i32_1 = arith.constant 0 : i32
    return %arg0, %c0_i32, %c0_i32_0 : i32, i32, i32
  }
  func.func @transform_17(%arg0: i32) -> (i32, i32, i32) {
    %c0_i32 = arith.constant 0 : i32
    %c0_i32_0 = arith.constant 0 : i32
    %c0_i32_1 = arith.constant 0 : i32
    return %arg0, %c0_i32, %c0_i32_0 : i32, i32, i32
  }
  func.func @transform_18(%arg0: i32) -> (i32, i32, i32) {
    %c0_i32 = arith.constant 0 : i32
    %c0_i32_0 = arith.constant 0 : i32
    %c0_i32_1 = arith.constant 0 : i32
    return %arg0, %c0_i32, %c0_i32_0 : i32, i32, i32
  }
  func.func @transform_19(%arg0: i32) -> (i32, i32) {
    %c0_i32 = arith.constant 0 : i32
    %c0_i32_0 = arith.constant 0 : i32
    %c0_i32_1 = arith.constant 0 : i32
    return %c0_i32, %c0_i32_0 : i32, i32
  }
  func.func @transform_20(%arg0: i32) -> (i32, i32) {
    %c0_i32 = arith.constant 0 : i32
    %c0_i32_0 = arith.constant 0 : i32
    %c0_i32_1 = arith.constant 0 : i32
    return %c0_i32, %c0_i32_0 : i32, i32
  }
  func.func @transform_21(%arg0: i32) -> (i32, i32) {
    %c0_i32 = arith.constant 0 : i32
    %c0_i32_0 = arith.constant 0 : i32
    %c0_i32_1 = arith.constant 0 : i32
    return %c0_i32, %c0_i32_0 : i32, i32
  }
  func.func @transform_22(%arg0: i32) -> (i32, i32) {
    %c0_i32 = arith.constant 0 : i32
    %c0_i32_0 = arith.constant 0 : i32
    %c0_i32_1 = arith.constant 0 : i32
    return %c0_i32, %c0_i32_0 : i32, i32
  }
  func.func @transform_23(%arg0: i32) -> (i32, i32) {
    %c0_i32 = arith.constant 0 : i32
    %c0_i32_0 = arith.constant 0 : i32
    %c0_i32_1 = arith.constant 0 : i32
    return %c0_i32, %c0_i32_0 : i32, i32
  }
}

</mosaic_0001>

<bundles_post_ra>
// kernel: fused_forward.1
= control target key start
LH: loop header
LB: loop body
LE: loop exit
PB: predicated region body
PF: predicated region fallthrough
CT: control target
= control target key end

     0   :  { %s9473_s0 = inlined_call_operand.vmem [shape: f32[16,2], index: 0, kind: input, shape index: {}]   ;;  %s9474_s1 = inlined_call_operand.vmem [shape: f32[16,4], index: 1, kind: input, shape index: {}]   ;;  %s9475_s2 = inlined_call_operand.vmem [shape: f32[8,128], index: 2, kind: input, shape index: {}]   ;;  %s9476_s3 = inlined_call_operand.hbm [shape: f32[2,128], index: 3, kind: input, shape index: {}]   ;;  %s9477_s4 = inlined_call_operand.hbm [shape: f32[1,128], index: 4, kind: input, shape index: {}]   ;;  %s9478_s5 = inlined_call_operand.hbm [shape: f32[4,128], index: 5, kind: input, shape index: {}]   ;;  %s9479_s6 = inlined_call_operand.hbm [shape: f32[1,128], index: 6, kind: input, shape index: {}]   ;;  %s9480_s7 = inlined_call_operand.hbm [shape: bf16[4,128,384], index: 7, kind: input, shape index: {}]   ;;  %s9481_s8 = inlined_call_operand.hbm [shape: f32[4,1,384], index: 8, kind: input, shape index: {}]   ;;  %s9482_s9 = inlined_call_operand.hbm [shape: bf16[4,128,128], index: 9, kind: input, shape index: {}]   ;;  %s9483_s10 = inlined_call_operand.hbm [shape: f32[4,1,128], index: 10, kind: input, shape index: {}]   ;;  %s9484_s11 = inlined_call_operand.hbm [shape: f32[4,1,128], index: 11, kind: input, shape index: {}]   ;;  %s9485_s12 = inlined_call_operand.hbm [shape: f32[4,1,128], index: 12, kind: input, shape index: {}]   ;;  %s9486_s13 = inlined_call_operand.hbm [shape: bf16[4,128,2048], index: 13, kind: input, shape index: {}]   ;;  %s9487_s14 = inlined_call_operand.hbm [shape: f32[4,1,2048], index: 14, kind: input, shape index: {}]   ;;  %s9488_s15 = inlined_call_operand.hbm [shape: bf16[4,2048,128], index: 15, kind: input, shape index: {}]   ;;  %s9489_s16 = inlined_call_operand.hbm [shape: f32[4,1,128], index: 16, kind: input, shape index: {}]   ;;  %s9490_s17 = inlined_call_operand.hbm [shape: f32[4,1,128], index: 17, kind: input, shape index: {}]   ;;  %s9491_s18 = inlined_call_operand.hbm [shape: f32[4,1,128], index: 18, kind: input, shape index: {}]   ;;  %s9492_s19 = inlined_call_operand.hbm [shape: f32[1,128], index: 19, kind: input, shape index: {}]   ;;  %s9493_s20 = inlined_call_operand.hbm [shape: f32[1,128], index: 20, kind: input, shape index: {}]   ;;  %s9494_s21 = inlined_call_operand.hbm [shape: bf16[128,128], index: 21, kind: input, shape index: {}]   ;;  %s9495_s22 = inlined_call_operand.hbm [shape: f32[1,128], index: 22, kind: input, shape index: {}]   ;;  %s9496_s23 = inlined_call_operand.hbm [shape: f32[2,128], index: 23, kind: output, shape index: {}]  }
   0x1   :  { %9530 = sst [smem:[#allocation44_spill]] %s9473_s0 }
   0x2   :  { %9531 = sst [smem:[#allocation45_spill]] %s9474_s1 }
   0x3   :  { %9532 = sst [smem:[#allocation46_spill]] %s9475_s2 }
   0x4   :  { %9533 = sst [smem:[#allocation47_spill]] %s9476_s3 }
   0x5   :  { %9534 = sst [smem:[#allocation48_spill]] %s9477_s4 }
   0x6   :  { %9535 = sst [smem:[#allocation49_spill]] %s9478_s5 }
   0x7   :  { %9536 = sst [smem:[#allocation50_spill]] %s9479_s6 }
   0x8   :  { %9537 = sst [smem:[#allocation51_spill]] %s9480_s7 }
   0x9   :  { %9538 = sst [smem:[#allocation52_spill]] %s9481_s8 }
   0xa   :  { %9539 = sst [smem:[#allocation53_spill]] %s9489_s16 }
   0xb   :  { %9540 = sst [smem:[#allocation54_spill]] %s9490_s17 }
   0xc   :  { %9541 = sst [smem:[#allocation55_spill]] %s9491_s18 }
   0xd   :  { %9542 = sst [smem:[#allocation56_spill]] %s9492_s19 }
   0xe   :  { %9543 = sst [smem:[#allocation57_spill]] %s9493_s20 }
   0xf   :  { %9544 = sst [smem:[#allocation58_spill]] %s9494_s21 }
  0x10   :  { %9545 = sst [smem:[#allocation59_spill]] %s9495_s22 }
  0x11   :  { %9546 = sst [smem:[#allocation60_spill]] %s9496_s23 }
  0x12   :  { %28 = vsyncpa [#allocation4], 0 }
  0x13   :  { %29 = vsyncpa [#allocation7], 0 }
  0x14   :  { %30 = vsyncpa [#allocation10], 0 }
  0x15   :  { %31 = vsyncpa [#allocation26], 0 }
  0x16   :  { %32 = vsyncpa [#allocation5], 0  ;;  %s8333_s4 = smov 0   ;;  %s8335_s30 = smov 0  }
  0x17   :  { %s8337_s24 = smov 0   ;;  %s8339_s25 = smov 0  }
  0x18 LB: > { %9547 = sst [smem:[#allocation37_spill]] %s8169_s30  ;;  %s8352_s5 = sadd.s32 4294967295, %s8177_s25   ;;  %s8177_s25 = sphi %s8339_s25, %s9611_s25   ;;  %s8173_s24 = sphi %s8337_s24, %s9614_s24   ;;  %s8169_s30 = sphi %s8335_s30, %s9613_s30   ;;  %s8165_s4 = sphi %s8333_s4, %s9612_s4  }
  0x19   : > { %9548 = sst [smem:[#allocation38_spill]] %s8173_s24  ;;  %p205_p0 = scmp.ne.s32.totalorder %s8169_s30, %s8165_s4 }
  0x1a   : > { %9549 = sst [smem:[#allocation39_spill]] %s8352_s5  ;;  %p9511_p1 = scmp.eq.s32.totalorder %s8352_s5, 0 }
  0x1b   : > { %p6330_p2 = scmp.ge.s32.totalorder %s8177_s25, 1  ;;  %p607_p3 = scmp.lt.s32.totalorder %s8177_s25, 5 }
  0x1c   : > { %p8361_p5 = por %p9511_p1, %p205_p0  ;;  %s8179_s2 = smov [#allocation3]  }
  0x1d   : > { %p8365_p6 = pnand %p6330_p2, %p607_p3  ;;  %s629_s6 = sshll.u32 %s8179_s2, 4  ;;  %s630_s6 = int_to_ptr.vmem [resolvable:$true] %s629_s6 }
  0x1e   : > { %s9550_s1 = scalar_select %p8361_p5, 1, 0 }
  0x1f   : > { %s9552_s26 = scalar_select %p8365_p6, 1, 0 }
  0x20   : > { %9551 = sst [smem:[#allocation40_spill]] %s9550_s1  ;;  %p7177_p7 = pneg %p8365_p6 }
  0x21   : > { %9553 = sst [smem:[#allocation41_spill]] %s9552_s26  ;;  %s8372_s27 = sadd.s32 1, %s8177_s25  }
  0x22   : > { %9554 = sst [smem:[#allocation42_spill]] %s8372_s27  ;;  %p8376_p8 = pnand %p7177_p7, %p9511_p1 }
  0x23   : > { %s189_s28 = ssub.s32 %s8177_s25, %s8372_s27  ;;  %s192_s3 = sadd.s32 1, %s8173_s24 }
  0x24   : > { %s9555_s7 = scalar_select %p8376_p8, 1, 0 }
  0x25   : > { %p8382_p9 = scmp.eq.s32.totalorder %s189_s28, 0  ;;  %p199_p10 = scmp.ne.s32.totalorder %s8173_s24, %s8169_s30 }
  0x26   : > { %p8391_p11 = pneg %p8376_p8  ;;  %s7558_s4 = scalar_lea.vmem %s630_s6, 32 }
  0x27   : > { %p7559_p12 = scmp.ne.s32.totalorder %s630_s6, %s7558_s4  ;;  %p7566_p2 = scmp.lt.s32.totalorder %s630_s6, %s630_s6 }
  0x28   : > { %s9557_s0 = scalar_select %p8391_p11, 1, 0 }
  0x29   : > { %p7561_p13 = pnand %p7559_p12, %p8391_p11  ;;  %p7567_p3 = scmp.lt.s32.totalorder %s7558_s4, %s7558_s4 }
  0x2b   : > { %p7562_p0 = pneg %p7561_p13  ;;  %p7568_p7 = por %p7567_p3, %p7566_p2 }
  0x2d   : > { %p7569_p4 = pnand %p7568_p7, %p7562_p0 }
  0x2f   : > { %7572 = shalt.err (!%p7569_p4)
}
  0x30   : > { %s9558_s27 = sld [smem:[#allocation47_spill]]  ;;  %p200_p12 = scmp.eq.s32.totalorder %s8177_s25, 0 }
  0x31   : > { %s8405_s4 = scalar_select %p8382_p9, %s8173_s24, %s192_s3  }
  0x32   : > { %p7247_p4 = scmp.lt.s32.totalorder %s8177_s25, 4  ;;  %s719_s23 = sand.u32 1, %s8177_s25  }
  0x33   : > { %9559 = sst [smem:[#allocation43_spill]] %s8405_s4  ;;  %s8411_s1 = sand.u32 1, %s8173_s24  }
  0x34   : > { %p201_p13 = por %p200_p12, %p199_p10  ;;  %s7111_s2 = smul.u32 192, %s8411_s1 }
  0x35   : > { %s7112_s28 = smul.u32 3072, %s8177_s25  ;;  %s8429_s4 = scalar_lea.sflag [#allocation4], %s719_s23 }
  0x36   : > { %7180 = dma.hbm_to_vmem [thread:$0]  (!%p8376_p8), %s9558_s27, 32, %s630_s6, [#allocation4]  }
  0x37   : > { %p8418_p0 = pnand %p7247_p4, %p201_p13  ;;  %s9561_s6 = sld [smem:[#allocation51_spill]] }
  0x38   : > { %s723_s29 = scalar_lea.vmem [#allocation11], %s7111_s2 }
  0x39   : > { %s9560_s5 = scalar_select %p8418_p0, 1, 0 }
  0x3a   : > { %s730_s3 = sshll.u32 %s723_s29, 4  ;;  %p8435_p10 = pneg %p8418_p0  ;;  %s8427_s3 = int_to_ptr.vmem [resolvable:$true] %s730_s3 }
  0x3c   : > { %s9562_s30 = scalar_select %p8435_p10, 1, 0 }
  0x3d   : > { %s8425_s27 = scalar_lea.hbm %s9561_s6, %s7112_s28  ;;  %s7578_s2 = scalar_lea.hbm %s9561_s6, 12288 }
  0x3e   : > { %s7573_s24 = scalar_lea.hbm %s8425_s27, 3072  ;;  %p7579_p7 = scmp.lt.s32.totalorder %s8425_s27, %s9561_s6 }
  0x3f   : > { %p7574_p9 = scmp.ne.s32.totalorder %s8425_s27, %s7573_s24  ;;  %p7580_p12 = scmp.lt.s32.totalorder %s7578_s2, %s7573_s24 }
  0x41   : > { %p7576_p2 = pnand %p8435_p10, %p7574_p9  ;;  %p7581_p4 = por %p7580_p12, %p7579_p7 }
  0x43   : > { %p7577_p3 = pneg %p7576_p2 }
  0x45   : > { %p7582_p13 = pnand %p7581_p4, %p7577_p3 }
  0x47   : > { %7585 = shalt.err (!%p7582_p13)
}
  0x48   : > { %s7586_s23 = scalar_lea.vmem %s8427_s3, 3072  ;;  %s8180_s22 = smov [#allocation11]  }
  0x49   : > { %p7587_p1 = scmp.ne.s32.totalorder %s8427_s3, %s7586_s23  ;;  %s7591_s18 = sshll.u32 %s8180_s22, 4  ;;  %s7592_s18 = int_to_ptr.vmem [resolvable:$false] %s7591_s18 }
  0x4a   : > { %s7593_s26 = scalar_lea.vmem %s7592_s18, 6144  ;;  %p7594_p5 = scmp.lt.s32.totalorder %s8427_s3, %s7592_s18 }
  0x4b   : > { %p7589_p9 = pnand %p7587_p1, %p8435_p10  ;;  %p7595_p6 = scmp.lt.s32.totalorder %s7593_s26, %s7586_s23 }
  0x4d   : > { %p7590_p2 = pneg %p7589_p9  ;;  %p7596_p8 = por %p7595_p6, %p7594_p5 }
  0x4f   : > { %p7597_p11 = pnand %p7596_p8, %p7590_p2 }
  0x51   : > { %7600 = shalt.err (!%p7597_p11)
}
  0x52   : > { %s8181_s24 = smov 192   ;;  %s8182_s2 = smov 12  }
  0x53   : > { %7205 = dma.hbm_to_vmem [thread:$0]  (!%p8418_p0), %s8425_s27, 3072, %s8427_s3, %s8429_s4, %s8181_s24, %s8181_s24, %s8182_s2  }
  0x54   : > { %s7113_s22 = smul.u32 3, %s8411_s1  ;;  %s6342_s29 = sshll.u32 %s8411_s1, 6 }
  0x55   : > { %s7114_s28 = smul.u32 48, %s8177_s25  ;;  %s9563_s8 = sld [smem:[#allocation52_spill]] }
  0x56   : > { %s744_s6 = scalar_lea.vmem [#allocation12], %s7113_s22 }
  0x57   : > { %s752_s20 = sshll.u32 %s744_s6, 4  ;;  %s753_s20 = int_to_ptr.vmem [resolvable:$true] %s752_s20 }
  0x5b   : > { %s750_s26 = scalar_lea.hbm %s9563_s8, %s7114_s28  ;;  %s7606_s16 = scalar_lea.hbm %s9563_s8, 192 }
  0x5c   : > { %s7601_s19 = scalar_lea.hbm %s750_s26, 48  ;;  %p7607_p8 = scmp.lt.s32.totalorder %s750_s26, %s9563_s8 }
  0x5d   : > { %p7602_p1 = scmp.ne.s32.totalorder %s750_s26, %s7601_s19  ;;  %p7608_p11 = scmp.lt.s32.totalorder %s7606_s16, %s7601_s19 }
  0x5f   : > { %p7604_p5 = pnand %p7602_p1, %p8435_p10  ;;  %p7609_p3 = por %p7608_p11, %p7607_p8 }
  0x61   : > { %p7605_p6 = pneg %p7604_p5 }
  0x63   : > { %p7610_p7 = pnand %p7609_p3, %p7605_p6 }
  0x65   : > { %7613 = shalt.err (!%p7610_p7)
}
  0x66   : > { %s7614_s24 = scalar_lea.vmem %s753_s20, 48  ;;  %s8183_s6 = smov [#allocation12]  }
  0x67   : > { %p7615_p12 = scmp.ne.s32.totalorder %s753_s20, %s7614_s24  ;;  %s7619_s2 = sshll.u32 %s8183_s6, 4  ;;  %s7620_s2 = int_to_ptr.vmem [resolvable:$false] %s7619_s2 }
  0x68   : > { %s7621_s22 = scalar_lea.vmem %s7620_s2, 96  ;;  %p7622_p9 = scmp.lt.s32.totalorder %s753_s20, %s7620_s2 }
  0x69   : > { %p7617_p4 = pnand %p7615_p12, %p8435_p10  ;;  %p7623_p2 = scmp.lt.s32.totalorder %s7621_s22, %s7614_s24 }
  0x6b   : > { %p7618_p13 = pneg %p7617_p4  ;;  %p7624_p1 = por %p7623_p2, %p7622_p9 }
  0x6d   : > { %p7625_p5 = pnand %p7624_p1, %p7618_p13 }
  0x6f   : > { %7628 = shalt.err (!%p7625_p5)
}
  0x70   : > { %7208 = dma.hbm_to_vmem [thread:$0]  (!%p8418_p0), %s750_s26, 48, %s753_s20, %s8429_s4  }
  0x71   : > { %s6716_s16 = sshll.u32 %s8177_s25, 10  ;;  %s763_s17 = scalar_lea.vmem [#allocation13], %s6342_s29 }
  0x72   : > { %s770_s19 = sshll.u32 %s763_s17, 4  ;;  %s8483_s18 = scalar_lea.hbm %s9482_s9, %s6716_s16  ;;  %s8485_s19 = int_to_ptr.vmem [resolvable:$true] %s770_s19 }
  0x73   : > { %s7629_s23 = scalar_lea.hbm %s8483_s18, 1024  ;;  %s7634_s29 = scalar_lea.hbm %s9482_s9, 4096 }
  0x74   : > { %p7630_p6 = scmp.ne.s32.totalorder %s8483_s18, %s7629_s23  ;;  %p7635_p3 = scmp.lt.s32.totalorder %s8483_s18, %s9482_s9 }
  0x75   : > { %p7636_p7 = scmp.lt.s32.totalorder %s7634_s29, %s7629_s23 }
  0x76   : > { %p7632_p8 = pnand %p7630_p6, %p8435_p10 }
  0x77   : > { %p7637_p12 = por %p7636_p7, %p7635_p3 }
  0x78   : > { %p7633_p11 = pneg %p7632_p8 }
  0x7a   : > { %p7638_p4 = pnand %p7637_p12, %p7633_p11 }
  0x7c   : > { %7641 = shalt.err (!%p7638_p4)
}
  0x7d   : > { %s7642_s24 = scalar_lea.vmem %s8485_s19, 1024  ;;  %s8184_s6 = smov [#allocation13]  }
  0x7e   : > { %p7643_p13 = scmp.ne.s32.totalorder %s8485_s19, %s7642_s24  ;;  %s7647_s2 = sshll.u32 %s8184_s6, 4  ;;  %s7648_s2 = int_to_ptr.vmem [resolvable:$false] %s7647_s2 }
  0x7f   : > { %s7649_s22 = scalar_lea.vmem %s7648_s2, 2048  ;;  %p7650_p1 = scmp.lt.s32.totalorder %s8485_s19, %s7648_s2 }
  0x80   : > { %p7645_p9 = pnand %p7643_p13, %p8435_p10  ;;  %p7651_p5 = scmp.lt.s32.totalorder %s7649_s22, %s7642_s24 }
  0x82   : > { %p7646_p2 = pneg %p7645_p9  ;;  %p7652_p6 = por %p7651_p5, %p7650_p1 }
  0x84   : > { %p7653_p8 = pnand %p7652_p6, %p7646_p2 }
  0x86   : > { %7656 = shalt.err (!%p7653_p8)
}
  0x87   : > { %s8185_s16 = smov 64   ;;  %s9521_s17 = smov 4  }
  0x88   : > { %7211 = dma.hbm_to_vmem [thread:$0]  (!%p8418_p0), %s8483_s18, 1024, %s8485_s19, %s8429_s4, %s8185_s16, %s8185_s16, %s9521_s17  }
  0x89   : > { %s8512_s21 = sshll.u32 %s8177_s25, 4  ;;  %s783_s26 = scalar_lea.vmem [#allocation14], %s8411_s1 }
  0x8a   : > { %s788_s20 = scalar_lea.hbm %s9483_s10, %s8512_s21  ;;  %s790_s29 = sshll.u32 %s783_s26, 4  ;;  %s791_s29 = int_to_ptr.vmem [resolvable:$true] %s790_s29 }
  0x8b   : > { %s7657_s27 = scalar_lea.hbm %s788_s20, 16  ;;  %s7662_s6 = scalar_lea.hbm %s9483_s10, 64 }
  0x8c   : > { %p7658_p11 = scmp.ne.s32.totalorder %s788_s20, %s7657_s27  ;;  %p7663_p12 = scmp.lt.s32.totalorder %s788_s20, %s9483_s10 }
  0x8d   : > { %p7664_p4 = scmp.lt.s32.totalorder %s7662_s6, %s7657_s27 }
  0x8e   : > { %p7660_p3 = pnand %p7658_p11, %p8435_p10 }
  0x8f   : > { %p7665_p13 = por %p7664_p4, %p7663_p12 }
  0x90   : > { %p7661_p7 = pneg %p7660_p3 }
  0x92   : > { %p7666_p9 = pnand %p7665_p13, %p7661_p7 }
  0x94   : > { %7669 = shalt.err (!%p7666_p9)
}
  0x95   : > { %s7670_s2 = scalar_lea.vmem %s791_s29, 16  ;;  %s8187_s22 = smov [#allocation14]  }
  0x96   : > { %p7671_p2 = scmp.ne.s32.totalorder %s791_s29, %s7670_s2  ;;  %s7675_s28 = sshll.u32 %s8187_s22, 4  ;;  %s7676_s28 = int_to_ptr.vmem [resolvable:$false] %s7675_s28 }
  0x97   : > { %s7677_s23 = scalar_lea.vmem %s7676_s28, 32  ;;  %p7678_p6 = scmp.lt.s32.totalorder %s791_s29, %s7676_s28 }
  0x98   : > { %p7673_p1 = pnand %p7671_p2, %p8435_p10  ;;  %p7679_p8 = scmp.lt.s32.totalorder %s7677_s23, %s7670_s2 }
  0x9a   : > { %p7674_p5 = pneg %p7673_p1  ;;  %p7680_p11 = por %p7679_p8, %p7678_p6 }
  0x9c   : > { %p7681_p3 = pnand %p7680_p11, %p7674_p5 }
  0x9e   : > { %7684 = shalt.err (!%p7681_p3)
}
  0x9f   : > { %7214 = dma.hbm_to_vmem [thread:$0]  (!%p8418_p0), %s788_s20, 16, %s791_s29, %s8429_s4  }
  0xa0   : > { %s805_s3 = scalar_lea.hbm %s9484_s11, %s8512_s21  ;;  %s800_s24 = scalar_lea.vmem [#allocation15], %s8411_s1 }
  0xa1   : > { %s807_s6 = sshll.u32 %s800_s24, 4  ;;  %s7685_s19 = scalar_lea.hbm %s805_s3, 16  ;;  %s808_s6 = int_to_ptr.vmem [resolvable:$true] %s807_s6 }
  0xa2   : > { %p7686_p7 = scmp.ne.s32.totalorder %s805_s3, %s7685_s19  ;;  %s7690_s22 = scalar_lea.hbm %s9484_s11, 64 }
  0xa3   : > { %p7691_p13 = scmp.lt.s32.totalorder %s805_s3, %s9484_s11  ;;  %p7692_p9 = scmp.lt.s32.totalorder %s7690_s22, %s7685_s19 }
  0xa4   : > { %p7688_p12 = pnand %p7686_p7, %p8435_p10 }
  0xa5   : > { %p7693_p2 = por %p7692_p9, %p7691_p13 }
  0xa6   : > { %p7689_p4 = pneg %p7688_p12 }
  0xa8   : > { %p7694_p1 = pnand %p7693_p2, %p7689_p4 }
  0xaa   : > { %7697 = shalt.err (!%p7694_p1)
}
  0xab   : > { %s7698_s20 = scalar_lea.vmem %s808_s6, 16  ;;  %s8188_s29 = smov [#allocation15]  }
  0xac   : > { %p7699_p5 = scmp.ne.s32.totalorder %s808_s6, %s7698_s20  ;;  %s7703_s26 = sshll.u32 %s8188_s29, 4  ;;  %s7704_s26 = int_to_ptr.vmem [resolvable:$false] %s7703_s26 }
  0xad   : > { %s7705_s27 = scalar_lea.vmem %s7704_s26, 32  ;;  %p7706_p11 = scmp.lt.s32.totalorder %s808_s6, %s7704_s26 }
  0xae   : > { %p7701_p6 = pnand %p7699_p5, %p8435_p10  ;;  %p7707_p3 = scmp.lt.s32.totalorder %s7705_s27, %s7698_s20 }
  0xb0   : > { %p7702_p8 = pneg %p7701_p6  ;;  %p7708_p7 = por %p7707_p3, %p7706_p11 }
  0xb2   : > { %p7709_p12 = pnand %p7708_p7, %p7702_p8 }
  0xb4   : > { %7712 = shalt.err (!%p7709_p12)
}
  0xb5   : > { %7217 = dma.hbm_to_vmem [thread:$0]  (!%p8418_p0), %s805_s3, 16, %s808_s6, %s8429_s4  }
  0xb6   : > { %s8554_s18 = scalar_lea.hbm %s9485_s12, %s8512_s21  ;;  %s817_s2 = scalar_lea.vmem [#allocation16], %s8411_s1 }
  0xb7   : > { %s824_s22 = sshll.u32 %s817_s2, 4  ;;  %s9523_s28 = sshll.u32 %s8411_s1, 10  ;;  %s825_s22 = int_to_ptr.vmem [resolvable:$true] %s824_s22 }
  0xb8   : > { %s7713_s23 = scalar_lea.hbm %s8554_s18, 16  ;;  %s7718_s3 = scalar_lea.hbm %s9485_s12, 64 }
  0xb9   : > { %p7714_p4 = scmp.ne.s32.totalorder %s8554_s18, %s7713_s23  ;;  %p7719_p2 = scmp.lt.s32.totalorder %s8554_s18, %s9485_s12 }
  0xba   : > { %p7720_p1 = scmp.lt.s32.totalorder %s7718_s3, %s7713_s23 }
  0xbb   : > { %p7716_p13 = pnand %p7714_p4, %p8435_p10 }
  0xbc   : > { %p7721_p5 = por %p7720_p1, %p7719_p2 }
  0xbd   : > { %p7717_p9 = pneg %p7716_p13 }
  0xbf   : > { %p7722_p6 = pnand %p7721_p5, %p7717_p9 }
  0xc1   : > { %7725 = shalt.err (!%p7722_p6)
}
  0xc2   : > { %s7726_s27 = scalar_lea.vmem %s825_s22, 16  ;;  %s8189_s24 = smov [#allocation16]  }
  0xc3   : > { %p7727_p8 = scmp.ne.s32.totalorder %s825_s22, %s7726_s27  ;;  %s7731_s19 = sshll.u32 %s8189_s24, 4  ;;  %s7732_s19 = int_to_ptr.vmem [resolvable:$false] %s7731_s19 }
  0xc4   : > { %s7733_s2 = scalar_lea.vmem %s7732_s19, 32  ;;  %p7734_p7 = scmp.lt.s32.totalorder %s825_s22, %s7732_s19 }
  0xc5   : > { %p7729_p11 = pnand %p7727_p8, %p8435_p10  ;;  %p7735_p12 = scmp.lt.s32.totalorder %s7733_s2, %s7726_s27 }
  0xc7   : > { %p7730_p3 = pneg %p7729_p11  ;;  %p7736_p4 = por %p7735_p12, %p7734_p7 }
  0xc9   : > { %p7737_p13 = pnand %p7736_p4, %p7730_p3 }
  0xcb   : > { %7740 = shalt.err (!%p7737_p13)
}
  0xcc   : > { %7220 = dma.hbm_to_vmem [thread:$0]  (!%p8418_p0), %s8554_s18, 16, %s825_s22, %s8429_s4  }
  0xcd   : > { %s6717_s23 = sshll.u32 %s8177_s25, 14  ;;  %s835_s6 = scalar_lea.vmem [#allocation17], %s9523_s28 }
  0xce   : > { %s8581_s3 = scalar_lea.hbm %s9486_s13, %s6717_s23  ;;  %s842_s26 = sshll.u32 %s835_s6, 4  ;;  %s8585_s26 = int_to_ptr.vmem [resolvable:$true] %s842_s26 }
  0xcf   : > { %s7741_s27 = scalar_lea.hbm %s8581_s3, 16384  ;;  %s7746_s24 = scalar_lea.hbm %s9486_s13, 65536 }
  0xd0   : > { %p7742_p9 = scmp.ne.s32.totalorder %s8581_s3, %s7741_s27  ;;  %p7747_p5 = scmp.lt.s32.totalorder %s8581_s3, %s9486_s13 }
  0xd1   : > { %p7748_p6 = scmp.lt.s32.totalorder %s7746_s24, %s7741_s27 }
  0xd2   : > { %p7744_p2 = pnand %p7742_p9, %p8435_p10 }
  0xd3   : > { %p7749_p8 = por %p7748_p6, %p7747_p5 }
  0xd4   : > { %p7745_p1 = pneg %p7744_p2 }
  0xd6   : > { %p7750_p11 = pnand %p7749_p8, %p7745_p1 }
  0xd8   : > { %7753 = shalt.err (!%p7750_p11)
}
  0xd9   : > { %s7754_s20 = scalar_lea.vmem %s8585_s26, 16384  ;;  %s8190_s29 = smov [#allocation17]  }
  0xda   : > { %p7755_p3 = scmp.ne.s32.totalorder %s8585_s26, %s7754_s20  ;;  %s7759_s6 = sshll.u32 %s8190_s29, 4  ;;  %s7760_s6 = int_to_ptr.vmem [resolvable:$false] %s7759_s6 }
  0xdb   : > { %s7761_s18 = scalar_lea.vmem %s7760_s6, 32768  ;;  %p7762_p4 = scmp.lt.s32.totalorder %s8585_s26, %s7760_s6 }
  0xdc   : > { %p7757_p7 = pnand %p7755_p3, %p8435_p10  ;;  %p7763_p13 = scmp.lt.s32.totalorder %s7761_s18, %s7754_s20 }
  0xde   : > { %p7758_p12 = pneg %p7757_p7  ;;  %p7764_p9 = por %p7763_p13, %p7762_p4 }
  0xe0   : > { %p7765_p2 = pnand %p7764_p9, %p7758_p12 }
  0xe2   : > { %7768 = shalt.err (!%p7765_p2)
}
  0xe3   : > { %s8191_s27 = smov 1024   ;;  %s6351_s22 = sshll.u32 %s8411_s1, 4 }
  0xe4   : > { %7223 = dma.hbm_to_vmem [thread:$0]  (!%p8418_p0), %s8581_s3, 16384, %s8585_s26, %s8429_s4, %s8191_s27, %s8191_s27, %s8185_s16  }
  0xe5   : > { %s6718_s24 = sshll.u32 %s8177_s25, 8  ;;  %s856_s29 = scalar_lea.vmem [#allocation18], %s6351_s22 }
  0xe6   : > { %s8614_s20 = scalar_lea.hbm %s9487_s14, %s6718_s24  ;;  %s864_s6 = sshll.u32 %s856_s29, 4  ;;  %s865_s6 = int_to_ptr.vmem [resolvable:$true] %s864_s6 }
  0xe7   : > { %s8621_s28 = scalar_lea.hbm %s9488_s15, %s6717_s23  ;;  %s7769_s3 = scalar_lea.hbm %s8614_s20, 256 }
  0xe8   : > { %p7770_p1 = scmp.ne.s32.totalorder %s8614_s20, %s7769_s3  ;;  %s7774_s24 = scalar_lea.hbm %s9487_s14, 1024 }
  0xe9   : > { %p7775_p8 = scmp.lt.s32.totalorder %s8614_s20, %s9487_s14  ;;  %p7776_p11 = scmp.lt.s32.totalorder %s7774_s24, %s7769_s3 }
  0xea   : > { %p7772_p5 = pnand %p7770_p1, %p8435_p10 }
  0xeb   : > { %p7777_p3 = por %p7776_p11, %p7775_p8 }
  0xec   : > { %p7773_p6 = pneg %p7772_p5 }
  0xee   : > { %p7778_p7 = pnand %p7777_p3, %p7773_p6 }
  0xf0   : > { %7781 = shalt.err (!%p7778_p7)
}
  0xf1   : > { %s7782_s25 = scalar_lea.vmem %s865_s6, 256  ;;  %s8192_s17 = smov [#allocation18]  }
  0xf2   : > { %p7783_p12 = scmp.ne.s32.totalorder %s865_s6, %s7782_s25  ;;  %s7787_s23 = sshll.u32 %s8192_s17, 4  ;;  %s7788_s23 = int_to_ptr.vmem [resolvable:$false] %s7787_s23 }
  0xf3   : > { %s7789_s22 = scalar_lea.vmem %s7788_s23, 512  ;;  %p7790_p9 = scmp.lt.s32.totalorder %s865_s6, %s7788_s23 }
  0xf4   : > { %p7785_p4 = pnand %p7783_p12, %p8435_p10  ;;  %p7791_p2 = scmp.lt.s32.totalorder %s7789_s22, %s7782_s25 }
  0xf6   : > { %p7786_p13 = pneg %p7785_p4  ;;  %p7792_p1 = por %p7791_p2, %p7790_p9 }
  0xf8   : > { %p7793_p5 = pnand %p7792_p1, %p7786_p13 }
  0xfa   : > { %7796 = shalt.err (!%p7793_p5)
}
  0xfb   : > { %7226 = dma.hbm_to_vmem [thread:$0]  (!%p8418_p0), %s8614_s20, 256, %s865_s6, %s8429_s4  }
  0xfc   : > { %s9564_s29 = sshll.u32 %s8411_s1, 10  ;;  %s8193_s26 = smov [#allocation6]  }
  0xfd   : > { %s875_s18 = scalar_lea.vmem [#allocation19], %s9564_s29  ;;  %s8644_s27 = sshll.u32 %s8193_s26, 4  ;;  %s641_s27 = int_to_ptr.vmem [resolvable:$true] %s8644_s27 }
  0xfe   : > { %s882_s3 = sshll.u32 %s875_s18, 4  ;;  %s7797_s24 = scalar_lea.hbm %s8621_s28, 16384  ;;  %s8642_s3 = int_to_ptr.vmem [resolvable:$true] %s882_s3 }
  0xff   : > { %p7798_p6 = scmp.ne.s32.totalorder %s8621_s28, %s7797_s24  ;;  %s7802_s25 = scalar_lea.hbm %s9488_s15, 65536 }
 0x100   : > { %p7803_p3 = scmp.lt.s32.totalorder %s8621_s28, %s9488_s15  ;;  %p7804_p7 = scmp.lt.s32.totalorder %s7802_s25, %s7797_s24 }
 0x101   : > { %p7800_p8 = pnand %p7798_p6, %p8435_p10 }
 0x102   : > { %p7805_p12 = por %p7804_p7, %p7803_p3 }
 0x103   : > { %p7801_p11 = pneg %p7800_p8 }
 0x105   : > { %p7806_p4 = pnand %p7805_p12, %p7801_p11 }
 0x107   : > { %7809 = shalt.err (!%p7806_p4)
}
 0x108   : > { %s7810_s20 = scalar_lea.vmem %s8642_s3, 16384  ;;  %s8194_s6 = smov [#allocation19]  }
 0x109   : > { %p7811_p13 = scmp.ne.s32.totalorder %s8642_s3, %s7810_s20  ;;  %s7815_s22 = sshll.u32 %s8194_s6, 4  ;;  %s7816_s22 = int_to_ptr.vmem [resolvable:$false] %s7815_s22 }
 0x10a   : > { %s7817_s29 = scalar_lea.vmem %s7816_s22, 32768  ;;  %p7818_p1 = scmp.lt.s32.totalorder %s8642_s3, %s7816_s22 }
 0x10b   : > { %p7813_p9 = pnand %p7811_p13, %p8435_p10  ;;  %p7819_p5 = scmp.lt.s32.totalorder %s7817_s29, %s7810_s20 }
 0x10d   : > { %p7814_p2 = pneg %p7813_p9  ;;  %p7820_p6 = por %p7819_p5, %p7818_p1 }
 0x10f   : > { %p7821_p8 = pnand %p7820_p6, %p7814_p2 }
 0x111   : > { %7824 = shalt.err (!%p7821_p8)
}
 0x112   : > { %s9565_s18 = smov 4   ;;  %s7836_s26 = scalar_lea.vmem %s641_s27, 16 }
 0x113   : > { %7229 = dma.hbm_to_vmem [thread:$0]  (!%p8418_p0), %s8621_s28, 16384, %s8642_s3, %s8429_s4, %s8185_s16, %s8185_s16, %s9565_s18  }
 0x114   : > { %p7837_p11 = scmp.ne.s32.totalorder %s641_s27, %s7836_s26  ;;  %p9566_p3 = scmp.ne.s32.totalorder %s9557_s0, 0 }
 0x115   : > { %s7843_s24 = scalar_lea.vmem %s641_s27, 32  ;;  %p7844_p4 = scmp.lt.s32.totalorder %s641_s27, %s641_s27 }
 0x116   : > { %p7839_p7 = pnand %p7837_p11, %p9566_p3  ;;  %p7845_p13 = scmp.lt.s32.totalorder %s7843_s24, %s7836_s26 }
 0x118   : > { %p7840_p12 = pneg %p7839_p7  ;;  %p7846_p9 = por %p7845_p13, %p7844_p4 }
 0x11a   : > { %p7847_p2 = pnand %p7846_p9, %p7840_p12 }
 0x11c   : > { %7850 = shalt.err (!%p7847_p2)
}
 0x11d   : > { %p9567_p1 = scmp.ne.s32.totalorder %s9555_s7, 0  ;;  %s9568_s25 = sld [smem:[#allocation48_spill]] }
 0x11e   : > { %s9569_s17 = sld [smem:[#allocation53_spill]]  ;;  %s895_s20 = scalar_lea.vmem [#allocation20], %s8411_s1 }
 0x11f   : > { %s902_s6 = sshll.u32 %s895_s20, 4  ;;  %s903_s6 = int_to_ptr.vmem [resolvable:$true] %s902_s6 }
 0x123   : > { %7183 = dma.hbm_to_vmem [thread:$0]  (!%p9567_p1), %s9568_s25, 16, %s641_s27, [#allocation7]  }
 0x124   : > { %s900_s23 = scalar_lea.hbm %s9569_s17, %s8512_s21  ;;  %s7856_s24 = scalar_lea.hbm %s9569_s17, 64 }
 0x125   : > { %s7851_s22 = scalar_lea.hbm %s900_s23, 16  ;;  %p7857_p11 = scmp.lt.s32.totalorder %s900_s23, %s9569_s17 }
 0x126   : > { %p7852_p5 = scmp.ne.s32.totalorder %s900_s23, %s7851_s22  ;;  %p7858_p7 = scmp.lt.s32.totalorder %s7856_s24, %s7851_s22 }
 0x128   : > { %p7854_p6 = pnand %p7852_p5, %p8435_p10  ;;  %p7859_p12 = por %p7858_p7, %p7857_p11 }
 0x12a   : > { %p7855_p8 = pneg %p7854_p6 }
 0x12c   : > { %p7860_p4 = pnand %p7859_p12, %p7855_p8 }
 0x12e   : > { %7863 = shalt.err (!%p7860_p4)
}
 0x12f   : > { %s7864_s27 = scalar_lea.vmem %s903_s6, 16  ;;  %s8195_s25 = smov [#allocation20]  }
 0x130   : > { %p7865_p13 = scmp.ne.s32.totalorder %s903_s6, %s7864_s27  ;;  %s7869_s28 = sshll.u32 %s8195_s25, 4  ;;  %s7870_s28 = int_to_ptr.vmem [resolvable:$false] %s7869_s28 }
 0x131   : > { %s7871_s3 = scalar_lea.vmem %s7870_s28, 32  ;;  %p7872_p5 = scmp.lt.s32.totalorder %s903_s6, %s7870_s28 }
 0x132   : > { %p7867_p9 = pnand %p7865_p13, %p8435_p10  ;;  %p7873_p6 = scmp.lt.s32.totalorder %s7871_s3, %s7864_s27 }
 0x134   : > { %p7868_p2 = pneg %p7867_p9  ;;  %p7874_p1 = por %p7873_p6, %p7872_p5 }
 0x136   : > { %p7875_p3 = pnand %p7874_p1, %p7868_p2 }
 0x138   : > { %7878 = shalt.err (!%p7875_p3)
}
 0x139   : > { %7232 = dma.hbm_to_vmem [thread:$0]  (!%p8418_p0), %s900_s23, 16, %s903_s6, %s8429_s4  }
 0x13a   : > { %s8196_s20 = smov [#allocation8]   ;;  %s8197_s29 = smov [#allocation9]  }
 0x13b   : > { %s651_s22 = sshll.u32 %s8196_s20, 4  ;;  %s662_s26 = sshll.u32 %s8197_s29, 4  ;;  %s652_s22 = int_to_ptr.vmem [resolvable:$true] %s651_s22  ;;  %s663_s26 = int_to_ptr.vmem [resolvable:$true] %s662_s26 }
 0x13c   : > { %s7890_s24 = scalar_lea.vmem %s652_s22, 64  ;;  %p9570_p11 = scmp.ne.s32.totalorder %s9557_s0, 0 }
 0x13d   : > { %p7891_p8 = scmp.ne.s32.totalorder %s652_s22, %s7890_s24  ;;  %p7898_p4 = scmp.lt.s32.totalorder %s652_s22, %s652_s22 }
 0x13e   : > { %p7899_p13 = scmp.lt.s32.totalorder %s7890_s24, %s7890_s24 }
 0x13f   : > { %p7893_p7 = pnand %p7891_p8, %p9570_p11 }
 0x140   : > { %p7900_p9 = por %p7899_p13, %p7898_p4 }
 0x141   : > { %p7894_p12 = pneg %p7893_p7 }
 0x143   : > { %p7901_p1 = pnand %p7900_p9, %p7894_p12 }
 0x145   : > { %7904 = shalt.err (!%p7901_p1)
}
 0x146   : > { %p9571_p3 = scmp.ne.s32.totalorder %s9555_s7, 0  ;;  %s9572_s23 = sld [smem:[#allocation49_spill]] }
 0x147   : > { %s7916_s6 = scalar_lea.vmem %s663_s26, 16  ;;  %s7923_s27 = scalar_lea.vmem %s663_s26, 32 }
 0x148   : > { %p7917_p2 = scmp.ne.s32.totalorder %s663_s26, %s7916_s6  ;;  %p7924_p8 = scmp.lt.s32.totalorder %s663_s26, %s663_s26 }
 0x149   : > { %p7925_p7 = scmp.lt.s32.totalorder %s7923_s27, %s7916_s6 }
 0x14a   : > { %p7919_p5 = pnand %p7917_p2, %p9570_p11 }
 0x14b   : > { %p7926_p0 = por %p7925_p7, %p7924_p8 }
 0x14c   : > { %7186 = dma.hbm_to_vmem [thread:$0]  (!%p9571_p3), %s9572_s23, 64, %s652_s22, [#allocation7]  }
 0x14d   : > { %p7920_p6 = pneg %p7919_p5 }
 0x14f   : > { %p7927_p4 = pnand %p7926_p0, %p7920_p6 }
 0x151   : > { %7930 = shalt.err (!%p7927_p4)
}
 0x152   : > { %s9573_s3 = sld [smem:[#allocation50_spill]]  ;;  %s8198_s20 = smov [#allocation25]  }
 0x153   : > { %s694_s22 = sshll.u32 %s8198_s20, 4  ;;  %s9574_s19 = sld [smem:[#allocation54_spill]]  ;;  %s695_s22 = int_to_ptr.vmem [resolvable:$true] %s694_s22 }
 0x154   : > { %s7942_s23 = scalar_lea.vmem %s695_s22, 1024  ;;  %p7950_p9 = scmp.lt.s32.totalorder %s695_s22, %s695_s22 }
 0x155   : > { %p7943_p12 = scmp.ne.s32.totalorder %s695_s22, %s7942_s23  ;;  %p7951_p1 = scmp.lt.s32.totalorder %s7942_s23, %s7942_s23 }
 0x157   : > { %p7945_p0 = pnand %p7943_p12, %p9570_p11  ;;  %p7952_p2 = por %p7951_p1, %p7950_p9 }
 0x158   : > { %7189 = dma.hbm_to_vmem [thread:$0]  (!%p9571_p3), %s9573_s3, 16, %s663_s26, [#allocation10]  }
 0x159   : > { %s8714_s2 = scalar_lea.hbm %s9574_s19, %s8512_s21  ;;  %p7946_p13 = pneg %p7945_p0 }
 0x15b   : > { %p7953_p5 = pnand %p7952_p2, %p7946_p13 }
 0x15d   : > { %7956 = shalt.err (!%p7953_p5)
}
 0x15e   : > { %s9575_s27 = sld [smem:[#allocation58_spill]]  ;;  %s912_s25 = scalar_lea.vmem [#allocation21], %s8411_s1 }
 0x15f   : > { %s919_s28 = sshll.u32 %s912_s25, 4  ;;  %s8199_s3 = smov [#allocation23]   ;;  %s920_s28 = int_to_ptr.vmem [resolvable:$true] %s919_s28 }
 0x160   : > { %s673_s20 = sshll.u32 %s8199_s3, 4  ;;  %s7957_s29 = scalar_lea.hbm %s8714_s2, 16  ;;  %s674_s20 = int_to_ptr.vmem [resolvable:$true] %s673_s20 }
 0x161   : > { %p7958_p6 = scmp.ne.s32.totalorder %s8714_s2, %s7957_s29  ;;  %s7962_s26 = scalar_lea.hbm %s9574_s19, 64 }
 0x162   : > { %p7963_p4 = scmp.lt.s32.totalorder %s8714_s2, %s9574_s19  ;;  %p7964_p12 = scmp.lt.s32.totalorder %s7962_s26, %s7957_s29 }
 0x163   : > { %p7960_p8 = pnand %p7958_p6, %p8435_p10 }
 0x164   : > { %7198 = dma.hbm_to_vmem [thread:$0]  (!%p9571_p3), %s9575_s27, 1024, %s695_s22, [#allocation26], %s8185_s16, %s8185_s16, %s9565_s18  }
 0x165   : > { %p7961_p7 = pneg %p7960_p8  ;;  %p7965_p0 = por %p7964_p12, %p7963_p4 }
 0x167   : > { %p7966_p13 = pnand %p7965_p0, %p7961_p7 }
 0x169   : > { %7969 = shalt.err (!%p7966_p13)
}
 0x16a   : > { %s7970_s16 = scalar_lea.vmem %s920_s28, 16  ;;  %s8200_s18 = smov [#allocation21]  }
 0x16b   : > { %p7971_p9 = scmp.ne.s32.totalorder %s920_s28, %s7970_s16  ;;  %s7975_s22 = sshll.u32 %s8200_s18, 4  ;;  %s7976_s22 = int_to_ptr.vmem [resolvable:$false] %s7975_s22 }
 0x16c   : > { %s7977_s27 = scalar_lea.vmem %s7976_s22, 32  ;;  %p7978_p5 = scmp.lt.s32.totalorder %s920_s28, %s7976_s22 }
 0x16d   : > { %p7973_p1 = pnand %p7971_p9, %p8435_p10  ;;  %p7979_p6 = scmp.lt.s32.totalorder %s7977_s27, %s7970_s16 }
 0x16f   : > { %p7974_p2 = pneg %p7973_p1  ;;  %p7980_p8 = por %p7979_p6, %p7978_p5 }
 0x171   : > { %p7981_p3 = pnand %p7980_p8, %p7974_p2 }
 0x173   : > { %7984 = shalt.err (!%p7981_p3)
}
 0x174   : > { %p9576_p11 = scmp.ne.s32.totalorder %s9560_s5, 0  ;;  %s7996_s8 = scalar_lea.vmem %s674_s20, 16 }
 0x175   : > { %p7997_p7 = scmp.ne.s32.totalorder %s674_s20, %s7996_s8  ;;  %p9577_p4 = scmp.ne.s32.totalorder %s9557_s0, 0 }
 0x176   : > { %7235 = dma.hbm_to_vmem [thread:$0]  (!%p9576_p11), %s8714_s2, 16, %s920_s28, %s8429_s4  }
 0x177   : > { %p7999_p12 = pnand %p7997_p7, %p9577_p4  ;;  %s8003_s25 = scalar_lea.vmem %s674_s20, 32 }
 0x178   : > { %p8004_p13 = scmp.lt.s32.totalorder %s674_s20, %s674_s20  ;;  %p8005_p9 = scmp.lt.s32.totalorder %s8003_s25, %s7996_s8 }
 0x179   : > { %p8000_p0 = pneg %p7999_p12 }
 0x17a   : > { %p8006_p1 = por %p8005_p9, %p8004_p13 }
 0x17c   : > { %p8007_p10 = pnand %p8006_p1, %p8000_p0 }
 0x17e   : > { %8010 = shalt.err (!%p8007_p10)
}
 0x17f   : > { %p9578_p3 = scmp.ne.s32.totalorder %s9555_s7, 0  ;;  %s9579_s24 = sld [smem:[#allocation56_spill]] }
 0x180   : > { %s8201_s2 = smov [#allocation24]   ;;  %s8202_s23 = smov [#allocation27]  }
 0x181   : > { %s684_s28 = sshll.u32 %s8201_s2, 4  ;;  %s708_s26 = sshll.u32 %s8202_s23, 4  ;;  %s685_s28 = int_to_ptr.vmem [resolvable:$true] %s684_s28  ;;  %s709_s26 = int_to_ptr.vmem [resolvable:$true] %s708_s26 }
 0x182   : > { %s8022_s6 = scalar_lea.vmem %s685_s28, 16  ;;  %s8029_s16 = scalar_lea.vmem %s685_s28, 32 }
 0x183   : > { %p8023_p2 = scmp.ne.s32.totalorder %s685_s28, %s8022_s6  ;;  %p8030_p8 = scmp.lt.s32.totalorder %s685_s28, %s685_s28 }
 0x184   : > { %p8031_p10 = scmp.lt.s32.totalorder %s8029_s16, %s8022_s6 }
 0x185   : > { %7192 = dma.hbm_to_vmem [thread:$0]  (!%p9578_p3), %s9579_s24, 16, %s674_s20, [#allocation7]  }
 0x186   : > { %p8025_p5 = pnand %p8023_p2, %p9577_p4  ;;  %p8032_p7 = por %p8031_p10, %p8030_p8 }
 0x188   : > { %p8026_p6 = pneg %p8025_p5 }
 0x18a   : > { %p8033_p12 = pnand %p8032_p7, %p8026_p6 }
 0x18c   : > { %8036 = shalt.err (!%p8033_p12)
}
 0x18d   : > { %s9580_s22 = sld [smem:[#allocation57_spill]]  ;;  %s8048_s27 = scalar_lea.vmem %s709_s26, 16 }
 0x18e   : > { %p8049_p0 = scmp.ne.s32.totalorder %s709_s26, %s8048_s27  ;;  %s8055_s8 = scalar_lea.vmem %s709_s26, 32 }
 0x18f   : > { %p8056_p1 = scmp.lt.s32.totalorder %s709_s26, %s709_s26  ;;  %p8057_p2 = scmp.lt.s32.totalorder %s8055_s8, %s8048_s27 }
 0x190   : > { %p8051_p13 = pnand %p8049_p0, %p9577_p4 }
 0x191   : > { %p8058_p5 = por %p8057_p2, %p8056_p1 }
 0x192   : > { %p8052_p9 = pneg %p8051_p13 }
 0x193   : > { %7195 = dma.hbm_to_vmem [thread:$0]  (!%p9578_p3), %s9580_s22, 16, %s685_s28, [#allocation10]  }
 0x194   : > { %p8059_p8 = pnand %p8058_p5, %p8052_p9 }
 0x196   : > { %8062 = shalt.err (!%p8059_p8)
}
 0x197   : > { %s9581_s29 = sld [smem:[#allocation59_spill]]  ;;  %s929_s23 = scalar_lea.vmem [#allocation22], %s8411_s1 }
 0x198   : > { %s9582_s0 = sld [smem:[#allocation55_spill]]  ;;  %s936_s6 = sshll.u32 %s929_s23, 4  ;;  %s937_s6 = int_to_ptr.vmem [resolvable:$true] %s936_s6 }
 0x199   : > { %p9583_p6 = scmp.ne.s32.totalorder %s9562_s30, 0 }
 0x19d   : > { %7201 = dma.hbm_to_vmem [thread:$0]  (!%p9578_p3), %s9581_s29, 16, %s709_s26, [#allocation26]  }
 0x19e   : > { %s934_s28 = scalar_lea.hbm %s9582_s0, %s8512_s21  ;;  %s8068_s20 = scalar_lea.hbm %s9582_s0, 64 }
 0x19f   : > { %s8063_s16 = scalar_lea.hbm %s934_s28, 16  ;;  %p8069_p3 = scmp.lt.s32.totalorder %s934_s28, %s9582_s0 }
 0x1a0   : > { %p8064_p4 = scmp.ne.s32.totalorder %s934_s28, %s8063_s16  ;;  %p8070_p12 = scmp.lt.s32.totalorder %s8068_s20, %s8063_s16 }
 0x1a2   : > { %p8066_p10 = pnand %p8064_p4, %p9583_p6  ;;  %p8071_p0 = por %p8070_p12, %p8069_p3 }
 0x1a4   : > { %p8067_p7 = pneg %p8066_p10 }
 0x1a6   : > { %p8072_p13 = pnand %p8071_p0, %p8067_p7 }
 0x1a8   : > { %8075 = shalt.err (!%p8072_p13)
}
 0x1a9   : > { %s8076_s1 = scalar_lea.vmem %s937_s6, 16  ;;  %s8203_s21 = smov [#allocation22]  }
 0x1aa   : > { %p8077_p9 = scmp.ne.s32.totalorder %s937_s6, %s8076_s1  ;;  %s8081_s26 = sshll.u32 %s8203_s21, 4  ;;  %s8082_s26 = int_to_ptr.vmem [resolvable:$false] %s8081_s26 }
 0x1ab   : > { %s8083_s8 = scalar_lea.vmem %s8082_s26, 32  ;;  %p8084_p5 = scmp.lt.s32.totalorder %s937_s6, %s8082_s26 }
 0x1ac   : > { %p8079_p1 = pnand %p8077_p9, %p9583_p6  ;;  %p8085_p8 = scmp.lt.s32.totalorder %s8083_s8, %s8076_s1 }
 0x1ae   : > { %p8080_p2 = pneg %p8079_p1  ;;  %p8086_p4 = por %p8085_p8, %p8084_p5 }
 0x1b0   : > { %p8087_p10 = pnand %p8086_p4, %p8080_p2 }
 0x1b2   : > { %8090 = shalt.err (!%p8087_p10)
}
 0x1b3   : > { %7238 = dma.hbm_to_vmem [thread:$0]  (!%p9576_p11), %s934_s28, 16, %s937_s6, %s8429_s4  }
 0x1b4   : > { %s9584_s25 = sld [smem:[#allocation41_spill]] }
 0x1ba   : > { %p9585_p7 = scmp.ne.s32.totalorder %s9584_s25, 0 }
 0x1bb   : > { %s9586_s3 = sld [smem:[#allocation39_spill]] (!%p9585_p7) }
 0x1bc   : > { %945 = sbr.rel (%p9585_p7) target bundleno = 5174 (0x1436), region = 112 }
 0x1c1   : > { %p9587_p3 = scmp.eq.s32.totalorder %s9586_s3, 0 }
 0x1c3   : > { %8132 = dma.done.wait (%p9587_p3), [#allocation4], 32   ;;  %p9588_p6 = pmov %p9587_p3 }
 0x1c4   : > { %p9589_p12 = pmov %p9587_p3 }
 0x1c5   : > { %8134 = vsyncadd (%p9588_p6), [#allocation4], 4294967264 }
 0x1c6   : > { %8136 = dma.done.wait (%p9589_p12), [#allocation7], 80   ;;  %p9590_p0 = pmov %p9587_p3 }
 0x1c8   : > { %8138 = vsyncadd (%p9590_p0), [#allocation7], 4294967216  ;;  %p9591_p13 = pmov %p9590_p0 }
 0x1c9   : > { %p9592_p11 = pmov %p9590_p0 }
 0x1ca   : > { %8140 = dma.done.wait (%p9591_p13), [#allocation10], 16  }
 0x1cb   : > { %8142 = vsyncadd (%p9592_p11), [#allocation10], 4294967280  ;;  %s9593_s30 = sld [smem:[#allocation37_spill]]  ;;  %s963_s4 = sand.u32 1, %s9586_s3  }
 0x1cc   : > { %s9594_s5 = sld [smem:[#allocation40_spill]]  ;;  %s964_s2 = scalar_lea.sflag [#allocation4], %s963_s4 }
 0x1d1   : > { %s8799_s29 = sand.u32 1, %s9593_s30  }
 0x1d2   : > { %s7115_s24 = smul.u32 192, %s8799_s29  ;;  %p9595_p9 = scmp.ne.s32.totalorder %s9594_s5, 0 }
 0x1d4   : > { %s8802_s28 = scalar_lea.vmem [#allocation11], %s7115_s24 }
 0x1d5   : > { %8144 = dma.done.wait (%p9595_p9), %s964_s2, 37264  }
 0x1d6   : > { %8146 = vsyncadd (%p9595_p9), %s964_s2, 4294930032  ;;  %s7116_s23 = smul.u32 3, %s8799_s29  ;;  %s6365_s6 = sshll.u32 %s8799_s29, 6 }
 0x1d7   : > { %s6366_s16 = sshll.u32 %s8799_s29, 10  ;;  %s6367_s7 = sshll.u32 %s8799_s29, 4 }
 0x1d8   : > { %s8812_s18 = scalar_lea.vmem [#allocation12], %s7116_s23  ;;  %s8814_s20 = scalar_lea.vmem [#allocation13], %s6365_s6 }
 0x1d9   : > { %s993_s22 = scalar_lea.vmem [#allocation14], %s8799_s29  ;;  %s1001_s27 = scalar_lea.vmem [#allocation15], %s8799_s29 }
 0x1da   : > { %s1009_s1 = scalar_lea.vmem [#allocation16], %s8799_s29  ;;  %s8819_s21 = scalar_lea.vmem [#allocation17], %s6366_s16 }
 0x1db   : > { %s8821_s26 = scalar_lea.vmem [#allocation18], %s6367_s7  ;;  %s8823_s8 = scalar_lea.vmem [#allocation19], %s6366_s16 }
 0x1dc   : > { %s1044_s25 = scalar_lea.vmem [#allocation20], %s8799_s29  ;;  %p9596_p1 = pmov %p9590_p0 }
 0x1dd   : > { %p9597_p2 = pmov %p9590_p0 }
 0x1de   : > { %8148 = dma.done.wait (%p9596_p1), [#allocation7], 16  }
 0x1df   : > { %8150 = vsyncadd (%p9597_p2), [#allocation7], 4294967280  ;;  %p9598_p5 = pmov %p9590_p0 }
 0x1e0   : > { %p9599_p8 = pmov %p9590_p0 }
 0x1e1   : > { %8152 = dma.done.wait (%p9598_p5), [#allocation10], 16  }
 0x1e2   : > { %8154 = vsyncadd (%p9599_p8), [#allocation10], 4294967280  ;;  %p9600_p4 = pmov %p9590_p0 }
 0x1e3   : > { %p9601_p10 = pmov %p9590_p0 }
 0x1e4   : > { %8156 = dma.done.wait (%p9600_p4), [#allocation26], 1040  }
 0x1e5   : > { %8158 = vsyncadd (%p9601_p10), [#allocation26], 4294966256  ;;  %p9602_p7 = scmp.ne.s32.totalorder %s9586_s3, 0 }
 0x1e6   : > { %s9603_s2 = sld [smem:[#allocation44_spill]] (!%p9602_p7) }
 0x1e7   : > { %1187 = sbr.rel (%p9602_p7) target bundleno = 698 (0x2ba), region = 196  ;;  %s9604_s16 = sld [smem:[#allocation45_spill]] (!%p9602_p7) }
 0x1e8   : > { %s9605_s5 = sld [smem:[#allocation46_spill]] (!%p9602_p7) }
 0x1ec   : > { %v1190_v0 = vld [vmem:[#allocation3] sm:$0x3]  ;;  %vm1205_vm0 = vcmask 1041408   ;;  %v1286_v1 = vld [vmem:[#allocation8] sm:$0xf]  ;;  %vm1301_vm1 = vcmask 1043456  }
 0x1ed   : > { %6961 = vmatprep.subr.msk.mxu0 %vm1205_vm0, %v1190_v0  ;;  %6966 = vmatprep.subr.msk.mxu1 %vm1301_vm1, %v1286_v1  ;;  %v1188_v2 = vld [vmem:[%s9603_s2] sm:$0xff]  ;;  %vm1198_vm2 = vcmask 15360   ;;  %vm1294_vm3 = vcmask 31744   ;;  %v1189_v4 = vld [vmem:[%s9603_s2 + $0x8] sm:$0xff]  ;;  %v6374_v6 = vld [vmem:[#allocation6] ss:$0 sm:$0xff] }
 0x1ee   : > { %v1284_v3 = vld [vmem:[%s9604_s16] sm:$0xff]  ;;  %6962 = vmatpush3.msk.msra.mxu0 %vm1205_vm0, %v1190_v0  ;;  %6963 = vmatprep.mubr.msk.f32.mxu0 %vm1198_vm2, %v1188_v2  ;;  %v1285_v5 = vld [vmem:[%s9604_s16 + $0x8] sm:$0xff]  ;;  %v6378_v7 = vld [vmem:[#allocation9] ss:$0 sm:$0xff] }
 0x1ef   : > { %6967 = vmatpush3.msk.msra.mxu1 %vm1301_vm1, %v1286_v1  ;;  %6968 = vmatprep.mubr.msk.f32.mxu1 %vm1294_vm3, %v1284_v3  ;;  %v1380_v12 = vld [vmem:[%s9605_s5] sm:$0xff] }
 0x1f0   : > { %6964 = vmatmul.mubr.msk.f32.vlgmr.msra.gmra.mxu0 %vm1198_vm2, %v1189_v4  ;;  %6969 = vmatmul.mubr.msk.f32.vlgmr.msra.gmra.mxu1 %vm1294_vm3, %v1285_v5 }
 0x2b0   : > { %v6965_v8 = vpop.f32.mrf.mxu0  ;;  %v6970_v9 = vpop.f32.mrf.mxu1 }
 0x2b1   : > { %v1281_v10 = vadd.f32 %v6965_v8, %v6374_v6  ;;  %v1377_v11 = vadd.f32 %v6970_v9, %v6378_v7 }
 0x2b2   : > { %v1275_v13 = vpop.f32.mrf.mxu0  ;;  %v1371_v14 = vpop.f32.mrf.mxu1 }
 0x2b3   : > { %v1382_v15 = vadd.f32 %v1377_v11, %v1281_v10  ;;  %v1276_v16 = vadd.f32 %v6374_v6, %v1275_v13  ;;  %v1372_v17 = vadd.f32 %v6378_v7, %v1371_v14 }
 0x2b5   : > { %v1384_v18 = vadd.f32 %v1382_v15, %v1380_v12  ;;  %v1381_v19 = vadd.f32 %v1372_v17, %v1276_v16 }
 0x2b7   : > { %1386 = vst [vmem:[#allocation2 + $0x8] sm:$0xff] %v1384_v18  ;;  %v1383_v20 = vadd.f32 %v1381_v19, %v1380_v12 }
 0x2b9   : > { %1385 = vst [vmem:[#allocation2] sm:$0xff] %v1383_v20 }
 0x2ba PF: > { %v7327_v21 = vld [vmem:[%s8802_s28 + $0xac] ss:$12 sps:$4 sm:$0xff]   ;;  %v7329_v22 = vld [vmem:[%s8802_s28 + $0xa8] ss:$12 sps:$4 sm:$0xff]   ;;  %v8204_v23 = vmov 0   ;;  %v8205_v24 = vmov 0.0   ;;  %v1424_v50 = vlaneseq }
 0x2bb   : > { %1599 = vmatprep.mubr.bf16.mxu0 %v8204_v23  ;;  %6971 = vmatprep.subr.bf16.mxu1 %v8205_v24  ;;  %v7330_v25 = vld [vmem:[%s8802_s28 + $0x94] ss:$12 sps:$4 sm:$0xff]   ;;  %vm8206_vm4 = vmmov 0   ;;  %v7332_v26 = vld [vmem:[%s8802_s28 + $0x90] ss:$12 sps:$4 sm:$0xff]   ;;  %vm1651_vm5 = vcmask 261120  }
 0x2bc   : > { %1567 = vmatprep.subr.bf16.mxu0 %v7327_v21  ;;  %6987 = vmatprep.mubr.msk.bf16.mxu1 %vm8206_vm4, %v8205_v24  ;;  %v7333_v27 = vld [vmem:[%s8802_s28 + $0x7c] ss:$12 sps:$4 sm:$0xff]   ;;  %v7335_v28 = vld [vmem:[%s8802_s28 + $0x78] ss:$12 sps:$4 sm:$0xff]   ;;  %v7338_v30 = vld [vmem:[%s8802_s28 + $0x60] ss:$12 sps:$4 sm:$0xff]  }
 0x2bd   : > { %1568 = vmatpush1.bf16.msra.mxu0 %v7329_v22  ;;  %v7336_v29 = vld [vmem:[%s8802_s28 + $0x64] ss:$12 sps:$4 sm:$0xff]   ;;  %v7339_v31 = vld [vmem:[%s8802_s28 + $0x4c] ss:$12 sps:$4 sm:$0xff]   ;;  %v7341_v34 = vld [vmem:[%s8802_s28 + $0x48] ss:$12 sps:$4 sm:$0xff]  }
 0x2be   : > { %1569 = vmatprep.subr.bf16.mxu0 %v7330_v25  ;;  %v7351_v32 = vld [vmem:[%s8802_s28 + $0xb0] ss:$12 sps:$4 sm:$0xff]   ;;  %v7352_v33 = vld [vmem:[%s8802_s28 + $0x98] ss:$12 sps:$4 sm:$0xff]   ;;  %v7342_v35 = vld [vmem:[%s8802_s28 + $0x34] ss:$12 sps:$4 sm:$0xff]  }
 0x2bf   : > { %6972 = vmatpush3.bf16.msra.mxu1 %v7351_v32  ;;  %v7353_v36 = vld [vmem:[%s8802_s28 + $0x80] ss:$12 sps:$4 sm:$0xff]   ;;  %v7344_v37 = vld [vmem:[%s8802_s28 + $0x30] ss:$12 sps:$4 sm:$0xff]   ;;  %v7354_v39 = vld [vmem:[%s8802_s28 + $0x68] ss:$12 sps:$4 sm:$0xff]  }
 0x2c0   : > { %6973 = vmatprep.subr.bf16.mxu1 %v8205_v24  ;;  %v7345_v38 = vld [vmem:[%s8802_s28 + $0x1c] ss:$12 sps:$4 sm:$0xff]   ;;  %v7347_v40 = vld [vmem:[%s8802_s28 + $0x18] ss:$12 sps:$4 sm:$0xff]   ;;  %v7350_v43 = vld [vmem:[%s8802_s28] ss:$12 sps:$4 sm:$0xff]  }
 0x2c1   : > { %1570 = vmatpush1.bf16.msra.mxu0 %v7332_v26  ;;  %v7348_v41 = vld [vmem:[%s8802_s28 + $0x4] ss:$12 sps:$4 sm:$0xff]   ;;  %v7357_v48 = vld [vmem:[%s8802_s28 + $0x20] ss:$12 sps:$4 sm:$0xff]   ;;  %v7358_v49 = vld [vmem:[%s8802_s28 + $0x8] ss:$12 sps:$4 sm:$0xff]  }
 0x2c2   : > { %1571 = vmatprep.subr.bf16.mxu0 %v7333_v27  ;;  %v7355_v42 = vld [vmem:[%s8802_s28 + $0x50] ss:$12 sps:$4 sm:$0xff]   ;;  %v1387_v44 = vld [vmem:[#allocation2] sm:$0xff]  ;;  %v8898_v51 = vshrl.u32 %v1424_v50, 7  ;;  %v1422_v53 = vld [vmem:[%s8812_s18] sm:$0x7] }
 0x2c3   : > { %6974 = vmatpush3.bf16.msra.mxu1 %v7352_v33  ;;  %v1388_v45 = vld [vmem:[#allocation2 + $0x8] sm:$0xff]  ;;  %v7356_v46 = vld [vmem:[%s8802_s28 + $0x38] ss:$12 sps:$4 sm:$0xff]   ;;  %s8207_s28 = smov 96   ;;  %vm1804_vm6 = vcmask 64512   ;;  %s8208_s18 = smov 64  }
 0x2c4   : > { %6975 = vmatprep.subr.bf16.mxu1 %v8205_v24  ;;  %v1389_v47 = vpack.c.bf16 %v1388_v45, %v1387_v44  ;;  %v8901_v52 = vsub.s32 0, %v8898_v51  ;;  %v8905_v54 = vsub.s32 1, %v8898_v51  ;;  %v8916_v62 = vsub.s32 2, %v8898_v51  ;;  %s8209_s30 = smov 32  }
 0x2c5   : > { %1572 = vmatpush1.bf16.msra.mxu0 %v7335_v28  ;;  %vm2991_vm7 = vcmask 523264   ;;  %vm2994_vm8 = vcmask 785408  }
 0x2c6   : > { %1573 = vmatprep.subr.bf16.mxu0 %v7336_v29  ;;  %v1427_v55 = vrot.slane %v1422_v53, %v8901_v52  ;;  %v1431_v56 = vrot.slane %v1422_v53, %v8905_v54  ;;  %v1435_v1 = vrot.slane %v1422_v53, %v8916_v62 }
 0x2c7   : > { %6976 = vmatpush3.bf16.msra.mxu1 %v7353_v36 }
 0x2c8   : > { %6977 = vmatprep.subr.bf16.mxu1 %v8205_v24 }
 0x2c9   : > { %1574 = vmatpush1.bf16.msra.mxu0 %v7338_v30 }
 0x2ca   : > { %1575 = vmatprep.subr.bf16.mxu0 %v7339_v31 }
 0x2cb   : > { %6978 = vmatpush3.bf16.msra.mxu1 %v7354_v39 }
 0x2cc   : > { %6979 = vmatprep.subr.bf16.mxu1 %v8205_v24 }
 0x2cd   : > { %1576 = vmatpush1.bf16.msra.mxu0 %v7341_v34 }
 0x2ce   : > { %1577 = vmatprep.subr.bf16.mxu0 %v7342_v35 }
 0x2cf   : > { %6980 = vmatpush3.bf16.msra.mxu1 %v7355_v42 }
 0x2d0   : > { %6981 = vmatprep.subr.bf16.mxu1 %v8205_v24 }
 0x2d1   : > { %1578 = vmatpush1.bf16.msra.mxu0 %v7344_v37 }
 0x2d2   : > { %1579 = vmatprep.subr.bf16.mxu0 %v7345_v38 }
 0x2d3   : > { %6982 = vmatpush3.bf16.msra.mxu1 %v7356_v46 }
 0x2d4   : > { %6983 = vmatprep.subr.bf16.mxu1 %v8205_v24 }
 0x2d5   : > { %1580 = vmatpush1.bf16.msra.mxu0 %v7347_v40 }
 0x2d6   : > { %1581 = vmatprep.subr.bf16.mxu0 %v7348_v41 }
 0x2d7   : > { %6984 = vmatpush3.bf16.msra.mxu1 %v7357_v48 }
 0x2d8   : > { %6985 = vmatprep.subr.bf16.mxu1 %v8205_v24 }
 0x2d9   : > { %1582 = vmatpush1.bf16.msra.mxu0 %v7350_v43 }
 0x2da   : > { %7031 = vmatprep.subr.mxu0 %v8205_v24 }
 0x2db   : > { %6986 = vmatpush3.bf16.msra.mxu1 %v7358_v49 }
 0x2dc   : > { %1600 = vmatmul.mubr.bf16.vlgmr.msra.gmra.mxu0 %v1389_v47  ;;  %6991 = vmatprep.subr.mxu1 %v8205_v24 }
 0x2dd   : > { %7033 = vmatprep.mubr.msk.f32.mxu0 %vm8206_vm4, %v8205_v24 }
 0x2de   : > { %6988 = vmatmul.mubr.bf16.vlgmr.msra.gmra.mxu1 %v1389_v47 }
 0x2df   : > { %6993 = vmatprep.mubr.msk.f32.mxu1 %vm8206_vm4, %v8205_v24 }
 0x39c   : > { %v1601_v57 = vpop.f32.mrf.mxu0 }
 0x39d   : > { %v8909_v58 = vadd.f32 %v1601_v57, %v1427_v55 }
 0x39e   : > { %v1603_v59 = vpop.f32.mrf.mxu0  ;;  %v1644_v3 = vpop.f32.mrf.mxu1 }
 0x39f   : > { %v8911_v60 = vadd.f32 %v1603_v59, %v1431_v56  ;;  %1973 = vrot.lane.b32.xlu1 %v8909_v58, %s8207_s28  ;;  %v8937_v4 = vadd.f32 %v1644_v3, %v1435_v1 }
 0x3a0   : > { %v1605_v61 = vpop.f32.mrf.mxu0  ;;  %v6989_v5 = vpop.f32.mrf.mxu1 }
 0x3a1   : > { %6992 = vmatpush3.xpose.msk.msra.mxu1 %vm1651_vm5, %v8911_v60  ;;  %v8930_v2 = vadd.f32 %v1605_v61, %v1427_v55 }
 0x3a2   : > { %v1607_v63 = vpop.f32.mrf.mxu0  ;;  %6996 = vmatprep.subr.mxu1 %v8205_v24  ;;  %v1647_v6 = vpop.f32.mrf.mxu1 }
 0x3a3   : > { %v8921_v0 = vadd.f32 %v1607_v63, %v1431_v56  ;;  %v8943_v7 = vadd.f32 %v1647_v6, %v1435_v1 }
 0x3a4   : > { %6994 = vmatmul.mubr.msk.f32.vlgmr.msra.gmra.mxu1 %vm1651_vm5, %v8909_v58  ;;  %v6990_v8 = vpop.f32.mrf.mxu1 }
 0x3a5   : > { %2053 = vrot.lane.b32.xlu1 %v8921_v0, %s8207_s28  ;;  %6997 = vmatpush3.xpose.msk.msra.mxu1 %vm1651_vm5, %v8921_v0 }
 0x3a6   : > { %6998 = vmatprep.mubr.msk.f32.mxu1 %vm8206_vm4, %v8205_v24  ;;  %7001 = vmatprep.subr.mxu1 %v8205_v24 }
 0x3a8   : > { %6999 = vmatmul.mubr.msk.f32.vlgmr.msra.gmra.mxu1 %vm1651_vm5, %v8930_v2 }
 0x3a9   : > { %7003 = vmatprep.mubr.msk.f32.mxu1 %vm8206_vm4, %v8205_v24  ;;  %7002 = vmatpush3.msra.mxu1 %v8937_v4 }
 0x3aa   : > { %7006 = vmatprep.subr.mxu1 %v8205_v24 }
 0x411   : > { %v1974_v27 = vpop.permute.xlu1 %1973 }
 0x417   : > { %v2054_v28 = vpop.permute.xlu1 %2053 }
 0x464   : > { %v1724_v9 = vpop.f32.mrf.mxu1 }
 0x465   : > { %v1805_v10 = vsel %vm1804_vm6, %v1724_v9, -inf }
 0x466   : > { %1806 = vmax.xlane.f32.xlu0 %v1805_v10  ;;  %v6995_v11 = vpop.f32.mrf.mxu1 }
 0x468   : > { %v1800_v12 = vpop.f32.mrf.mxu1 }
 0x469   : > { %v1808_v13 = vsel %vm1804_vm6, %v1800_v12, -inf }
 0x46a   : > { %1809 = vmax.xlane.f32.xlu0 %v1808_v13  ;;  %v7000_v14 = vpop.f32.mrf.mxu1 }
 0x480   : > { %1975 = vrot.lane.b32.xlu0 %v8911_v60, %s8207_s28 }
 0x4ef   : > { %v1807_v15 = vpop.xlane.xlu0 %1806 }
 0x4f0   : > { %v1811_v16 = vsub.f32 %v1724_v9, %v1807_v15 }
 0x4f2   : > { %v1813_v17 = vmul.f32 1.442695, %v1811_v16 }
 0x4f3   : > { %v1810_v18 = vpop.xlane.xlu0 %1809 }
 0x4f4   : > { %7495 = vpow2.f32 %v1813_v17  ;;  %v1812_v19 = vsub.f32 %v1800_v12, %v1810_v18 }
 0x4f6   : > { %v1815_v20 = vmul.f32 1.442695, %v1812_v19 }
 0x4f7   : > { %v1976_v35 = vpop.permute.xlu0 %1975 }
 0x4f8   : > { %7497 = vpow2.f32 %v1815_v20 }
 0x501   : > { %v7496_v21 = vpop.eup %7495 }
 0x502   : > { %v1817_v22 = vsel %vm1804_vm6, %v7496_v21, 0.0 }
 0x503   : > { %1818 = vadd.xlane.f32.xlu1 %v1817_v22 }
 0x505   : > { %v7498_v25 = vpop.eup %7497 }
 0x506   : > { %v1820_v26 = vsel %vm1804_vm6, %v7498_v25, 0.0 }
 0x507   : > { %1821 = vadd.xlane.f32.xlu1 %v1820_v26 }
 0x518   : > { %2051 = vrot.lane.b32.xlu1 %v8930_v2, %s8207_s28 }
 0x58c   : > { %v1819_v29 = vpop.xlane.xlu1 %1818 }
 0x58d   : > { %7499 = vrcp.f32 %v1819_v29 }
 0x590   : > { %v1822_v30 = vpop.xlane.xlu1 %1821 }
 0x591   : > { %7501 = vrcp.f32 %v1822_v30 }
 0x594   : > { %v2052_v36 = vpop.permute.xlu1 %2051 }
 0x59a   : > { %v7500_v31 = vpop.eup %7499 }
 0x59b   : > { %v1825_v32 = vmul.f32 %v7500_v31, %v7496_v21 }
 0x59d   : > { %7004 = vmatmul.mubr.msk.f32.vlgmr.msra.gmra.mxu1 %vm1804_vm6, %v1825_v32 }
 0x59e   : > { %v7502_v33 = vpop.eup %7501  ;;  %7007 = vmatpush3.msra.mxu1 %v8943_v7  ;;  %7008 = vmatprep.mubr.msk.f32.mxu1 %vm8206_vm4, %v8205_v24 }
 0x59f   : > { %7011 = vmatprep.subr.mxu1 %v8205_v24  ;;  %v1826_v34 = vmul.f32 %v7502_v33, %v7498_v25 }
 0x5a1   : > { %7009 = vmatmul.mubr.msk.f32.vlgmr.msra.gmra.mxu1 %vm1804_vm6, %v1826_v34 }
 0x5a2   : > { %7012 = vmatpush3.xpose.msk.msra.mxu1 %vm1651_vm5, %v1976_v35  ;;  %7013 = vmatprep.mubr.msk.f32.mxu1 %vm8206_vm4, %v8205_v24 }
 0x5a3   : > { %7016 = vmatprep.subr.mxu1 %v8205_v24 }
 0x5a5   : > { %7014 = vmatmul.mubr.msk.f32.vlgmr.msra.gmra.mxu1 %vm1651_vm5, %v1974_v27 }
 0x5a6   : > { %7017 = vmatpush3.xpose.msk.msra.mxu1 %vm1651_vm5, %v2054_v28  ;;  %7018 = vmatprep.mubr.msk.f32.mxu1 %vm8206_vm4, %v8205_v24 }
 0x5a7   : > { %7021 = vmatprep.subr.mxu1 %v8205_v24 }
 0x5a9   : > { %7019 = vmatmul.mubr.msk.f32.vlgmr.msra.gmra.mxu1 %vm1651_vm5, %v2052_v36 }
 0x5aa   : > { %7023 = vmatprep.mubr.msk.f32.mxu1 %vm8206_vm4, %v8205_v24 }
 0x65d   : > { %v8971_v37 = vpop.f32.mrf.mxu1 }
 0x65f   : > { %v7005_v38 = vpop.f32.mrf.mxu1 }
 0x661   : > { %v8973_v39 = vpop.f32.mrf.mxu1 }
 0x663   : > { %v7010_v40 = vpop.f32.mrf.mxu1 }
 0x665   : > { %v2047_v41 = vpop.f32.mrf.mxu1 }
 0x666   : > { %v2129_v42 = vsel %vm1804_vm6, %v2047_v41, -inf }
 0x667   : > { %2130 = vmax.xlane.f32.xlu0 %v2129_v42  ;;  %v7015_v43 = vpop.f32.mrf.mxu1 }
 0x669   : > { %v2125_v44 = vpop.f32.mrf.mxu1 }
 0x66a   : > { %v2132_v45 = vsel %vm1804_vm6, %v2125_v44, -inf }
 0x66b   : > { %2133 = vmax.xlane.f32.xlu1 %v2132_v45  ;;  %v7020_v46 = vpop.f32.mrf.mxu1 }
 0x67c   : > { %2229 = vrot.lane.b32.xlu1 %v8943_v7, %s8207_s28 }
 0x680   : > { %2307 = vrot.lane.b32.xlu1 %v8911_v60, %s8208_s18 }
 0x684   : > { %2385 = vrot.lane.b32.xlu1 %v8921_v0, %s8208_s18 }
 0x688   : > { %2383 = vrot.lane.b32.xlu1 %v8930_v2, %s8208_s18 }
 0x6f0   : > { %v2131_v47 = vpop.xlane.xlu0 %2130 }
 0x6f1   : > { %v2135_v48 = vsub.f32 %v2047_v41, %v2131_v47 }
 0x6f3   : > { %v2137_v49 = vmul.f32 1.442695, %v2135_v48 }
 0x6f4   : > { %v2134_v50 = vpop.xlane.xlu1 %2133 }
 0x6f5   : > { %7503 = vpow2.f32 %v2137_v49  ;;  %v2136_v53 = vsub.f32 %v2125_v44, %v2134_v50 }
 0x6f7   : > { %v2139_v55 = vmul.f32 1.442695, %v2136_v53 }
 0x6f8   : > { %v2230_v56 = vpop.permute.xlu1 %2229 }
 0x6f9   : > { %7505 = vpow2.f32 %v2139_v55 }
 0x6fc   : > { %v2308_v57 = vpop.permute.xlu1 %2307 }
 0x6fd   : > { %7032 = vmatpush3.xpose.msk.msra.mxu0 %vm1651_vm5, %v2308_v57 }
 0x6fe   : > { %7041 = vmatprep.subr.mxu0 %v8205_v24 }
 0x700   : > { %v2386_v12 = vpop.permute.xlu1 %2385 }
 0x702   : > { %v7504_v59 = vpop.eup %7503 }
 0x703   : > { %v2141_v61 = vsel %vm1804_vm6, %v7504_v59, 0.0 }
 0x704   : > { %2142 = vadd.xlane.f32.xlu0 %v2141_v61  ;;  %v2384_v14 = vpop.permute.xlu1 %2383 }
 0x706   : > { %v7506_v63 = vpop.eup %7505 }
 0x707   : > { %v2144_v1 = vsel %vm1804_vm6, %v7506_v63, 0.0 }
 0x708   : > { %2145 = vadd.xlane.f32.xlu0 %v2144_v1 }
 0x71e   : > { %2152 = vrot.lane.b32.xlu0 %v8937_v4, %s8207_s28 }
 0x722   : > { %2305 = vrot.lane.b32.xlu0 %v8909_v58, %s8208_s18 }
 0x78d   : > { %v2143_v3 = vpop.xlane.xlu0 %2142 }
 0x78e   : > { %7507 = vrcp.f32 %v2143_v3 }
 0x791   : > { %v2146_v5 = vpop.xlane.xlu0 %2145 }
 0x792   : > { %7509 = vrcp.f32 %v2146_v5 }
 0x795   : > { %v2153_v6 = vpop.permute.xlu0 %2152 }
 0x796   : > { %7022 = vmatpush3.msra.mxu1 %v2153_v6 }
 0x797   : > { %7026 = vmatprep.subr.mxu1 %v8205_v24 }
 0x799   : > { %v2306_v8 = vpop.permute.xlu0 %2305 }
 0x79a   : > { %7034 = vmatmul.mubr.msk.f32.vlgmr.msra.gmra.mxu0 %vm1651_vm5, %v2306_v8 }
 0x79b   : > { %v7508_v9 = vpop.eup %7507  ;;  %7043 = vmatprep.mubr.msk.f32.mxu0 %vm8206_vm4, %v8205_v24 }
 0x79c   : > { %v2149_v10 = vmul.f32 %v7508_v9, %v7504_v59 }
 0x79e   : > { %7024 = vmatmul.mubr.msk.f32.vlgmr.msra.gmra.mxu1 %vm1804_vm6, %v2149_v10 }
 0x79f   : > { %v7510_v11 = vpop.eup %7509  ;;  %7027 = vmatpush3.msra.mxu1 %v2230_v56  ;;  %7028 = vmatprep.mubr.msk.f32.mxu1 %vm8206_vm4, %v8205_v24 }
 0x7a0   : > { %7036 = vmatprep.subr.mxu1 %v8205_v24  ;;  %v2150_v13 = vmul.f32 %v7510_v11, %v7506_v63 }
 0x7a2   : > { %7029 = vmatmul.mubr.msk.f32.vlgmr.msra.gmra.mxu1 %vm1804_vm6, %v2150_v13 }
 0x7a3   : > { %7037 = vmatpush3.xpose.msk.msra.mxu1 %vm1651_vm5, %v2386_v12  ;;  %7038 = vmatprep.mubr.msk.f32.mxu1 %vm8206_vm4, %v8205_v24 }
 0x7a4   : > { %7046 = vmatprep.subr.mxu1 %v8205_v24 }
 0x7a6   : > { %7039 = vmatmul.mubr.msk.f32.vlgmr.msra.gmra.mxu1 %vm1651_vm5, %v2384_v14 }
 0x7a7   : > { %7048 = vmatprep.mubr.msk.f32.mxu1 %vm8206_vm4, %v8205_v24 }
 0x85a   : > { %v2379_v15 = vpop.f32.mrf.mxu0 }
 0x85b   : > { %v2461_v16 = vsel %vm1804_vm6, %v2379_v15, -inf }
 0x85c   : > { %2462 = vmax.xlane.f32.xlu0 %v2461_v16  ;;  %v7035_v17 = vpop.f32.mrf.mxu0 }
 0x85e   : > { %v9010_v18 = vpop.f32.mrf.mxu1 }
 0x860   : > { %v7025_v19 = vpop.f32.mrf.mxu1 }
 0x862   : > { %v9012_v20 = vpop.f32.mrf.mxu1 }
 0x863   : > { %v7312_v21 = vpack.i.bf16 %v9012_v20, %v9010_v18 }
 0x864   : > { %v7030_v22 = vpop.f32.mrf.mxu1 }
 0x865   : > { %v7360_v22 = vld [vmem:[%s8814_s20 + $0x30] sm:$0xff]  }
 0x866   : > { %v2457_v25 = vpop.f32.mrf.mxu1 }
 0x867   : > { %v2464_v26 = vsel %vm1804_vm6, %v2457_v25, -inf }
 0x868   : > { %2465 = vmax.xlane.f32.xlu1 %v2464_v26  ;;  %v7040_v27 = vpop.f32.mrf.mxu1  ;;  %v7362_v26 = vld [vmem:[%s8814_s20 + $0x20] sm:$0xff]  }
 0x869   : > { %v7363_v27 = vld [vmem:[%s8814_s20 + $0x18] sm:$0xff]  }
 0x879   : > { %2559 = vrot.lane.b32.xlu1 %v8943_v7, %s8208_s18 }
 0x87d   : > { %2637 = vrot.lane.b32.xlu1 %v8911_v60, %s8209_s30 }
 0x881   : > { %2715 = vrot.lane.b32.xlu1 %v8921_v0, %s8209_s30 }
 0x885   : > { %2713 = vrot.lane.b32.xlu1 %v8930_v2, %s8209_s30 }
 0x8e5   : > { %v2463_v28 = vpop.xlane.xlu0 %2462 }
 0x8e6   : > { %v2467_v29 = vsub.f32 %v2379_v15, %v2463_v28  ;;  %v7364_v28 = vld [vmem:[%s8814_s20 + $0x10] sm:$0xff]  }
 0x8e8   : > { %v2469_v30 = vmul.f32 1.442695, %v2467_v29  ;;  %v7365_v29 = vld [vmem:[%s8814_s20 + $0x8] sm:$0xff]  }
 0x8ea   : > { %7511 = vpow2.f32 %v2469_v30 }
 0x8f1   : > { %v2466_v31 = vpop.xlane.xlu1 %2465 }
 0x8f2   : > { %v2468_v32 = vsub.f32 %v2457_v25, %v2466_v31  ;;  %v7361_v25 = vld [vmem:[%s8814_s20 + $0x28] sm:$0xff]  }
 0x8f4   : > { %v2471_v33 = vmul.f32 1.442695, %v2468_v32  ;;  %v7366_v32 = vld [vmem:[%s8814_s20] sm:$0xff]  }
 0x8f5   : > { %v2560_v34 = vpop.permute.xlu1 %2559 }
 0x8f6   : > { %7513 = vpow2.f32 %v2471_v33  ;;  %7047 = vmatpush3.msra.mxu1 %v2560_v34 }
 0x8f7   : > { %v7512_v35 = vpop.eup %7511  ;;  %7056 = vmatprep.subr.mxu1 %v8205_v24 }
 0x8f8   : > { %v2473_v60 = vsel %vm1804_vm6, %v7512_v35, 0.0 }
 0x8f9   : > { %2474 = vadd.xlane.f32.xlu0 %v2473_v60  ;;  %v2638_v43 = vpop.permute.xlu1 %2637 }
 0x8fd   : > { %v2716_v45 = vpop.permute.xlu1 %2715 }
 0x901   : > { %v2714_v47 = vpop.permute.xlu1 %2713 }
 0x903   : > { %v7514_v0 = vpop.eup %7513 }
 0x904   : > { %v2476_v36 = vsel %vm1804_vm6, %v7514_v0, 0.0 }
 0x905   : > { %2477 = vadd.xlane.f32.xlu0 %v2476_v36 }
 0x91b   : > { %2483 = vrot.lane.b32.xlu0 %v8937_v4, %s8208_s18 }
 0x91f   : > { %2635 = vrot.lane.b32.xlu0 %v8909_v58, %s8209_s30 }
 0x982   : > { %v2475_v2 = vpop.xlane.xlu0 %2474 }
 0x983   : > { %7515 = vrcp.f32 %v2475_v2 }
 0x98e   : > { %v2478_v38 = vpop.xlane.xlu0 %2477 }
 0x98f   : > { %7517 = vrcp.f32 %v2478_v38 }
 0x990   : > { %v7516_v40 = vpop.eup %7515 }
 0x991   : > { %v2481_v41 = vmul.f32 %v7516_v40, %v7512_v35 }
 0x992   : > { %v2484_v42 = vpop.permute.xlu0 %2483 }
 0x993   : > { %7042 = vmatpush3.msra.mxu0 %v2484_v42 }
 0x994   : > { %7044 = vmatmul.mubr.msk.f32.vlgmr.msra.gmra.mxu0 %vm1804_vm6, %v2481_v41  ;;  %7051 = vmatprep.subr.mxu0 %v8205_v24 }
 0x995   : > { %7052 = vmatpush3.xpose.msk.msra.mxu0 %vm1651_vm5, %v2638_v43  ;;  %7053 = vmatprep.mubr.msk.f32.mxu0 %vm8206_vm4, %v8205_v24 }
 0x996   : > { %v2636_v44 = vpop.permute.xlu0 %2635  ;;  %7061 = vmatprep.subr.mxu0 %v8205_v24 }
 0x998   : > { %7054 = vmatmul.mubr.msk.f32.vlgmr.msra.gmra.mxu0 %vm1651_vm5, %v2636_v44 }
 0x999   : > { %7063 = vmatprep.mubr.msk.f32.mxu0 %vm8206_vm4, %v8205_v24 }
 0x99c   : > { %v7518_v58 = vpop.eup %7517 }
 0x99d   : > { %v2482_v46 = vmul.f32 %v7518_v58, %v7514_v0 }
 0x99f   : > { %7049 = vmatmul.mubr.msk.f32.vlgmr.msra.gmra.mxu1 %vm1804_vm6, %v2482_v46 }
 0x9a0   : > { %7057 = vmatpush3.xpose.msk.msra.mxu1 %vm1651_vm5, %v2716_v45  ;;  %7058 = vmatprep.mubr.msk.f32.mxu1 %vm8206_vm4, %v8205_v24 }
 0x9a1   : > { %7066 = vmatprep.subr.mxu1 %v8205_v24 }
 0x9a3   : > { %7059 = vmatmul.mubr.msk.f32.vlgmr.msra.gmra.mxu1 %vm1651_vm5, %v2714_v47 }
 0x9a4   : > { %7068 = vmatprep.mubr.msk.f32.mxu1 %vm8206_vm4, %v8205_v24 }
 0xa54   : > { %v2555_v48 = vpop.f32.mrf.mxu0 }
 0xa56   : > { %v7045_v49 = vpop.f32.mrf.mxu0 }
 0xa57   : > { %v6430_v49 = vld [vmem:[%s993_s22] ss:$0 sm:$0xff]  ;;  %s9607_s22 = scalar_lea.vmem [#allocation22], %s8799_s29 }
 0xa58   : > { %v2709_v50 = vpop.f32.mrf.mxu0 }
 0xa59   : > { %v2791_v53 = vsel %vm1804_vm6, %v2709_v50, -inf }
 0xa5a   : > { %2792 = vmax.xlane.f32.xlu0 %v2791_v53  ;;  %v7055_v55 = vpop.f32.mrf.mxu0 }
 0xa5f   : > { %v2631_v56 = vpop.f32.mrf.mxu1 }
 0xa60   : > { %v7317_v1 = vpack.i.bf16 %v2631_v56, %v2555_v48 }
 0xa61   : > { %v7050_v57 = vpop.f32.mrf.mxu1 }
 0xa63   : > { %v2787_v59 = vpop.f32.mrf.mxu1 }
 0xa64   : > { %v2794_v61 = vsel %vm1804_vm6, %v2787_v59, -inf }
 0xa65   : > { %2795 = vmax.xlane.f32.xlu1 %v2794_v61  ;;  %v7060_v63 = vpop.f32.mrf.mxu1  ;;  %v7536_v61 = vld [vmem:[#allocation2 + $0x8] sm:$0xff] }
 0xa76   : > { %2889 = vrot.lane.b32.xlu1 %v8943_v7, %s8209_s30 }
 0xa7a   : > { %7313 = vrot.lane.b32.xlu1 %v7312_v21, %s8209_s30  ;;  %v7359_v21 = vld [vmem:[%s8814_s20 + $0x38] sm:$0xff]   ;;  %s9606_s20 = scalar_lea.vmem [#allocation21], %s8799_s29 }
 0xa7e   : > { %7318 = vrot.lane.b32.xlu1 %v7317_v1, %s8208_s18  ;;  %v3266_v1 = vld [vmem:[%s8819_s21 + $0x380] sm:$0xff] }
 0xae3   : > { %v2793_v3 = vpop.xlane.xlu0 %2792 }
 0xae4   : > { %v2797_v5 = vsub.f32 %v2709_v50, %v2793_v3  ;;  %v3274_v3 = vld [vmem:[%s8819_s21 + $0x3c0] sm:$0xff] }
 0xae6   : > { %v2799_v6 = vmul.f32 1.442695, %v2797_v5  ;;  %v3267_v5 = vld [vmem:[%s8819_s21 + $0x388] sm:$0xff] }
 0xae8   : > { %7519 = vpow2.f32 %v2799_v6  ;;  %v6553_v6 = vcombine.low %v3266_v1, %v3274_v3 }
 0xaee   : > { %v2796_v8 = vpop.xlane.xlu1 %2795 }
 0xaef   : > { %v2798_v9 = vsub.f32 %v2787_v59, %v2796_v8  ;;  %v6554_v8 = vcombine.high %v3266_v1, %v3274_v3  ;;  %v3179_v3 = vld [vmem:[%s8819_s21 + $0xc8] sm:$0xff] }
 0xaf1   : > { %v2801_v10 = vmul.f32 1.442695, %v2798_v9  ;;  %v3275_v9 = vld [vmem:[%s8819_s21 + $0x3c8] sm:$0xff] }
 0xaf2   : > { %v2890_v11 = vpop.permute.xlu1 %2889 }
 0xaf3   : > { %7521 = vpow2.f32 %v2801_v10  ;;  %7067 = vmatpush3.msra.mxu1 %v2890_v11  ;;  %v6555_v10 = vcombine.low %v3267_v5, %v3275_v9  ;;  %v6556_v11 = vcombine.high %v3267_v5, %v3275_v9  ;;  %v3154_v9 = vld [vmem:[%s8819_s21] sm:$0xff] }
 0xaf4   : > { %4006 = vmatprep.subr.bf16.mxu1 %v6554_v8 }
 0xaf5   : > { %v7520_v12 = vpop.eup %7519 }
 0xaf6   : > { %v2803_v7 = vsel %vm1804_vm6, %v7520_v12, 0.0  ;;  %v7314_v60 = vpop.permute.xlu1 %7313 }
 0xaf7   : > { %2804 = vadd.xlane.f32.xlu0 %v2803_v7  ;;  %v7316_v36 = vunpack.i.h.bf16 %v7314_v60  ;;  %v7315_v2 = vunpack.i.l.bf16 %v7314_v60  ;;  %v3218_v60 = vld [vmem:[%s8819_s21 + $0x200] sm:$0xff] }
 0xaf9   : > { %v2989_v42 = vsel %vm1651_vm5, %v8971_v37, %v7315_v2  ;;  %v7535_v37 = vld [vmem:[#allocation2] sm:$0xff] }
 0xafa   : > { %v7319_v0 = vpop.permute.xlu1 %7318 }
 0xafb   : > { %v7321_v38 = vunpack.i.h.bf16 %v7319_v0  ;;  %v7320_v40 = vunpack.i.l.bf16 %v7319_v0  ;;  %v3226_v0 = vld [vmem:[%s8819_s21 + $0x240] sm:$0xff] }
 0xafc   : > { %v6506_v2 = vcombine.high %v3218_v60, %v3226_v0 }
 0xafd   : > { %v2992_v58 = vsel %vm2991_vm7, %v2989_v42, %v7320_v40  ;;  %v6505_v40 = vcombine.low %v3218_v60, %v3226_v0  ;;  %v3202_v42 = vld [vmem:[%s8819_s21 + $0x180] sm:$0xff] }
 0xb00   : > { %v7522_v13 = vpop.eup %7521 }
 0xb01   : > { %v2806_v14 = vsel %vm1804_vm6, %v7522_v13, 0.0 }
 0xb02   : > { %2807 = vadd.xlane.f32.xlu0 %v2806_v14 }
 0xb18   : > { %2813 = vrot.lane.b32.xlu0 %v8937_v4, %s8209_s30 }
 0xb80   : > { %v2805_v15 = vpop.xlane.xlu0 %2804 }
 0xb81   : > { %7523 = vrcp.f32 %v2805_v15 }
 0xb8b   : > { %v2808_v16 = vpop.xlane.xlu0 %2807 }
 0xb8c   : > { %7525 = vrcp.f32 %v2808_v16 }
 0xb8e   : > { %v7524_v17 = vpop.eup %7523 }
 0xb8f   : > { %v2814_v18 = vpop.permute.xlu0 %2813  ;;  %v2811_v19 = vmul.f32 %v7524_v17, %v7520_v12 }
 0xb90   : > { %7062 = vmatpush3.msra.mxu0 %v2814_v18 }
 0xb91   : > { %7064 = vmatmul.mubr.msk.f32.vlgmr.msra.gmra.mxu0 %vm1804_vm6, %v2811_v19  ;;  %7071 = vmatprep.subr.bf16.mxu0 %v8205_v24  ;;  %v3250_v19 = vld [vmem:[%s8819_s21 + $0x300] sm:$0xff] }
 0xb92   : > { %7087 = vmatprep.mubr.msk.bf16.mxu0 %vm8206_vm4, %v8205_v24  ;;  %7072 = vmatpush3.bf16.msra.mxu0 %v7359_v21 }
 0xb93   : > { %7073 = vmatprep.subr.bf16.mxu0 %v8205_v24 }
 0xb96   : > { %7074 = vmatpush3.bf16.msra.mxu0 %v7360_v22  ;;  %v3259_v22 = vld [vmem:[%s8819_s21 + $0x348] sm:$0xff] }
 0xb97   : > { %7075 = vmatprep.subr.bf16.mxu0 %v8205_v24 }
 0xb99   : > { %v7526_v4 = vpop.eup %7525 }
 0xb9a   : > { %v2812_v20 = vmul.f32 %v7526_v4, %v7522_v13  ;;  %7076 = vmatpush3.bf16.msra.mxu0 %v7361_v25  ;;  %v3258_v4 = vld [vmem:[%s8819_s21 + $0x340] sm:$0xff] }
 0xb9b   : > { %7077 = vmatprep.subr.bf16.mxu0 %v8205_v24  ;;  %v6538_v21 = vcombine.high %v3250_v19, %v3258_v4  ;;  %v6537_v25 = vcombine.low %v3250_v19, %v3258_v4  ;;  %v3276_v19 = vld [vmem:[%s8819_s21 + $0x3d0] sm:$0xff]  ;;  %v3269_v4 = vld [vmem:[%s8819_s21 + $0x398] sm:$0xff] }
 0xb9c   : > { %7069 = vmatmul.mubr.msk.f32.vlgmr.msra.gmra.mxu1 %vm1804_vm6, %v2812_v20  ;;  %v3251_v20 = vld [vmem:[%s8819_s21 + $0x308] sm:$0xff] }
 0xb9d   : > { %4038 = vmatprep.mubr.bf16.mxu1 %v8204_v23  ;;  %4007 = vmatpush1.bf16.msra.mxu1 %v6553_v6 }
 0xb9e   : > { %7078 = vmatpush3.bf16.msra.mxu0 %v7362_v26  ;;  %v6539_v26 = vcombine.low %v3251_v20, %v3259_v22  ;;  %4008 = vmatprep.subr.bf16.mxu1 %v6538_v21 }
 0xb9f   : > { %7079 = vmatprep.subr.bf16.mxu0 %v8205_v24 }
 0xba1   : > { %4009 = vmatpush1.bf16.msra.mxu1 %v6537_v25 }
 0xba2   : > { %7080 = vmatpush3.bf16.msra.mxu0 %v7363_v27  ;;  %v6540_v27 = vcombine.high %v3251_v20, %v3259_v22  ;;  %v3277_v22 = vld [vmem:[%s8819_s21 + $0x3d8] sm:$0xff] }
 0xba3   : > { %7081 = vmatprep.subr.bf16.mxu0 %v8205_v24  ;;  %v6559_v25 = vcombine.low %v3269_v4, %v3277_v22 }
 0xba6   : > { %7082 = vmatpush3.bf16.msra.mxu0 %v7364_v28  ;;  %v3234_v28 = vld [vmem:[%s8819_s21 + $0x280] sm:$0xff] }
 0xba7   : > { %7083 = vmatprep.subr.bf16.mxu0 %v8205_v24 }
 0xbaa   : > { %7084 = vmatpush3.bf16.msra.mxu0 %v7365_v29  ;;  %v3242_v29 = vld [vmem:[%s8819_s21 + $0x2c0] sm:$0xff] }
 0xbab   : > { %7085 = vmatprep.subr.bf16.mxu0 %v8205_v24  ;;  %v2990_v24 = vsel %vm1651_vm5, %v8973_v39, %v7316_v36  ;;  %v3219_v36 = vld [vmem:[%s8819_s21 + $0x208] sm:$0xff] }
 0xbac   : > { %v2993_v45 = vsel %vm2991_vm7, %v2990_v24, %v7321_v38  ;;  %v3227_v38 = vld [vmem:[%s8819_s21 + $0x248] sm:$0xff] }
 0xbad   : > { %v6508_v24 = vcombine.high %v3219_v36, %v3227_v38 }
 0xbae   : > { %7086 = vmatpush3.bf16.msra.mxu0 %v7366_v32  ;;  %v3243_v32 = vld [vmem:[%s8819_s21 + $0x2c8] sm:$0xff] }
 0xbaf   : > { %4049 = vmatprep.subr.bf16.mxu0 %v6556_v11  ;;  %v3155_v11 = vld [vmem:[%s8819_s21 + $0x8] sm:$0xff] }
 0xc51   : > { %v2885_v30 = vpop.f32.mrf.mxu0 }
 0xc53   : > { %v7065_v31 = vpop.f32.mrf.mxu0 }
 0xc54   : > { %v6522_v31 = vcombine.high %v3234_v28, %v3242_v29 }
 0xc56   : > { %4010 = vmatprep.subr.bf16.mxu1 %v6522_v31 }
 0xc5c   : > { %v2961_v33 = vpop.f32.mrf.mxu1 }
 0xc5d   : > { %v7322_v34 = vpack.i.bf16 %v2961_v33, %v2885_v30  ;;  %v3235_v30 = vld [vmem:[%s8819_s21 + $0x288] sm:$0xff]  ;;  %v6521_v33 = vcombine.low %v3234_v28, %v3242_v29 }
 0xc5e   : > { %v7070_v35 = vpop.f32.mrf.mxu1 }
 0xc5f   : > { %7323 = vrot.lane.b32.xlu0 %v7322_v34, %s8207_s28  ;;  %v6523_v34 = vcombine.low %v3235_v30, %v3243_v32  ;;  %v6524_v35 = vcombine.high %v3235_v30, %v3243_v32  ;;  %4011 = vmatpush1.bf16.msra.mxu1 %v6521_v33 }
 0xc60   : > { %4012 = vmatprep.subr.bf16.mxu1 %v6506_v2  ;;  %v6440_v2 = vld [vmem:[%s1009_s1] ss:$0 sm:$0xff] }
 0xc63   : > { %4013 = vmatpush1.bf16.msra.mxu1 %v6505_v40  ;;  %v3252_v40 = vld [vmem:[%s8819_s21 + $0x310] sm:$0xff] }
 0xcd1   : > { %v7324_v41 = vpop.permute.xlu0 %7323 }
 0xcd2   : > { %v7326_v43 = vunpack.i.h.bf16 %v7324_v41  ;;  %v7325_v44 = vunpack.i.l.bf16 %v7324_v41  ;;  %v6507_v41 = vcombine.low %v3219_v36, %v3227_v38 }
 0xcd4   : > { %v2996_v46 = vsel %vm2994_vm8, %v2993_v45, %v7326_v43  ;;  %v2995_v47 = vsel %vm2994_vm8, %v2992_v58, %v7325_v44  ;;  %v3210_v43 = vld [vmem:[%s8819_s21 + $0x1c0] sm:$0xff]  ;;  %v3203_v44 = vld [vmem:[%s8819_s21 + $0x188] sm:$0xff] }
 0xcd5   : > { %v2997_v48 = vpack.c.bf16 %v2996_v46, %v2995_v47  ;;  %v6490_v58 = vcombine.high %v3202_v42, %v3210_v43  ;;  %v3211_v45 = vld [vmem:[%s8819_s21 + $0x1c8] sm:$0xff]  ;;  %v6489_v46 = vcombine.low %v3202_v42, %v3210_v43  ;;  %v3261_v42 = vld [vmem:[%s8819_s21 + $0x358] sm:$0xff] }
 0xcd6   : > { %v6491_v47 = vcombine.low %v3203_v44, %v3211_v45 }
 0xcd7   : > { %7088 = vmatmul.mubr.bf16.vlgmr.msra.gmra.mxu0 %v2997_v48  ;;  %v6492_v48 = vcombine.high %v3203_v44, %v3211_v45  ;;  %4014 = vmatprep.subr.bf16.mxu1 %v6490_v58 }
 0xcd8   : > { %4081 = vmatprep.mubr.bf16.mxu0 %v8204_v23  ;;  %4050 = vmatpush1.bf16.msra.mxu0 %v6555_v10  ;;  %v3162_v10 = vld [vmem:[%s8819_s21 + $0x40] sm:$0xff] }
 0xcd9   : > { %4051 = vmatprep.subr.bf16.mxu0 %v6540_v27  ;;  %4015 = vmatpush1.bf16.msra.mxu1 %v6489_v46  ;;  %v3244_v46 = vld [vmem:[%s8819_s21 + $0x2d0] sm:$0xff] }
 0xcdc   : > { %4052 = vmatpush1.bf16.msra.mxu0 %v6539_v26  ;;  %v6560_v26 = vcombine.high %v3269_v4, %v3277_v22  ;;  %v3180_v22 = vld [vmem:[%s8819_s21 + $0xd0] sm:$0xff] }
 0xcdd   : > { %4053 = vmatprep.subr.bf16.mxu0 %v6524_v35  ;;  %v6439_v35 = vld [vmem:[%s1001_s27] ss:$0 sm:$0xff]  ;;  %s9608_s27 = sld [smem:[#allocation39_spill]] }
 0xce0   : > { %4054 = vmatpush1.bf16.msra.mxu0 %v6523_v34 }
 0xce1   : > { %4055 = vmatprep.subr.bf16.mxu0 %v6508_v24  ;;  %v3253_v24 = vld [vmem:[%s8819_s21 + $0x318] sm:$0xff] }
 0xce2   : > { %v6544_v45 = vcombine.high %v3253_v24, %v3261_v42 }
 0xce3   : > { %p6700_p3 = scmp.ne.s32.totalorder %s9608_s27, 3 }
 0xce4   : > { %4056 = vmatpush1.bf16.msra.mxu0 %v6507_v41  ;;  %v3260_v41 = vld [vmem:[%s8819_s21 + $0x350] sm:$0xff] }
 0xce5   : > { %4057 = vmatprep.subr.bf16.mxu0 %v6492_v48  ;;  %v6542_v58 = vcombine.high %v3252_v40, %v3260_v41  ;;  %v3245_v48 = vld [vmem:[%s8819_s21 + $0x2d8] sm:$0xff] }
 0xce8   : > { %4058 = vmatpush1.bf16.msra.mxu0 %v6491_v47  ;;  %v3237_v47 = vld [vmem:[%s8819_s21 + $0x298] sm:$0xff] }
 0xd97   : > { %v3103_v50 = vpop.f32.mrf.mxu0 }
 0xd98   : > { %v3104_v39 = vadd.f32 %v6430_v49, %v3103_v50  ;;  %v3194_v50 = vld [vmem:[%s8819_s21 + $0x140] sm:$0xff] }
 0xd99   : > { %v7089_v53 = vpop.f32.mrf.mxu0 }
 0xd9a   : > { %v3110_v55 = vadd.f32 %v7535_v37, %v3104_v39  ;;  %v3187_v39 = vld [vmem:[%s8819_s21 + $0x108] sm:$0xff] }
 0xd9b   : > { %v3106_v56 = vpop.f32.mrf.mxu0  ;;  %v3195_v37 = vld [vmem:[%s8819_s21 + $0x148] sm:$0xff] }
 0xd9c   : > { %v3107_v57 = vadd.f32 %v6430_v49, %v3106_v56  ;;  %3114 = vadd.xlane.f32.xlu1 %v3110_v55  ;;  %v3186_v49 = vld [vmem:[%s8819_s21 + $0x100] sm:$0xff]  ;;  %v6475_v56 = vcombine.low %v3187_v39, %v3195_v37 }
 0xd9d   : > { %v7090_v59 = vpop.f32.mrf.mxu0  ;;  %v6474_v53 = vcombine.high %v3186_v49, %v3194_v50 }
 0xd9e   : > { %v3111_v63 = vadd.f32 %v7536_v61, %v3107_v57  ;;  %v6476_v57 = vcombine.high %v3187_v39, %v3195_v37  ;;  %v3170_v59 = vld [vmem:[%s8819_s21 + $0x80] sm:$0xff]  ;;  %v3220_v37 = vld [vmem:[%s8819_s21 + $0x210] sm:$0xff] }
 0xd9f   : > { %4016 = vmatprep.subr.bf16.mxu1 %v6474_v53  ;;  %v3178_v61 = vld [vmem:[%s8819_s21 + $0xc0] sm:$0xff]  ;;  %v6528_v53 = vcombine.high %v3237_v47, %v3245_v48 }
 0xda0   : > { %3116 = vadd.xlane.f32.xlu0 %v3111_v63  ;;  %4059 = vmatprep.subr.bf16.mxu0 %v6476_v57  ;;  %v6458_v1 = vcombine.high %v3170_v59, %v3178_v61  ;;  %v6457_v5 = vcombine.low %v3170_v59, %v3178_v61  ;;  %v3229_v57 = vld [vmem:[%s8819_s21 + $0x258] sm:$0xff]  ;;  %v6527_v61 = vcombine.low %v3237_v47, %v3245_v48  ;;  %v3255_v47 = vld [vmem:[%s8819_s21 + $0x328] sm:$0xff] }
 0xda1   : > { %4060 = vmatpush1.bf16.msra.mxu0 %v6475_v56  ;;  %v3221_v56 = vld [vmem:[%s8819_s21 + $0x218] sm:$0xff]  ;;  %v3263_v48 = vld [vmem:[%s8819_s21 + $0x368] sm:$0xff] }
 0xe25   : > { %v3115_v12 = vpop.xlane.xlu1 %3114 }
 0xe26   : > { %v3119_v7 = vmul.f32 0.0078125, %v3115_v12  ;;  %v6442_v12 = vcombine.high %v3154_v9, %v3162_v10 }
 0xe28   : > { %v9095_v13 = vsub.f32 %v3110_v55, %v3119_v7  ;;  %v6473_v55 = vcombine.low %v3186_v49, %v3194_v50  ;;  %v3163_v7 = vld [vmem:[%s8819_s21 + $0x48] sm:$0xff]  ;;  %v6541_v49 = vcombine.low %v3252_v40, %v3260_v41  ;;  %v6543_v50 = vcombine.low %v3253_v24, %v3261_v42 }
 0xe29   : > { %v3117_v14 = vpop.xlane.xlu0 %3116  ;;  %v3271_v40 = vld [vmem:[%s8819_s21 + $0x3a8] sm:$0xff] }
 0xe2a   : > { %v3120_v15 = vmul.f32 0.0078125, %v3117_v14  ;;  %v3123_v16 = vmul.f32 %v9095_v13, %v9095_v13  ;;  %4017 = vmatpush1.bf16.msra.mxu1 %v6473_v55  ;;  %v6441_v14 = vcombine.low %v3154_v9, %v3162_v10  ;;  %v3228_v55 = vld [vmem:[%s8819_s21 + $0x250] sm:$0xff]  ;;  %v6511_v10 = vcombine.low %v3221_v56, %v3229_v57  ;;  %v3279_v41 = vld [vmem:[%s8819_s21 + $0x3e8] sm:$0xff] }
 0xe2b   : > { %4018 = vmatprep.subr.bf16.mxu1 %v6458_v1  ;;  %v6512_v1 = vcombine.high %v3221_v56, %v3229_v57  ;;  %v6509_v9 = vcombine.low %v3220_v37, %v3228_v55  ;;  %v3239_v56 = vld [vmem:[%s8819_s21 + $0x2a8] sm:$0xff] }
 0xe2c   : > { %v9099_v17 = vsub.f32 %v3111_v63, %v3120_v15  ;;  %3125 = vadd.xlane.f32.xlu0 %v3123_v16  ;;  %v3171_v63 = vld [vmem:[%s8819_s21 + $0x88] sm:$0xff]  ;;  %v6443_v15 = vcombine.low %v3155_v11, %v3163_v7  ;;  %v6444_v16 = vcombine.high %v3155_v11, %v3163_v7  ;;  %v3188_v7 = vld [vmem:[%s8819_s21 + $0x110] sm:$0xff] }
 0xe2d   : > { %v6459_v6 = vcombine.low %v3171_v63, %v3179_v3  ;;  %v6460_v8 = vcombine.high %v3171_v63, %v3179_v3  ;;  %v6510_v63 = vcombine.high %v3220_v37, %v3228_v55  ;;  %v3204_v3 = vld [vmem:[%s8819_s21 + $0x190] sm:$0xff]  ;;  %v3238_v37 = vld [vmem:[%s8819_s21 + $0x2a0] sm:$0xff]  ;;  %v3247_v57 = vld [vmem:[%s8819_s21 + $0x2e8] sm:$0xff] }
 0xe2e   : > { %v3124_v18 = vmul.f32 %v9099_v17, %v9099_v17  ;;  %4019 = vmatpush1.bf16.msra.mxu1 %v6457_v5  ;;  %v3212_v5 = vld [vmem:[%s8819_s21 + $0x1d0] sm:$0xff]  ;;  %v3246_v55 = vld [vmem:[%s8819_s21 + $0x2e0] sm:$0xff] }
 0xe2f   : > { %4061 = vmatprep.subr.bf16.mxu0 %v6460_v8  ;;  %4020 = vmatprep.subr.bf16.mxu1 %v6442_v12  ;;  %v3213_v8 = vld [vmem:[%s8819_s21 + $0x1d8] sm:$0xff]  ;;  %v6494_v11 = vcombine.high %v3204_v3, %v3212_v5 }
 0xe30   : > { %3127 = vadd.xlane.f32.xlu0 %v3124_v18  ;;  %4062 = vmatpush1.bf16.msra.mxu0 %v6459_v6  ;;  %v3268_v18 = vld [vmem:[%s8819_s21 + $0x390] sm:$0xff]  ;;  %v3205_v6 = vld [vmem:[%s8819_s21 + $0x198] sm:$0xff] }
 0xe31   : > { %4063 = vmatprep.subr.bf16.mxu0 %v6444_v16  ;;  %v6557_v20 = vcombine.low %v3268_v18, %v3276_v19  ;;  %v6558_v21 = vcombine.high %v3268_v18, %v3276_v19  ;;  %v6496_v12 = vcombine.high %v3205_v6, %v3213_v8  ;;  %v3197_v16 = vld [vmem:[%s8819_s21 + $0x158] sm:$0xff]  ;;  %v6493_v18 = vcombine.low %v3204_v3, %v3212_v5  ;;  %v3222_v3 = vld [vmem:[%s8819_s21 + $0x220] sm:$0xff] }
 0xe32   : > { %4021 = vmatpush1.bf16.msra.mxu1 %v6441_v14  ;;  %v3196_v14 = vld [vmem:[%s8819_s21 + $0x150] sm:$0xff]  ;;  %v6495_v19 = vcombine.low %v3205_v6, %v3213_v8  ;;  %v3230_v5 = vld [vmem:[%s8819_s21 + $0x260] sm:$0xff]  ;;  %v3223_v6 = vld [vmem:[%s8819_s21 + $0x228] sm:$0xff] }
 0xe33   : > { %4092 = vmatprep.subr.bf16.mxu1 %v6558_v21  ;;  %v6478_v4 = vcombine.high %v3188_v7, %v3196_v14  ;;  %v3172_v21 = vld [vmem:[%s8819_s21 + $0x90] sm:$0xff]  ;;  %v3231_v8 = vld [vmem:[%s8819_s21 + $0x268] sm:$0xff] }
 0xe34   : > { %4064 = vmatpush1.bf16.msra.mxu0 %v6443_v15  ;;  %v3189_v15 = vld [vmem:[%s8819_s21 + $0x118] sm:$0xff] }
 0xe35   : > { %4135 = vmatprep.subr.bf16.mxu0 %v6560_v26  ;;  %v3181_v26 = vld [vmem:[%s8819_s21 + $0xd8] sm:$0xff] }
 0xeb5   : > { %v3126_v27 = vpop.xlane.xlu0 %3125 }
 0xeb6   : > { %v3129_v28 = vmul.f32 0.0078125, %v3126_v27  ;;  %v6477_v27 = vcombine.low %v3188_v7, %v3196_v14  ;;  %v3206_v7 = vld [vmem:[%s8819_s21 + $0x1a0] sm:$0xff] }
 0xeb7   : > { %v3214_v14 = vld [vmem:[%s8819_s21 + $0x1e0] sm:$0xff] }
 0xeb8   : > { %v3131_v29 = vadd.f32 1e-05, %v3129_v28  ;;  %v6479_v28 = vcombine.low %v3189_v15, %v3197_v16 }
 0xeb9   : > { %v3128_v30 = vpop.xlane.xlu0 %3127 }
 0xeba   : > { %7527 = vrsqrt.f32 %v3131_v29  ;;  %v3130_v31 = vmul.f32 0.0078125, %v3128_v30  ;;  %v6462_v29 = vcombine.high %v3172_v21, %v3180_v22 }
 0xebc   : > { %v3132_v32 = vadd.f32 1e-05, %v3130_v31  ;;  %v3156_v31 = vld [vmem:[%s8819_s21 + $0x10] sm:$0xff] }
 0xebe   : > { %7529 = vrsqrt.f32 %v3132_v32  ;;  %v3164_v32 = vld [vmem:[%s8819_s21 + $0x50] sm:$0xff] }
 0xebf   : > { %v6445_v24 = vcombine.low %v3156_v31, %v3164_v32 }
 0xec7   : > { %v7528_v33 = vpop.eup %7527 }
 0xec8   : > { %v3135_v34 = vmul.f32 %v7528_v33, %v9095_v13  ;;  %v3157_v33 = vld [vmem:[%s8819_s21 + $0x18] sm:$0xff] }
 0xeca   : > { %v3143_v0 = vmul.f32 %v6439_v35, %v3135_v34  ;;  %v3165_v34 = vld [vmem:[%s8819_s21 + $0x58] sm:$0xff] }
 0xecb   : > { %v7530_v60 = vpop.eup %7529  ;;  %v6447_v42 = vcombine.low %v3157_v33, %v3165_v34 }
 0xecc   : > { %v3136_v36 = vmul.f32 %v7530_v60, %v9099_v17  ;;  %v9145_v43 = vadd.f32 %v6440_v2, %v3143_v0  ;;  %v3236_v17 = vld [vmem:[%s8819_s21 + $0x290] sm:$0xff]  ;;  %v6446_v0 = vcombine.high %v3156_v31, %v3164_v32  ;;  %v3174_v31 = vld [vmem:[%s8819_s21 + $0xa0] sm:$0xff] }
 0xecd   : > { %v6526_v39 = vcombine.high %v3236_v17, %v3244_v46  ;;  %v6525_v59 = vcombine.low %v3236_v17, %v3244_v46  ;;  %v3254_v17 = vld [vmem:[%s8819_s21 + $0x320] sm:$0xff] }
 0xece   : > { %v3144_v38 = vmul.f32 %v6439_v35, %v3136_v36  ;;  %v6461_v35 = vcombine.low %v3172_v21, %v3180_v22  ;;  %v6448_v36 = vcombine.high %v3157_v33, %v3165_v34  ;;  %v3262_v46 = vld [vmem:[%s8819_s21 + $0x360] sm:$0xff]  ;;  %v3175_v33 = vld [vmem:[%s8819_s21 + $0xa8] sm:$0xff] }
 0xecf   : > { %v3190_v21 = vld [vmem:[%s8819_s21 + $0x120] sm:$0xff]  ;;  %v3183_v34 = vld [vmem:[%s8819_s21 + $0xe8] sm:$0xff] }
 0xed0   : > { %v9147_v13 = vadd.f32 %v6440_v2, %v3144_v38  ;;  %v3270_v2 = vld [vmem:[%s8819_s21 + $0x3a0] sm:$0xff] }
 0xed1   : > { %v3278_v38 = vld [vmem:[%s8819_s21 + $0x3e0] sm:$0xff] }
 0xed2   : > { %v9151_v44 = vpack.c.bf16 %v9147_v13, %v9145_v43  ;;  %v3198_v22 = vld [vmem:[%s8819_s21 + $0x160] sm:$0xff] }
 0xed3   : > { %v3182_v32 = vld [vmem:[%s8819_s21 + $0xe0] sm:$0xff] }
 0xed4   : > { %4039 = vmatmul.mubr.bf16.vlgmr.msra.gmra.mxu1 %v9151_v44  ;;  %4082 = vmatmul.mubr.bf16.vlgmr.msra.gmra.mxu0 %v9151_v44 }
 0xed5   : > { %4093 = vmatpush1.bf16.msra.mxu1 %v6557_v20  ;;  %4136 = vmatpush1.bf16.msra.mxu0 %v6559_v25  ;;  %v6480_v20 = vcombine.high %v3189_v15, %v3197_v16  ;;  %v3173_v25 = vld [vmem:[%s8819_s21 + $0x98] sm:$0xff]  ;;  %v3207_v15 = vld [vmem:[%s8819_s21 + $0x1a8] sm:$0xff] }
 0xed6   : > { %4094 = vmatprep.subr.bf16.mxu1 %v6542_v58  ;;  %4137 = vmatprep.subr.bf16.mxu0 %v6544_v45  ;;  %v6464_v30 = vcombine.high %v3173_v25, %v3181_v26  ;;  %v6463_v60 = vcombine.low %v3173_v25, %v3181_v26  ;;  %v6562_v58 = vcombine.high %v3270_v2, %v3278_v38  ;;  %v3215_v16 = vld [vmem:[%s8819_s21 + $0x1e8] sm:$0xff] }
 0xed7   : > { %4124 = vmatprep.mubr.bf16.mxu1 %v8204_v23  ;;  %4167 = vmatprep.mubr.bf16.mxu0 %v8204_v23  ;;  %v6564_v45 = vcombine.high %v3271_v40, %v3279_v41  ;;  %v3191_v25 = vld [vmem:[%s8819_s21 + $0x128] sm:$0xff] }
 0xed8   : > { %v3199_v26 = vld [vmem:[%s8819_s21 + $0x168] sm:$0xff] }
 0xed9   : > { %4095 = vmatpush1.bf16.msra.mxu1 %v6541_v49  ;;  %4138 = vmatpush1.bf16.msra.mxu0 %v6543_v50  ;;  %v6561_v49 = vcombine.low %v3270_v2, %v3278_v38  ;;  %v6563_v50 = vcombine.low %v3271_v40, %v3279_v41  ;;  %v3158_v2 = vld [vmem:[%s8819_s21 + $0x20] sm:$0xff]  ;;  %v3159_v40 = vld [vmem:[%s8819_s21 + $0x28] sm:$0xff] }
 0xeda   : > { %4096 = vmatprep.subr.bf16.mxu1 %v6526_v39  ;;  %4139 = vmatprep.subr.bf16.mxu0 %v6528_v53  ;;  %v6546_v39 = vcombine.high %v3254_v17, %v3262_v46  ;;  %v6548_v53 = vcombine.high %v3255_v47, %v3263_v48  ;;  %v3166_v38 = vld [vmem:[%s8819_s21 + $0x60] sm:$0xff]  ;;  %v3167_v41 = vld [vmem:[%s8819_s21 + $0x68] sm:$0xff] }
 0xedd   : > { %4097 = vmatpush1.bf16.msra.mxu1 %v6525_v59  ;;  %4140 = vmatpush1.bf16.msra.mxu0 %v6527_v61  ;;  %v6545_v59 = vcombine.low %v3254_v17, %v3262_v46  ;;  %v6547_v61 = vcombine.low %v3255_v47, %v3263_v48  ;;  %v3272_v17 = vld [vmem:[%s8819_s21 + $0x3b0] sm:$0xff]  ;;  %v3273_v47 = vld [vmem:[%s8819_s21 + $0x3b8] sm:$0xff] }
 0xede   : > { %4098 = vmatprep.subr.bf16.mxu1 %v6510_v63  ;;  %4141 = vmatprep.subr.bf16.mxu0 %v6512_v1  ;;  %v6530_v63 = vcombine.high %v3238_v37, %v3246_v55  ;;  %v6532_v1 = vcombine.high %v3239_v56, %v3247_v57  ;;  %v3280_v46 = vld [vmem:[%s8819_s21 + $0x3f0] sm:$0xff]  ;;  %v3281_v48 = vld [vmem:[%s8819_s21 + $0x3f8] sm:$0xff] }
 0xee1   : > { %4099 = vmatpush1.bf16.msra.mxu1 %v6509_v9  ;;  %4142 = vmatpush1.bf16.msra.mxu0 %v6511_v10  ;;  %v6529_v9 = vcombine.low %v3238_v37, %v3246_v55  ;;  %v6531_v10 = vcombine.low %v3239_v56, %v3247_v57  ;;  %v3256_v37 = vld [vmem:[%s8819_s21 + $0x330] sm:$0xff]  ;;  %v3257_v56 = vld [vmem:[%s8819_s21 + $0x338] sm:$0xff] }
 0xee2   : > { %4100 = vmatprep.subr.bf16.mxu1 %v6494_v11  ;;  %4143 = vmatprep.subr.bf16.mxu0 %v6496_v12  ;;  %v6514_v11 = vcombine.high %v3222_v3, %v3230_v5  ;;  %v6516_v12 = vcombine.high %v3223_v6, %v3231_v8  ;;  %v3264_v55 = vld [vmem:[%s8819_s21 + $0x370] sm:$0xff]  ;;  %v3265_v57 = vld [vmem:[%s8819_s21 + $0x378] sm:$0xff] }
 0xee5   : > { %4101 = vmatpush1.bf16.msra.mxu1 %v6493_v18  ;;  %4144 = vmatpush1.bf16.msra.mxu0 %v6495_v19  ;;  %v6513_v18 = vcombine.low %v3222_v3, %v3230_v5  ;;  %v6515_v19 = vcombine.low %v3223_v6, %v3231_v8  ;;  %v3240_v3 = vld [vmem:[%s8819_s21 + $0x2b0] sm:$0xff]  ;;  %v3241_v6 = vld [vmem:[%s8819_s21 + $0x2b8] sm:$0xff] }
 0xee6   : > { %4102 = vmatprep.subr.bf16.mxu1 %v6478_v4  ;;  %4145 = vmatprep.subr.bf16.mxu0 %v6480_v20  ;;  %v6498_v4 = vcombine.high %v3206_v7, %v3214_v14  ;;  %v6500_v20 = vcombine.high %v3207_v15, %v3215_v16  ;;  %v3248_v5 = vld [vmem:[%s8819_s21 + $0x2f0] sm:$0xff]  ;;  %v3249_v8 = vld [vmem:[%s8819_s21 + $0x2f8] sm:$0xff] }
 0xee9   : > { %4103 = vmatpush1.bf16.msra.mxu1 %v6477_v27  ;;  %4146 = vmatpush1.bf16.msra.mxu0 %v6479_v28  ;;  %v6497_v27 = vcombine.low %v3206_v7, %v3214_v14  ;;  %v6499_v28 = vcombine.low %v3207_v15, %v3215_v16  ;;  %v3224_v7 = vld [vmem:[%s8819_s21 + $0x230] sm:$0xff]  ;;  %v3225_v15 = vld [vmem:[%s8819_s21 + $0x238] sm:$0xff] }
 0xeea   : > { %4104 = vmatprep.subr.bf16.mxu1 %v6462_v29  ;;  %4147 = vmatprep.subr.bf16.mxu0 %v6464_v30  ;;  %v6482_v29 = vcombine.high %v3190_v21, %v3198_v22  ;;  %v6484_v30 = vcombine.high %v3191_v25, %v3199_v26  ;;  %v3232_v14 = vld [vmem:[%s8819_s21 + $0x270] sm:$0xff]  ;;  %v3233_v16 = vld [vmem:[%s8819_s21 + $0x278] sm:$0xff] }
 0xeed   : > { %4105 = vmatpush1.bf16.msra.mxu1 %v6461_v35  ;;  %4148 = vmatpush1.bf16.msra.mxu0 %v6463_v60  ;;  %v6481_v35 = vcombine.low %v3190_v21, %v3198_v22  ;;  %v6483_v60 = vcombine.low %v3191_v25, %v3199_v26  ;;  %v3208_v21 = vld [vmem:[%s8819_s21 + $0x1b0] sm:$0xff]  ;;  %v3209_v25 = vld [vmem:[%s8819_s21 + $0x1b8] sm:$0xff] }
 0xeee   : > { %4106 = vmatprep.subr.bf16.mxu1 %v6446_v0  ;;  %4149 = vmatprep.subr.bf16.mxu0 %v6448_v36  ;;  %v6466_v0 = vcombine.high %v3174_v31, %v3182_v32  ;;  %v6468_v36 = vcombine.high %v3175_v33, %v3183_v34  ;;  %v3216_v22 = vld [vmem:[%s8819_s21 + $0x1f0] sm:$0xff]  ;;  %v3217_v26 = vld [vmem:[%s8819_s21 + $0x1f8] sm:$0xff] }
 0xef1   : > { %4107 = vmatpush1.bf16.msra.mxu1 %v6445_v24  ;;  %4150 = vmatpush1.bf16.msra.mxu0 %v6447_v42  ;;  %v6465_v24 = vcombine.low %v3174_v31, %v3182_v32  ;;  %v6467_v42 = vcombine.low %v3175_v33, %v3183_v34  ;;  %v3200_v31 = vld [vmem:[%s8819_s21 + $0x170] sm:$0xff]  ;;  %v3193_v32 = vld [vmem:[%s8819_s21 + $0x138] sm:$0xff]  ;;  %v6501_v34 = vcombine.low %v3208_v21, %v3216_v22 }
 0xef2   : > { %4178 = vmatprep.subr.bf16.mxu1 %v6562_v58  ;;  %4221 = vmatprep.subr.bf16.mxu0 %v6564_v45  ;;  %v6450_v58 = vcombine.high %v3158_v2, %v3166_v38  ;;  %v6452_v45 = vcombine.high %v3159_v40, %v3167_v41  ;;  %v3201_v33 = vld [vmem:[%s8819_s21 + $0x178] sm:$0xff] }
 0xef4   : > { %4125 = vmatmul.mubr.bf16.vlgmr.msra.gmra.mxu1 %v9151_v44  ;;  %4168 = vmatmul.mubr.bf16.vlgmr.msra.gmra.mxu0 %v9151_v44 }
 0xef5   : > { %4179 = vmatpush1.bf16.msra.mxu1 %v6561_v49  ;;  %4222 = vmatpush1.bf16.msra.mxu0 %v6563_v50  ;;  %v6449_v49 = vcombine.low %v3158_v2, %v3166_v38  ;;  %v6451_v50 = vcombine.low %v3159_v40, %v3167_v41  ;;  %v3184_v2 = vld [vmem:[%s8819_s21 + $0xf0] sm:$0xff]  ;;  %v3177_v38 = vld [vmem:[%s8819_s21 + $0xb8] sm:$0xff] }
 0xef6   : > { %4180 = vmatprep.subr.bf16.mxu1 %v6546_v39  ;;  %4223 = vmatprep.subr.bf16.mxu0 %v6548_v53  ;;  %v6566_v39 = vcombine.high %v3272_v17, %v3280_v46  ;;  %v6568_v53 = vcombine.high %v3273_v47, %v3281_v48  ;;  %v3185_v40 = vld [vmem:[%s8819_s21 + $0xf8] sm:$0xff] }
 0xef7   : > { %4210 = vmatprep.mubr.bf16.mxu1 %v8204_v23  ;;  %4253 = vmatprep.mubr.bf16.mxu0 %v8204_v23 }
 0xef9   : > { %4181 = vmatpush1.bf16.msra.mxu1 %v6545_v59  ;;  %4224 = vmatpush1.bf16.msra.mxu0 %v6547_v61  ;;  %v6565_v59 = vcombine.low %v3272_v17, %v3280_v46  ;;  %v6567_v61 = vcombine.low %v3273_v47, %v3281_v48  ;;  %v3168_v17 = vld [vmem:[%s8819_s21 + $0x70] sm:$0xff]  ;;  %v3161_v46 = vld [vmem:[%s8819_s21 + $0x38] sm:$0xff] }
 0xefa   : > { %4182 = vmatprep.subr.bf16.mxu1 %v6530_v63  ;;  %4225 = vmatprep.subr.bf16.mxu0 %v6532_v1  ;;  %v6550_v63 = vcombine.high %v3256_v37, %v3264_v55  ;;  %v6552_v1 = vcombine.high %v3257_v56, %v3265_v57  ;;  %v3169_v47 = vld [vmem:[%s8819_s21 + $0x78] sm:$0xff] }
 0xefd   : > { %4183 = vmatpush1.bf16.msra.mxu1 %v6529_v9  ;;  %4226 = vmatpush1.bf16.msra.mxu0 %v6531_v10  ;;  %v6549_v9 = vcombine.low %v3256_v37, %v3264_v55  ;;  %v6551_v10 = vcombine.low %v3257_v56, %v3265_v57  ;;  %v6455_v37 = vcombine.low %v3161_v46, %v3169_v47  ;;  %v7367_v55 = vld [vmem:[%s8823_s8 + $0x78] sm:$0xff]  }
 0xefe   : > { %4184 = vmatprep.subr.bf16.mxu1 %v6514_v11  ;;  %4227 = vmatprep.subr.bf16.mxu0 %v6516_v12  ;;  %v6534_v11 = vcombine.high %v3240_v3, %v3248_v5  ;;  %v6536_v12 = vcombine.high %v3241_v6, %v3249_v8  ;;  %v7368_v56 = vld [vmem:[%s8823_s8 + $0xf8] sm:$0xff]  }
 0xeff   : > { %v7369_v57 = vld [vmem:[%s8823_s8 + $0x38] sm:$0xff]  }
 0xf01   : > { %4185 = vmatpush1.bf16.msra.mxu1 %v6513_v18  ;;  %4228 = vmatpush1.bf16.msra.mxu0 %v6515_v19  ;;  %v6533_v18 = vcombine.low %v3240_v3, %v3248_v5  ;;  %v6535_v19 = vcombine.low %v3241_v6, %v3249_v8  ;;  %v7374_v3 = vld [vmem:[%s8823_s8 + $0xb0] sm:$0xff]   ;;  %v7375_v5 = vld [vmem:[%s8823_s8 + $0x68] sm:$0xff]  }
 0xf02   : > { %4186 = vmatprep.subr.bf16.mxu1 %v6498_v4  ;;  %4229 = vmatprep.subr.bf16.mxu0 %v6500_v20  ;;  %v6518_v4 = vcombine.high %v3224_v7, %v3232_v14  ;;  %v6520_v20 = vcombine.high %v3225_v15, %v3233_v16  ;;  %v7376_v6 = vld [vmem:[%s8823_s8 + $0xe8] sm:$0xff]  }
 0xf03   : > { %v7377_v8 = vld [vmem:[%s8823_s8 + $0x28] sm:$0xff]  }
 0xf05   : > { %4187 = vmatpush1.bf16.msra.mxu1 %v6497_v27  ;;  %4230 = vmatpush1.bf16.msra.mxu0 %v6499_v28  ;;  %v6517_v27 = vcombine.low %v3224_v7, %v3232_v14  ;;  %v6502_v28 = vcombine.high %v3208_v21, %v3216_v22  ;;  %v7383_v7 = vld [vmem:[%s8823_s8 + $0x58] sm:$0xff]   ;;  %v7391_v21 = vld [vmem:[%s8823_s8 + $0x48] sm:$0xff]  }
 0xf06   : > { %4188 = vmatprep.subr.bf16.mxu1 %v6482_v29  ;;  %4231 = vmatprep.subr.bf16.mxu0 %v6484_v30  ;;  %v6504_v29 = vcombine.high %v3209_v25, %v3217_v26  ;;  %v3192_v30 = vld [vmem:[%s8819_s21 + $0x130] sm:$0xff]  ;;  %v7384_v14 = vld [vmem:[%s8823_s8 + $0xd8] sm:$0xff]   ;;  %v7392_v22 = vld [vmem:[%s8823_s8 + $0xc8] sm:$0xff]  }
 0xf07   : > { %v6485_v41 = vcombine.low %v3192_v30, %v3200_v31 }
 0xf09   : > { %4189 = vmatpush1.bf16.msra.mxu1 %v6481_v35  ;;  %4232 = vmatpush1.bf16.msra.mxu0 %v6483_v60  ;;  %v6503_v35 = vcombine.low %v3209_v25, %v3217_v26  ;;  %v6486_v60 = vcombine.high %v3192_v30, %v3200_v31  ;;  %v7393_v25 = vld [vmem:[%s8823_s8 + $0x8] sm:$0xff]   ;;  %v7399_v30 = vld [vmem:[%s8823_s8 + $0x178] sm:$0xff]  }
 0xf0a   : > { %4190 = vmatprep.subr.bf16.mxu1 %v6466_v0  ;;  %4233 = vmatprep.subr.bf16.mxu0 %v6468_v36  ;;  %v6488_v0 = vcombine.high %v3193_v32, %v3201_v33  ;;  %v3176_v36 = vld [vmem:[%s8819_s21 + $0xb0] sm:$0xff]  ;;  %v7394_v26 = vld [vmem:[%s8823_s8 + $0x88] sm:$0xff]   ;;  %v7400_v31 = vld [vmem:[%s8823_s8 + $0x1f8] sm:$0xff]  }
 0xf0b   : > { %v6469_v48 = vcombine.low %v3176_v36, %v3184_v2 }
 0xf0d   : > { %4191 = vmatpush1.bf16.msra.mxu1 %v6465_v24  ;;  %4234 = vmatpush1.bf16.msra.mxu0 %v6467_v42  ;;  %v6487_v24 = vcombine.low %v3193_v32, %v3201_v33  ;;  %v6470_v42 = vcombine.high %v3176_v36, %v3184_v2  ;;  %v3300_v32 = vsub.s32 3, %v8898_v51  ;;  %v9291_v33 = vld [vmem:[%s8821_s26] sm:$0xff] }
 0xf0e   : > { %4192 = vmatprep.subr.bf16.mxu1 %v6450_v58  ;;  %4235 = vmatprep.subr.bf16.mxu0 %v6452_v45  ;;  %v6472_v58 = vcombine.high %v3177_v38, %v3185_v40  ;;  %v3160_v45 = vld [vmem:[%s8819_s21 + $0x30] sm:$0xff]  ;;  %v3289_v36 = vrot.slane %v9291_v33, %v8901_v52  ;;  %v3297_v2 = vrot.slane %v9291_v33, %v8916_v62 }
 0xf11   : > { %4193 = vmatpush1.bf16.msra.mxu1 %v6449_v49  ;;  %4236 = vmatpush1.bf16.msra.mxu0 %v6451_v50  ;;  %v6471_v49 = vcombine.low %v3177_v38, %v3185_v40  ;;  %v6454_v50 = vcombine.high %v3160_v45, %v3168_v17 }
 0xf12   : > { %4264 = vmatprep.subr.bf16.mxu1 %v6566_v39  ;;  %4307 = vmatprep.subr.bf16.mxu0 %v6568_v53  ;;  %v6456_v39 = vcombine.high %v3161_v46, %v3169_v47  ;;  %v6453_v53 = vcombine.low %v3160_v45, %v3168_v17 }
 0xf14   : > { %4211 = vmatmul.mubr.bf16.vlgmr.msra.gmra.mxu1 %v9151_v44  ;;  %4254 = vmatmul.mubr.bf16.vlgmr.msra.gmra.mxu0 %v9151_v44 }
 0xf15   : > { %4265 = vmatpush1.bf16.msra.mxu1 %v6565_v59  ;;  %4308 = vmatpush1.bf16.msra.mxu0 %v6567_v61  ;;  %v7370_v59 = vld [vmem:[%s8823_s8 + $0xb8] sm:$0xff]   ;;  %v7371_v61 = vld [vmem:[%s8823_s8 + $0x70] sm:$0xff]  }
 0xf16   : > { %4266 = vmatprep.subr.bf16.mxu1 %v6550_v63  ;;  %4309 = vmatprep.subr.bf16.mxu0 %v6552_v1  ;;  %v7372_v63 = vld [vmem:[%s8823_s8 + $0xf0] sm:$0xff]  }
 0xf17   : > { %4296 = vmatprep.mubr.bf16.mxu1 %v8204_v23  ;;  %4339 = vmatprep.mubr.bf16.mxu0 %v8204_v23  ;;  %v6519_v23 = vcombine.low %v3225_v15, %v3233_v16  ;;  %v7373_v1 = vld [vmem:[%s8823_s8 + $0x30] sm:$0xff]   ;;  %v7385_v15 = vld [vmem:[%s8823_s8 + $0x18] sm:$0xff]  }
 0xf18   : > { %v7386_v16 = vld [vmem:[%s8823_s8 + $0x98] sm:$0xff]  }
 0xf19   : > { %4267 = vmatpush1.bf16.msra.mxu1 %v6549_v9  ;;  %4310 = vmatpush1.bf16.msra.mxu0 %v6551_v10  ;;  %v7378_v9 = vld [vmem:[%s8823_s8 + $0xa8] sm:$0xff]   ;;  %v7380_v10 = vld [vmem:[%s8823_s8 + $0xe0] sm:$0xff]  }
 0xf1a   : > { %4268 = vmatprep.subr.bf16.mxu1 %v6534_v11  ;;  %4311 = vmatprep.subr.bf16.mxu0 %v6536_v12  ;;  %v7381_v11 = vld [vmem:[%s8823_s8 + $0x20] sm:$0xff]  }
 0xf1b   : > { %v7382_v12 = vld [vmem:[%s8823_s8 + $0xa0] sm:$0xff]  }
 0xf1d   : > { %4269 = vmatpush1.bf16.msra.mxu1 %v6533_v18  ;;  %4312 = vmatpush1.bf16.msra.mxu0 %v6535_v19  ;;  %v7387_v18 = vld [vmem:[%s8823_s8 + $0x50] sm:$0xff]  }
 0xf1e   : > { %4270 = vmatprep.subr.bf16.mxu1 %v6518_v4  ;;  %4313 = vmatprep.subr.bf16.mxu0 %v6520_v20  ;;  %v7388_v19 = vld [vmem:[%s8823_s8 + $0xd0] sm:$0xff]  }
 0xf1f   : > { %v7389_v4 = vld [vmem:[%s8823_s8 + $0x10] sm:$0xff]  }
 0xf20   : > { %v7390_v20 = vld [vmem:[%s8823_s8 + $0x90] sm:$0xff]  }
 0xf21   : > { %4271 = vmatpush1.bf16.msra.mxu1 %v6517_v27  ;;  %4314 = vmatpush1.bf16.msra.mxu0 %v6519_v23  ;;  %v7395_v27 = vld [vmem:[%s8823_s8 + $0x40] sm:$0xff]  }
 0xf22   : > { %4272 = vmatprep.subr.bf16.mxu1 %v6502_v28  ;;  %4315 = vmatprep.subr.bf16.mxu0 %v6504_v29  ;;  %v7396_v23 = vld [vmem:[%s8823_s8 + $0xc0] sm:$0xff]  }
 0xf23   : > { %v7397_v28 = vld [vmem:[%s8823_s8] sm:$0xff]  }
 0xf24   : > { %v7398_v29 = vld [vmem:[%s8823_s8 + $0x80] sm:$0xff]  }
 0xf25   : > { %4273 = vmatpush1.bf16.msra.mxu1 %v6501_v34  ;;  %4316 = vmatpush1.bf16.msra.mxu0 %v6503_v35 }
 0xf26   : > { %4274 = vmatprep.subr.bf16.mxu1 %v6486_v60  ;;  %4317 = vmatprep.subr.bf16.mxu0 %v6488_v0  ;;  %v3293_v60 = vrot.slane %v9291_v33, %v8905_v54  ;;  %v3301_v0 = vrot.slane %v9291_v33, %v3300_v32 }
 0xf29   : > { %4275 = vmatpush1.bf16.msra.mxu1 %v6485_v41  ;;  %4318 = vmatpush1.bf16.msra.mxu0 %v6487_v24 }
 0xf2a   : > { %4276 = vmatprep.subr.bf16.mxu1 %v6470_v42  ;;  %4319 = vmatprep.subr.bf16.mxu0 %v6472_v58 }
 0xf2d   : > { %4277 = vmatpush1.bf16.msra.mxu1 %v6469_v48  ;;  %4320 = vmatpush1.bf16.msra.mxu0 %v6471_v49 }
 0xf2e   : > { %4278 = vmatprep.subr.bf16.mxu1 %v6454_v50  ;;  %4321 = vmatprep.subr.bf16.mxu0 %v6456_v39 }
 0xf31   : > { %4279 = vmatpush1.bf16.msra.mxu1 %v6453_v53  ;;  %4322 = vmatpush1.bf16.msra.mxu0 %v6455_v37 }
 0xf32   : > { %6776 = vmatprep.subr.bf16.mxu1 %v7367_v55  ;;  %6798 = vmatprep.subr.bf16.mxu0 %v7368_v56 }
 0xf34   : > { %4297 = vmatmul.mubr.bf16.vlgmr.msra.gmra.mxu1 %v9151_v44  ;;  %4340 = vmatmul.mubr.bf16.vlgmr.msra.gmra.mxu0 %v9151_v44  ;;  %v7379_v44 = vld [vmem:[%s8823_s8 + $0x60] sm:$0xff]  }
 0xf35   : > { %6777 = vmatpush3.bf16.msra.mxu1 %v7369_v57  ;;  %6799 = vmatpush3.bf16.msra.mxu0 %v7370_v59 }
 0xf36   : > { %6778 = vmatprep.subr.bf16.mxu1 %v7371_v61  ;;  %6800 = vmatprep.subr.bf16.mxu0 %v7372_v63 }
 0xf39   : > { %6779 = vmatpush3.bf16.msra.mxu1 %v7373_v1  ;;  %6801 = vmatpush3.bf16.msra.mxu0 %v7374_v3 }
 0xf3a   : > { %6780 = vmatprep.subr.bf16.mxu1 %v7375_v5  ;;  %6802 = vmatprep.subr.bf16.mxu0 %v7376_v6  ;;  %v7401_v5 = vld [vmem:[%s8823_s8 + $0x138] sm:$0xff]  }
 0xf3b   : > { %v7402_v6 = vld [vmem:[%s8823_s8 + $0x1b8] sm:$0xff]  }
 0xf3d   : > { %6781 = vmatpush3.bf16.msra.mxu1 %v7377_v8  ;;  %6803 = vmatpush3.bf16.msra.mxu0 %v7378_v9 }
 0xf3e   : > { %6782 = vmatprep.subr.bf16.mxu1 %v7379_v44  ;;  %6804 = vmatprep.subr.bf16.mxu0 %v7380_v10  ;;  %v7403_v44 = vld [vmem:[%s8823_s8 + $0x170] sm:$0xff]  }
 0xf3f   : > { %v7404_v10 = vld [vmem:[%s8823_s8 + $0x1f0] sm:$0xff]  }
 0xf41   : > { %6783 = vmatpush3.bf16.msra.mxu1 %v7381_v11  ;;  %6805 = vmatpush3.bf16.msra.mxu0 %v7382_v12  ;;  %v7405_v11 = vld [vmem:[%s8823_s8 + $0x130] sm:$0xff]  }
 0xf42   : > { %6784 = vmatprep.subr.bf16.mxu1 %v7383_v7  ;;  %6806 = vmatprep.subr.bf16.mxu0 %v7384_v14  ;;  %v7406_v12 = vld [vmem:[%s8823_s8 + $0x1b0] sm:$0xff]   ;;  %v7407_v7 = vld [vmem:[%s8823_s8 + $0x168] sm:$0xff]  }
 0xf43   : > { %v7408_v14 = vld [vmem:[%s8823_s8 + $0x1e8] sm:$0xff]  }
 0xf45   : > { %6785 = vmatpush3.bf16.msra.mxu1 %v7385_v15  ;;  %6807 = vmatpush3.bf16.msra.mxu0 %v7386_v16  ;;  %v7409_v15 = vld [vmem:[%s8823_s8 + $0x128] sm:$0xff]  }
 0xf46   : > { %6786 = vmatprep.subr.bf16.mxu1 %v7387_v18  ;;  %6808 = vmatprep.subr.bf16.mxu0 %v7388_v19  ;;  %v7410_v16 = vld [vmem:[%s8823_s8 + $0x1a8] sm:$0xff]   ;;  %v7411_v18 = vld [vmem:[%s8823_s8 + $0x160] sm:$0xff]  }
 0xf47   : > { %v7412_v19 = vld [vmem:[%s8823_s8 + $0x1e0] sm:$0xff]  }
 0xf49   : > { %6787 = vmatpush3.bf16.msra.mxu1 %v7389_v4  ;;  %6809 = vmatpush3.bf16.msra.mxu0 %v7390_v20  ;;  %v7413_v4 = vld [vmem:[%s8823_s8 + $0x120] sm:$0xff]  }
 0xf4a   : > { %6788 = vmatprep.subr.bf16.mxu1 %v7391_v21  ;;  %6810 = vmatprep.subr.bf16.mxu0 %v7392_v22  ;;  %v7414_v20 = vld [vmem:[%s8823_s8 + $0x1a0] sm:$0xff]   ;;  %v7415_v21 = vld [vmem:[%s8823_s8 + $0x158] sm:$0xff]  }
 0xf4b   : > { %v7416_v22 = vld [vmem:[%s8823_s8 + $0x1d8] sm:$0xff]  }
 0xf4d   : > { %6789 = vmatpush3.bf16.msra.mxu1 %v7393_v25  ;;  %6811 = vmatpush3.bf16.msra.mxu0 %v7394_v26  ;;  %v7417_v25 = vld [vmem:[%s8823_s8 + $0x118] sm:$0xff]  }
 0xf4e   : > { %6790 = vmatprep.subr.bf16.mxu1 %v7395_v27  ;;  %6812 = vmatprep.subr.bf16.mxu0 %v7396_v23  ;;  %v7418_v26 = vld [vmem:[%s8823_s8 + $0x198] sm:$0xff]   ;;  %v7419_v27 = vld [vmem:[%s8823_s8 + $0x150] sm:$0xff]  }
 0xf4f   : > { %v7420_v23 = vld [vmem:[%s8823_s8 + $0x1d0] sm:$0xff]  }
 0xf51   : > { %6791 = vmatpush3.bf16.msra.mxu1 %v7397_v28  ;;  %6813 = vmatpush3.bf16.msra.mxu0 %v7398_v29  ;;  %v3308_v28 = vsub.s32 5, %v8898_v51  ;;  %v3316_v29 = vsub.s32 7, %v8898_v51 }
 0xf52   : > { %6820 = vmatprep.subr.bf16.mxu1 %v7399_v30  ;;  %6842 = vmatprep.subr.bf16.mxu0 %v7400_v31  ;;  %v3304_v30 = vsub.s32 4, %v8898_v51  ;;  %v3312_v31 = vsub.s32 6, %v8898_v51 }
 0xf94   : > { %v4040_v34 = vpop.f32.mrf.mxu1  ;;  %v4083_v35 = vpop.f32.mrf.mxu0 }
 0xf95   : > { %v4041_v46 = vadd.f32 %v4040_v34, %v3289_v36  ;;  %v4084_v47 = vadd.f32 %v4083_v35, %v3297_v2  ;;  %v7421_v34 = vld [vmem:[%s8823_s8 + $0x110] sm:$0xff]  }
 0xf96   : > { %v4042_v38 = vpop.f32.mrf.mxu1  ;;  %v4085_v40 = vpop.f32.mrf.mxu0  ;;  %v7422_v35 = vld [vmem:[%s8823_s8 + $0x190] sm:$0xff]  }
 0xf97   : > { %v4043_v42 = vadd.f32 %v4042_v38, %v3293_v60  ;;  %v4086_v58 = vadd.f32 %v4085_v40, %v3301_v0  ;;  %v4350_v61 = vmax.f32 %v4041_v46, 0.0  ;;  %v4352_v63 = vmax.f32 %v4084_v47, 0.0 }
 0xf98   : > { %v4044_v41 = vpop.f32.mrf.mxu1  ;;  %v4087_v24 = vpop.f32.mrf.mxu0  ;;  %v3309_v38 = vrot.slane %v9291_v33, %v3308_v28  ;;  %v3317_v40 = vrot.slane %v9291_v33, %v3316_v29 }
 0xf99   : > { %v4045_v45 = vadd.f32 %v4044_v41, %v3289_v36  ;;  %v4088_v17 = vadd.f32 %v4087_v24, %v3297_v2  ;;  %v4351_v55 = vmax.f32 %v4043_v42, 0.0  ;;  %v4353_v56 = vmax.f32 %v4086_v58, 0.0  ;;  %v7423_v36 = vld [vmem:[%s8823_s8 + $0x148] sm:$0xff]  }
 0xf9a   : > { %v4046_v48 = vpop.f32.mrf.mxu1  ;;  %v4089_v49 = vpop.f32.mrf.mxu0  ;;  %v7424_v2 = vld [vmem:[%s8823_s8 + $0x1c8] sm:$0xff]   ;;  %v3305_v41 = vrot.slane %v9291_v33, %v3304_v30  ;;  %v3313_v24 = vrot.slane %v9291_v33, %v3312_v31 }
 0xf9b   : > { %v4047_v50 = vadd.f32 %v4046_v48, %v3293_v60  ;;  %v4090_v39 = vadd.f32 %v4089_v49, %v3301_v0  ;;  %v4366_v53 = vmax.f32 %v4045_v45, 0.0  ;;  %v4368_v37 = vmax.f32 %v4088_v17, 0.0  ;;  %v7425_v45 = vld [vmem:[%s8823_s8 + $0x108] sm:$0xff]   ;;  %v7427_v48 = vld [vmem:[%s8823_s8 + $0x140] sm:$0xff]  }
 0xf9c   : > { %v7426_v17 = vld [vmem:[%s8823_s8 + $0x188] sm:$0xff]   ;;  %v7428_v49 = vld [vmem:[%s8823_s8 + $0x1c0] sm:$0xff]  }
 0xf9d   : > { %v4367_v57 = vmax.f32 %v4047_v50, 0.0  ;;  %v4369_v59 = vmax.f32 %v4090_v39, 0.0  ;;  %v4382_v8 = vpack.c.bf16 %v4366_v53, %v4350_v61  ;;  %v4384_v9 = vpack.c.bf16 %v4368_v37, %v4352_v63  ;;  %v7429_v63 = vld [vmem:[%s8823_s8 + $0x100] sm:$0xff]  }
 0xf9f   : > { %v4383_v1 = vpack.c.bf16 %v4367_v57, %v4351_v55  ;;  %v4385_v3 = vpack.c.bf16 %v4369_v59, %v4353_v56 }
 0xfa1   : > { %5461 = vmatprep.mubr.bf16.mxu1 %v4383_v1  ;;  %5502 = vmatprep.mubr.bf16.mxu0 %v4385_v3  ;;  %v7430_v1 = vld [vmem:[%s8823_s8 + $0x180] sm:$0xff]  }
 0xfa2   : > { %5462 = vmatmul.mubr.bf16.vlgmr.msra.gmra.mxu1 %v4382_v8  ;;  %5503 = vmatmul.mubr.bf16.vlgmr.msra.gmra.mxu0 %v4384_v9  ;;  %v7432_v8 = vld [vmem:[%s8823_s8 + $0x2f8] sm:$0xff]  }
 0xfa3   : > { %6821 = vmatpush3.bf16.msra.mxu1 %v7401_v5  ;;  %6843 = vmatpush3.bf16.msra.mxu0 %v7402_v6  ;;  %v7431_v6 = vld [vmem:[%s8823_s8 + $0x278] sm:$0xff]  }
 0xfa4   : > { %6822 = vmatprep.subr.bf16.mxu1 %v7403_v44  ;;  %6844 = vmatprep.subr.bf16.mxu0 %v7404_v10 }
 0xfa7   : > { %6823 = vmatpush3.bf16.msra.mxu1 %v7405_v11  ;;  %6845 = vmatpush3.bf16.msra.mxu0 %v7406_v12 }
 0xfa8   : > { %6824 = vmatprep.subr.bf16.mxu1 %v7407_v7  ;;  %6846 = vmatprep.subr.bf16.mxu0 %v7408_v14 }
 0xfab   : > { %6825 = vmatpush3.bf16.msra.mxu1 %v7409_v15  ;;  %6847 = vmatpush3.bf16.msra.mxu0 %v7410_v16  ;;  %v7433_v16 = vld [vmem:[%s8823_s8 + $0x238] sm:$0xff]  }
 0xfac   : > { %6826 = vmatprep.subr.bf16.mxu1 %v7411_v18  ;;  %6848 = vmatprep.subr.bf16.mxu0 %v7412_v19  ;;  %v7434_v18 = vld [vmem:[%s8823_s8 + $0x2b8] sm:$0xff]  }
 0xfaf   : > { %6827 = vmatpush3.bf16.msra.mxu1 %v7413_v4  ;;  %6849 = vmatpush3.bf16.msra.mxu0 %v7414_v20  ;;  %v7435_v20 = vld [vmem:[%s8823_s8 + $0x270] sm:$0xff]  }
 0xfb0   : > { %6828 = vmatprep.subr.bf16.mxu1 %v7415_v21  ;;  %6850 = vmatprep.subr.bf16.mxu0 %v7416_v22  ;;  %v7436_v21 = vld [vmem:[%s8823_s8 + $0x2f0] sm:$0xff]  }
 0xfb1   : > { %v7437_v22 = vld [vmem:[%s8823_s8 + $0x230] sm:$0xff]  }
 0xfb3   : > { %6829 = vmatpush3.bf16.msra.mxu1 %v7417_v25  ;;  %6851 = vmatpush3.bf16.msra.mxu0 %v7418_v26  ;;  %v7438_v25 = vld [vmem:[%s8823_s8 + $0x2b0] sm:$0xff]   ;;  %v7439_v26 = vld [vmem:[%s8823_s8 + $0x268] sm:$0xff]  }
 0xfb4   : > { %v4126_v60 = vpop.f32.mrf.mxu1  ;;  %v4169_v0 = vpop.f32.mrf.mxu0  ;;  %6830 = vmatprep.subr.bf16.mxu1 %v7419_v27  ;;  %6852 = vmatprep.subr.bf16.mxu0 %v7420_v23  ;;  %v7440_v27 = vld [vmem:[%s8823_s8 + $0x2e8] sm:$0xff]  }
 0xfb5   : > { %v4127_v33 = vadd.f32 %v4126_v60, %v3305_v41  ;;  %v4170_v55 = vadd.f32 %v4169_v0, %v3313_v24  ;;  %v7441_v23 = vld [vmem:[%s8823_s8 + $0x228] sm:$0xff]   ;;  %v7444_v60 = vld [vmem:[%s8823_s8 + $0x2e0] sm:$0xff]  }
 0xfb6   : > { %v4128_v42 = vpop.f32.mrf.mxu1  ;;  %v4171_v58 = vpop.f32.mrf.mxu0  ;;  %v7445_v0 = vld [vmem:[%s8823_s8 + $0x220] sm:$0xff]  }
 0xfb7   : > { %6831 = vmatpush3.bf16.msra.mxu1 %v7421_v34  ;;  %6853 = vmatpush3.bf16.msra.mxu0 %v7422_v35  ;;  %v4129_v50 = vadd.f32 %v4128_v42, %v3309_v38  ;;  %v4172_v39 = vadd.f32 %v4171_v58, %v3317_v40  ;;  %v4354_v12 = vmax.f32 %v4127_v33, 0.0  ;;  %v4356_v7 = vmax.f32 %v4170_v55, 0.0  ;;  %v7442_v34 = vld [vmem:[%s8823_s8 + $0x2a8] sm:$0xff]   ;;  %v7443_v35 = vld [vmem:[%s8823_s8 + $0x260] sm:$0xff]   ;;  %v7452_v42 = vld [vmem:[%s8823_s8 + $0x2d0] sm:$0xff]  }
 0xfb8   : > { %v4130_v46 = vpop.f32.mrf.mxu1  ;;  %v4173_v47 = vpop.f32.mrf.mxu0  ;;  %6832 = vmatprep.subr.bf16.mxu1 %v7423_v36  ;;  %6854 = vmatprep.subr.bf16.mxu0 %v7424_v2  ;;  %v7446_v36 = vld [vmem:[%s8823_s8 + $0x2a0] sm:$0xff]   ;;  %v7447_v2 = vld [vmem:[%s8823_s8 + $0x258] sm:$0xff]  }
 0xfb9   : > { %v4131_v53 = vadd.f32 %v4130_v46, %v3305_v41  ;;  %v4174_v37 = vadd.f32 %v4173_v47, %v3313_v24  ;;  %v4355_v9 = vmax.f32 %v4129_v50, 0.0  ;;  %v4357_v44 = vmax.f32 %v4172_v39, 0.0  ;;  %v7450_v41 = vld [vmem:[%s8823_s8 + $0x298] sm:$0xff]   ;;  %v7451_v24 = vld [vmem:[%s8823_s8 + $0x250] sm:$0xff]  }
 0xfba   : > { %v4132_v56 = vpop.f32.mrf.mxu1  ;;  %v4175_v57 = vpop.f32.mrf.mxu0  ;;  %v9371_v58 = vld [vmem:[%s8821_s26 + $0x8] sm:$0xff] }
 0xfbb   : > { %v4133_v59 = vadd.f32 %v4132_v56, %v3309_v38  ;;  %v4176_v61 = vadd.f32 %v4175_v57, %v3317_v40  ;;  %6833 = vmatpush3.bf16.msra.mxu1 %v7425_v45  ;;  %6855 = vmatpush3.bf16.msra.mxu0 %v7426_v17  ;;  %v4370_v3 = vmax.f32 %v4131_v53, 0.0  ;;  %v4372_v5 = vmax.f32 %v4174_v37, 0.0  ;;  %v7448_v38 = vld [vmem:[%s8823_s8 + $0x2d8] sm:$0xff]   ;;  %v7453_v45 = vld [vmem:[%s8823_s8 + $0x210] sm:$0xff]   ;;  %v7457_v56 = vld [vmem:[%s8823_s8 + $0x208] sm:$0xff]  }
 0xfbc   : > { %6834 = vmatprep.subr.bf16.mxu1 %v7427_v48  ;;  %6856 = vmatprep.subr.bf16.mxu0 %v7428_v49  ;;  %v7449_v40 = vld [vmem:[%s8823_s8 + $0x218] sm:$0xff]   ;;  %v7454_v17 = vld [vmem:[%s8823_s8 + $0x290] sm:$0xff]   ;;  %v7455_v48 = vld [vmem:[%s8823_s8 + $0x248] sm:$0xff]   ;;  %v3325_v50 = vrot.slane %v9371_v58, %v8905_v54  ;;  %v3333_v39 = vrot.slane %v9371_v58, %v3300_v32  ;;  %v3321_v53 = vrot.slane %v9371_v58, %v8901_v52 }
 0xfbd   : > { %v4371_v10 = vmax.f32 %v4133_v59, 0.0  ;;  %v4373_v11 = vmax.f32 %v4176_v61, 0.0  ;;  %v4386_v19 = vpack.c.bf16 %v4370_v3, %v4354_v12  ;;  %v4388_v4 = vpack.c.bf16 %v4372_v5, %v4356_v7  ;;  %v7456_v49 = vld [vmem:[%s8823_s8 + $0x2c8] sm:$0xff]   ;;  %v7459_v54 = vld [vmem:[%s8823_s8 + $0x240] sm:$0xff]  }
 0xfbe   : > { %v3329_v37 = vrot.slane %v9371_v58, %v8916_v62  ;;  %v7458_v57 = vld [vmem:[%s8823_s8 + $0x288] sm:$0xff]   ;;  %v7460_v32 = vld [vmem:[%s8823_s8 + $0x2c0] sm:$0xff]  }
 0xfbf   : > { %v4387_v14 = vpack.c.bf16 %v4371_v10, %v4355_v9  ;;  %v4389_v15 = vpack.c.bf16 %v4373_v11, %v4357_v44  ;;  %6835 = vmatpush3.bf16.msra.mxu1 %v7429_v63  ;;  %6857 = vmatpush3.bf16.msra.mxu0 %v7430_v1  ;;  %v7461_v10 = vld [vmem:[%s8823_s8 + $0x200] sm:$0xff]  }
 0xfc0   : > { %6864 = vmatprep.subr.bf16.mxu1 %v7431_v6  ;;  %6886 = vmatprep.subr.bf16.mxu0 %v7432_v8  ;;  %v7462_v11 = vld [vmem:[%s8823_s8 + $0x280] sm:$0xff]  }
 0xfc1   : > { %5543 = vmatprep.mubr.bf16.mxu1 %v4387_v14  ;;  %5584 = vmatprep.mubr.bf16.mxu0 %v4389_v15  ;;  %v7463_v14 = vld [vmem:[%s8823_s8 + $0x378] sm:$0xff]  }
 0xfc2   : > { %5544 = vmatmul.mubr.bf16.vlgmr.msra.gmra.mxu1 %v4386_v19  ;;  %5585 = vmatmul.mubr.bf16.vlgmr.msra.gmra.mxu0 %v4388_v4  ;;  %v7464_v15 = vld [vmem:[%s8823_s8 + $0x3f8] sm:$0xff]  }
 0xfc3   : > { %6865 = vmatpush3.bf16.msra.mxu1 %v7433_v16  ;;  %6887 = vmatpush3.bf16.msra.mxu0 %v7434_v18 }
 0xfc4   : > { %6866 = vmatprep.subr.bf16.mxu1 %v7435_v20  ;;  %6888 = vmatprep.subr.bf16.mxu0 %v7436_v21 }
 0xfc7   : > { %6867 = vmatpush3.bf16.msra.mxu1 %v7437_v22  ;;  %6889 = vmatpush3.bf16.msra.mxu0 %v7438_v25 }
 0xfc8   : > { %6868 = vmatprep.subr.bf16.mxu1 %v7439_v26  ;;  %6890 = vmatprep.subr.bf16.mxu0 %v7440_v27  ;;  %v7465_v26 = vld [vmem:[%s8823_s8 + $0x338] sm:$0xff]  }
 0xfc9   : > { %v7466_v27 = vld [vmem:[%s8823_s8 + $0x3b8] sm:$0xff]  }
 0xfcb   : > { %6869 = vmatpush3.bf16.msra.mxu1 %v7441_v23  ;;  %6891 = vmatpush3.bf16.msra.mxu0 %v7442_v34 }
 0xfcc   : > { %6870 = vmatprep.subr.bf16.mxu1 %v7443_v35  ;;  %6892 = vmatprep.subr.bf16.mxu0 %v7444_v60  ;;  %v7467_v35 = vld [vmem:[%s8823_s8 + $0x370] sm:$0xff]  }
 0xfcd   : > { %v7468_v60 = vld [vmem:[%s8823_s8 + $0x3f0] sm:$0xff]  }
 0xfcf   : > { %6871 = vmatpush3.bf16.msra.mxu1 %v7445_v0  ;;  %6893 = vmatpush3.bf16.msra.mxu0 %v7446_v36  ;;  %v7469_v0 = vld [vmem:[%s8823_s8 + $0x330] sm:$0xff]  }
 0xfd0   : > { %6872 = vmatprep.subr.bf16.mxu1 %v7447_v2  ;;  %6894 = vmatprep.subr.bf16.mxu0 %v7448_v38  ;;  %v7470_v36 = vld [vmem:[%s8823_s8 + $0x3b0] sm:$0xff]   ;;  %v7471_v2 = vld [vmem:[%s8823_s8 + $0x368] sm:$0xff]  }
 0xfd1   : > { %v7472_v38 = vld [vmem:[%s8823_s8 + $0x3e8] sm:$0xff]  }
 0xfd3   : > { %6873 = vmatpush3.bf16.msra.mxu1 %v7449_v40  ;;  %6895 = vmatpush3.bf16.msra.mxu0 %v7450_v41  ;;  %v7473_v40 = vld [vmem:[%s8823_s8 + $0x328] sm:$0xff]  }
 0xfd4   : > { %v4212_v46 = vpop.f32.mrf.mxu1  ;;  %v4255_v47 = vpop.f32.mrf.mxu0  ;;  %6874 = vmatprep.subr.bf16.mxu1 %v7451_v24  ;;  %6896 = vmatprep.subr.bf16.mxu0 %v7452_v42  ;;  %v7474_v41 = vld [vmem:[%s8823_s8 + $0x3a8] sm:$0xff]   ;;  %v7475_v24 = vld [vmem:[%s8823_s8 + $0x360] sm:$0xff]  }
 0xfd5   : > { %v4213_v62 = vadd.f32 %v4212_v46, %v3321_v53  ;;  %v4256_v5 = vadd.f32 %v4255_v47, %v3329_v37  ;;  %v7476_v42 = vld [vmem:[%s8823_s8 + $0x3e0] sm:$0xff]   ;;  %v7479_v46 = vld [vmem:[%s8823_s8 + $0x358] sm:$0xff]  }
 0xfd6   : > { %v4214_v33 = vpop.f32.mrf.mxu1  ;;  %v4257_v55 = vpop.f32.mrf.mxu0  ;;  %v7480_v47 = vld [vmem:[%s8823_s8 + $0x3d8] sm:$0xff]  }
 0xfd7   : > { %6875 = vmatpush3.bf16.msra.mxu1 %v7453_v45  ;;  %6897 = vmatpush3.bf16.msra.mxu0 %v7454_v17  ;;  %v4215_v63 = vadd.f32 %v4214_v33, %v3325_v50  ;;  %v4258_v1 = vadd.f32 %v4257_v55, %v3333_v39  ;;  %v4358_v20 = vmax.f32 %v4213_v62, 0.0  ;;  %v4360_v21 = vmax.f32 %v4256_v5, 0.0  ;;  %v7477_v45 = vld [vmem:[%s8823_s8 + $0x320] sm:$0xff]  }
 0xfd8   : > { %v4216_v59 = vpop.f32.mrf.mxu1  ;;  %v4259_v61 = vpop.f32.mrf.mxu0  ;;  %6876 = vmatprep.subr.bf16.mxu1 %v7455_v48  ;;  %6898 = vmatprep.subr.bf16.mxu0 %v7456_v49  ;;  %v7478_v17 = vld [vmem:[%s8823_s8 + $0x3a0] sm:$0xff]   ;;  %v7481_v48 = vld [vmem:[%s8823_s8 + $0x318] sm:$0xff]  }
 0xfd9   : > { %v4217_v52 = vadd.f32 %v4216_v59, %v3321_v53  ;;  %v4260_v3 = vadd.f32 %v4259_v61, %v3329_v37  ;;  %v4359_v16 = vmax.f32 %v4215_v63, 0.0  ;;  %v4361_v18 = vmax.f32 %v4258_v1, 0.0  ;;  %v7482_v49 = vld [vmem:[%s8823_s8 + $0x398] sm:$0xff]   ;;  %v7485_v53 = vld [vmem:[%s8823_s8 + $0x310] sm:$0xff]   ;;  %v7492_v5 = vld [vmem:[%s8823_s8 + $0x3c0] sm:$0xff]  }
 0xfda   : > { %v4218_v6 = vpop.f32.mrf.mxu1  ;;  %v4261_v8 = vpop.f32.mrf.mxu0  ;;  %v7486_v37 = vld [vmem:[%s8823_s8 + $0x390] sm:$0xff]   ;;  %v3341_v59 = vrot.slane %v9371_v58, %v3308_v28  ;;  %v3349_v61 = vrot.slane %v9371_v58, %v3316_v29  ;;  %v7491_v29 = vld [vmem:[%s8823_s8 + $0x340] sm:$0xff]  }
 0xfdb   : > { %v4219_v9 = vadd.f32 %v4218_v6, %v3325_v50  ;;  %v4262_v44 = vadd.f32 %v4261_v8, %v3333_v39  ;;  %6877 = vmatpush3.bf16.msra.mxu1 %v7457_v56  ;;  %6899 = vmatpush3.bf16.msra.mxu0 %v7458_v57  ;;  %v4374_v12 = vmax.f32 %v4217_v52, 0.0  ;;  %v4376_v7 = vmax.f32 %v4260_v3, 0.0  ;;  %v7483_v50 = vld [vmem:[%s8823_s8 + $0x350] sm:$0xff]   ;;  %v7487_v56 = vld [vmem:[%s8823_s8 + $0x348] sm:$0xff]  }
 0xfdc   : > { %6878 = vmatprep.subr.bf16.mxu1 %v7459_v54  ;;  %6900 = vmatprep.subr.bf16.mxu0 %v7460_v32  ;;  %v7484_v39 = vld [vmem:[%s8823_s8 + $0x3d0] sm:$0xff]   ;;  %v7488_v57 = vld [vmem:[%s8823_s8 + $0x3c8] sm:$0xff]   ;;  %v3337_v54 = vrot.slane %v9371_v58, %v3304_v30  ;;  %v3345_v32 = vrot.slane %v9371_v58, %v3312_v31 }
 0xfdd   : > { %v4375_v19 = vmax.f32 %v4219_v9, 0.0  ;;  %v4377_v4 = vmax.f32 %v4262_v44, 0.0  ;;  %v4390_v23 = vpack.c.bf16 %v4374_v12, %v4358_v20  ;;  %v4392_v34 = vpack.c.bf16 %v4376_v7, %v4360_v21  ;;  %v7489_v52 = vld [vmem:[%s8823_s8 + $0x308] sm:$0xff]   ;;  %v7493_v12 = vld [vmem:[%s8823_s8 + $0x300] sm:$0xff]  }
 0xfde   : > { %v7490_v3 = vld [vmem:[%s8823_s8 + $0x388] sm:$0xff]   ;;  %v7494_v7 = vld [vmem:[%s8823_s8 + $0x380] sm:$0xff]  }
 0xfdf   : > { %v4391_v22 = vpack.c.bf16 %v4375_v19, %v4359_v16  ;;  %v4393_v25 = vpack.c.bf16 %v4377_v4, %v4361_v18  ;;  %6879 = vmatpush3.bf16.msra.mxu1 %v7461_v10  ;;  %6901 = vmatpush3.bf16.msra.mxu0 %v7462_v11 }
 0xfe0   : > { %6908 = vmatprep.subr.bf16.mxu1 %v7463_v14  ;;  %6930 = vmatprep.subr.bf16.mxu0 %v7464_v15 }
 0xfe1   : > { %5625 = vmatprep.mubr.bf16.mxu1 %v4391_v22  ;;  %5666 = vmatprep.mubr.bf16.mxu0 %v4393_v25 }
 0xfe2   : > { %5626 = vmatmul.mubr.bf16.vlgmr.msra.gmra.mxu1 %v4390_v23  ;;  %5667 = vmatmul.mubr.bf16.vlgmr.msra.gmra.mxu0 %v4392_v34 }
 0xfe3   : > { %6909 = vmatpush3.bf16.msra.mxu1 %v7465_v26  ;;  %6931 = vmatpush3.bf16.msra.mxu0 %v7466_v27 }
 0xfe4   : > { %6910 = vmatprep.subr.bf16.mxu1 %v7467_v35  ;;  %6932 = vmatprep.subr.bf16.mxu0 %v7468_v60 }
 0xfe7   : > { %6911 = vmatpush3.bf16.msra.mxu1 %v7469_v0  ;;  %6933 = vmatpush3.bf16.msra.mxu0 %v7470_v36 }
 0xfe8   : > { %6912 = vmatprep.subr.bf16.mxu1 %v7471_v2  ;;  %6934 = vmatprep.subr.bf16.mxu0 %v7472_v38 }
 0xfeb   : > { %6913 = vmatpush3.bf16.msra.mxu1 %v7473_v40  ;;  %6935 = vmatpush3.bf16.msra.mxu0 %v7474_v41 }
 0xfec   : > { %6914 = vmatprep.subr.bf16.mxu1 %v7475_v24  ;;  %6936 = vmatprep.subr.bf16.mxu0 %v7476_v42 }
 0xfef   : > { %6915 = vmatpush3.bf16.msra.mxu1 %v7477_v45  ;;  %6937 = vmatpush3.bf16.msra.mxu0 %v7478_v17 }
 0xff0   : > { %6916 = vmatprep.subr.bf16.mxu1 %v7479_v46  ;;  %6938 = vmatprep.subr.bf16.mxu0 %v7480_v47 }
 0xff3   : > { %6917 = vmatpush3.bf16.msra.mxu1 %v7481_v48  ;;  %6939 = vmatpush3.bf16.msra.mxu0 %v7482_v49  ;;  %v6569_v48 = vld [vmem:[%s1044_s25] ss:$0 sm:$0xff] }
 0xff4   : > { %v4298_v33 = vpop.f32.mrf.mxu1  ;;  %v4341_v55 = vpop.f32.mrf.mxu0  ;;  %6918 = vmatprep.subr.bf16.mxu1 %v7483_v50  ;;  %6940 = vmatprep.subr.bf16.mxu0 %v7484_v39 }
 0xff5   : > { %v4299_v9 = vadd.f32 %v4298_v33, %v3337_v54  ;;  %v4342_v31 = vadd.f32 %v4341_v55, %v3345_v32 }
 0xff6   : > { %v4300_v63 = vpop.f32.mrf.mxu1  ;;  %v4343_v1 = vpop.f32.mrf.mxu0 }
 0xff7   : > { %6919 = vmatpush3.bf16.msra.mxu1 %v7485_v53  ;;  %6941 = vmatpush3.bf16.msra.mxu0 %v7486_v37  ;;  %v4301_v6 = vadd.f32 %v4300_v63, %v3341_v59  ;;  %v4344_v30 = vadd.f32 %v4343_v1, %v3349_v61  ;;  %v4362_v20 = vmax.f32 %v4299_v9, 0.0  ;;  %v4364_v21 = vmax.f32 %v4342_v31, 0.0 }
 0xff8   : > { %v4302_v62 = vpop.f32.mrf.mxu1  ;;  %v4345_v28 = vpop.f32.mrf.mxu0  ;;  %6920 = vmatprep.subr.bf16.mxu1 %v7487_v56  ;;  %6942 = vmatprep.subr.bf16.mxu0 %v7488_v57 }
 0xff9   : > { %v4303_v8 = vadd.f32 %v4302_v62, %v3337_v54  ;;  %v4346_v51 = vadd.f32 %v4345_v28, %v3345_v32  ;;  %v4363_v16 = vmax.f32 %v4301_v6, 0.0  ;;  %v4365_v18 = vmax.f32 %v4344_v30, 0.0 }
 0xffa   : > { %v4304_v58 = vpop.f32.mrf.mxu1  ;;  %v4347_v44 = vpop.f32.mrf.mxu0 }
 0xffb   : > { %v4305_v10 = vadd.f32 %v4304_v58, %v3341_v59  ;;  %v4348_v11 = vadd.f32 %v4347_v44, %v3349_v61  ;;  %6921 = vmatpush3.bf16.msra.mxu1 %v7489_v52  ;;  %6943 = vmatpush3.bf16.msra.mxu0 %v7490_v3  ;;  %v4378_v14 = vmax.f32 %v4303_v8, 0.0  ;;  %v4380_v15 = vmax.f32 %v4346_v51, 0.0 }
 0xffc   : > { %6922 = vmatprep.subr.bf16.mxu1 %v7491_v29  ;;  %6944 = vmatprep.subr.bf16.mxu0 %v7492_v5 }
 0xffd   : > { %v4379_v19 = vmax.f32 %v4305_v10, 0.0  ;;  %v4381_v4 = vmax.f32 %v4348_v11, 0.0  ;;  %v4394_v26 = vpack.c.bf16 %v4378_v14, %v4362_v20  ;;  %v4396_v27 = vpack.c.bf16 %v4380_v15, %v4364_v21 }
 0xfff   : > { %v4395_v22 = vpack.c.bf16 %v4379_v19, %v4363_v16  ;;  %v4397_v25 = vpack.c.bf16 %v4381_v4, %v4365_v18  ;;  %6923 = vmatpush3.bf16.msra.mxu1 %v7493_v12  ;;  %6945 = vmatpush3.bf16.msra.mxu0 %v7494_v7 }
0x1001   : > { %5707 = vmatprep.mubr.bf16.mxu1 %v4395_v22  ;;  %5748 = vmatprep.mubr.bf16.mxu0 %v4397_v25 }
0x1002   : > { %5708 = vmatmul.mubr.bf16.vlgmr.msra.gmra.mxu1 %v4394_v26  ;;  %5749 = vmatmul.mubr.bf16.vlgmr.msra.gmra.mxu0 %v4396_v27 }
0x1062   : > { %v6792_v23 = vpop.f32.mrf.mxu1  ;;  %v6814_v34 = vpop.f32.mrf.mxu0 }
0x1064   : > { %v6793_v35 = vpop.f32.mrf.mxu1  ;;  %v6815_v60 = vpop.f32.mrf.mxu0 }
0x1065   : > { %v6794_v47 = vadd.f32 %v6793_v35, %v6792_v23  ;;  %v6816_v55 = vadd.f32 %v6815_v60, %v6814_v34 }
0x1066   : > { %v6795_v0 = vpop.f32.mrf.mxu1  ;;  %v6817_v36 = vpop.f32.mrf.mxu0 }
0x1067   : > { %v5464_v53 = vadd.f32 %v6794_v47, %v6569_v48 }
0x1068   : > { %v6796_v2 = vpop.f32.mrf.mxu1  ;;  %v6818_v38 = vpop.f32.mrf.mxu0 }
0x1069   : > { %v6797_v37 = vadd.f32 %v6796_v2, %v6795_v0  ;;  %v5505_v59 = vadd.f32 %v6816_v55, %v5464_v53  ;;  %v6819_v32 = vadd.f32 %v6818_v38, %v6817_v36  ;;  %v6699_v53 = vld [vmem:[%s9607_s22] ss:$0 sm:$0xff] }
0x106b   : > { %v5467_v61 = vadd.f32 %v6797_v37, %v6569_v48 }
0x106d   : > { %v5508_v3 = vadd.f32 %v6819_v32, %v5467_v61 }
0x1082   : > { %v6836_v40 = vpop.f32.mrf.mxu1  ;;  %v6858_v41 = vpop.f32.mrf.mxu0 }
0x1084   : > { %v6837_v24 = vpop.f32.mrf.mxu1  ;;  %v6859_v42 = vpop.f32.mrf.mxu0 }
0x1085   : > { %v6838_v56 = vadd.f32 %v6837_v24, %v6836_v40  ;;  %v6860_v62 = vadd.f32 %v6859_v42, %v6858_v41 }
0x1086   : > { %v6839_v45 = vpop.f32.mrf.mxu1  ;;  %v6861_v17 = vpop.f32.mrf.mxu0 }
0x1087   : > { %v5546_v63 = vadd.f32 %v6838_v56, %v5505_v59 }
0x1088   : > { %v6840_v46 = vpop.f32.mrf.mxu1  ;;  %v6862_v49 = vpop.f32.mrf.mxu0 }
0x1089   : > { %v6841_v1 = vadd.f32 %v6840_v46, %v6839_v45  ;;  %v5587_v5 = vadd.f32 %v6860_v62, %v5546_v63  ;;  %v6863_v8 = vadd.f32 %v6862_v49, %v6861_v17 }
0x108b   : > { %v5549_v6 = vadd.f32 %v6841_v1, %v5508_v3 }
0x108d   : > { %v5590_v44 = vadd.f32 %v6863_v8, %v5549_v6 }
0x10a2   : > { %v6880_v50 = vpop.f32.mrf.mxu1  ;;  %v6902_v39 = vpop.f32.mrf.mxu0 }
0x10a4   : > { %v6881_v33 = vpop.f32.mrf.mxu1  ;;  %v6903_v57 = vpop.f32.mrf.mxu0 }
0x10a5   : > { %v6882_v28 = vadd.f32 %v6881_v33, %v6880_v50  ;;  %v6904_v10 = vadd.f32 %v6903_v57, %v6902_v39  ;;  %v6698_v50 = vld [vmem:[%s9606_s20] ss:$0 sm:$0xff] }
0x10a6   : > { %v6883_v54 = vpop.f32.mrf.mxu1  ;;  %v6905_v52 = vpop.f32.mrf.mxu0 }
0x10a7   : > { %v5628_v51 = vadd.f32 %v6882_v28, %v5587_v5 }
0x10a8   : > { %v6884_v29 = vpop.f32.mrf.mxu1  ;;  %v6906_v30 = vpop.f32.mrf.mxu0 }
0x10a9   : > { %v6885_v9 = vadd.f32 %v6884_v29, %v6883_v54  ;;  %v5669_v7 = vadd.f32 %v6904_v10, %v5628_v51  ;;  %v6907_v19 = vadd.f32 %v6906_v30, %v6905_v52 }
0x10ab   : > { %v5631_v14 = vadd.f32 %v6885_v9, %v5590_v44 }
0x10ad   : > { %v5672_v25 = vadd.f32 %v6907_v19, %v5631_v14 }
0x10c2   : > { %v6924_v31 = vpop.f32.mrf.mxu1  ;;  %v6946_v58 = vpop.f32.mrf.mxu0 }
0x10c4   : > { %v6925_v11 = vpop.f32.mrf.mxu1  ;;  %v6947_v12 = vpop.f32.mrf.mxu0 }
0x10c5   : > { %v6926_v15 = vadd.f32 %v6925_v11, %v6924_v31  ;;  %v6948_v20 = vadd.f32 %v6947_v12, %v6946_v58 }
0x10c6   : > { %v6927_v16 = vpop.f32.mrf.mxu1  ;;  %v6949_v18 = vpop.f32.mrf.mxu0 }
0x10c7   : > { %v5710_v4 = vadd.f32 %v6926_v15, %v5669_v7 }
0x10c8   : > { %v6928_v21 = vpop.f32.mrf.mxu1  ;;  %v6950_v22 = vpop.f32.mrf.mxu0 }
0x10c9   : > { %v5751_v26 = vadd.f32 %v6948_v20, %v5710_v4  ;;  %v6929_v27 = vadd.f32 %v6928_v21, %v6927_v16  ;;  %v6951_v34 = vadd.f32 %v6950_v22, %v6949_v18 }
0x10cb   : > { %v5713_v23 = vadd.f32 %v6929_v27, %v5672_v25  ;;  %v5757_v35 = vadd.f32 %v5751_v26, %v9145_v43 }
0x10cd   : > { %v5754_v60 = vadd.f32 %v6951_v34, %v5713_v23  ;;  %5761 = vadd.xlane.f32.xlu1 %v5757_v35 }
0x10cf   : > { %v5758_v0 = vadd.f32 %v5754_v60, %v9147_v13 }
0x10d1   : > { %5763 = vadd.xlane.f32.xlu0 %v5758_v0 }
0x1156   : > { %v5762_v36 = vpop.xlane.xlu1 %5761 }
0x1157   : > { %v5765_v2 = vmul.f32 0.0078125, %v5762_v36 }
0x1159   : > { %v5767_v38 = vsub.f32 %v5757_v35, %v5765_v2 }
0x115a   : > { %v5764_v40 = vpop.xlane.xlu0 %5763 }
0x115b   : > { %v5766_v41 = vmul.f32 0.0078125, %v5764_v40  ;;  %v5769_v24 = vmul.f32 %v5767_v38, %v5767_v38 }
0x115d   : > { %v5768_v42 = vsub.f32 %v5758_v0, %v5766_v41  ;;  %5771 = vadd.xlane.f32.xlu1 %v5769_v24 }
0x115f   : > { %v5770_v45 = vmul.f32 %v5768_v42, %v5768_v42 }
0x1161   : > { %5773 = vadd.xlane.f32.xlu0 %v5770_v45 }
0x11e6   : > { %v5772_v17 = vpop.xlane.xlu1 %5771 }
0x11e7   : > { %v5775_v46 = vmul.f32 0.0078125, %v5772_v17 }
0x11e9   : > { %v5777_v43 = vadd.f32 1e-05, %v5775_v46 }
0x11ea   : > { %v5774_v47 = vpop.xlane.xlu0 %5773 }
0x11eb   : > { %7531 = vrsqrt.f32 %v5777_v43  ;;  %v5776_v48 = vmul.f32 0.0078125, %v5774_v47 }
0x11ed   : > { %v5778_v13 = vadd.f32 1e-05, %v5776_v48 }
0x11ef   : > { %7533 = vrsqrt.f32 %v5778_v13 }
0x11f8   : > { %v7532_v49 = vpop.eup %7531 }
0x11f9   : > { %v5781_v39 = vmul.f32 %v7532_v49, %v5767_v38 }
0x11fb   : > { %v5789_v37 = vmul.f32 %v6698_v50, %v5781_v39 }
0x11fc   : > { %v7534_v33 = vpop.eup %7533 }
0x11fd   : > { %v5797_v55 = vadd.f32 %v6699_v53, %v5789_v37  ;;  %v5782_v56 = vmul.f32 %v7534_v33, %v5768_v42 }
0x11ff   : > { %5799 = vst [vmem:[#allocation2] sm:$0xff] %v5797_v55  ;;  %v5790_v57 = vmul.f32 %v6698_v50, %v5782_v56  ;;  %5804 = sbr.rel (%p6700_p3) target bundleno = 5150 (0x141e), region = 200 }
0x1201   : > { %v5798_v59 = vadd.f32 %v6699_v53, %v5790_v57 }
0x1203   : > { %5800 = vst [vmem:[#allocation2 + $0x8] sm:$0xff] %v5798_v59 }
0x1204   : > { %v5805_v61 = vrot.slane %v5797_v55, 4  ;;  %v5811_v54 = vrot.slane %v5798_v59, 4  ;;  %vm5824_vm9 = vcmask 1041409   ;;  %vm5827_vm10 = vcmask 1041408   ;;  %v7537_v18 = vld [vmem:[#allocation25 + $0x38] sm:$0xff]   ;;  %v7538_v4 = vld [vmem:[#allocation25 + $0x30] sm:$0xff]  }
0x1205   : > { %v8210_v19 = vmov 0.0   ;;  %v7539_v20 = vld [vmem:[#allocation25 + $0x28] sm:$0xff]   ;;  %v7540_v21 = vld [vmem:[#allocation25 + $0x20] sm:$0xff]   ;;  %v7541_v22 = vld [vmem:[#allocation25 + $0x18] sm:$0xff]   ;;  %vm8211_vm11 = vmmov 0  }
0x1206   : > { %v5806_v32 = vadd.f32 %v5805_v61, %v5797_v55  ;;  %v5812_v63 = vadd.f32 %v5811_v54, %v5798_v59  ;;  %7091 = vmatprep.subr.bf16.mxu0 %v8210_v19  ;;  %7107 = vmatprep.mubr.msk.bf16.mxu0 %vm8211_vm11, %v8210_v19  ;;  %v7542_v25 = vld [vmem:[#allocation25 + $0x10] sm:$0xff]   ;;  %v7543_v26 = vld [vmem:[#allocation25 + $0x8] sm:$0xff]   ;;  %v7544_v27 = vld [vmem:[#allocation25] sm:$0xff]  }
0x1207   : > { %7092 = vmatpush3.bf16.msra.mxu0 %v7537_v18  ;;  %v6701_v0 = vld [vmem:[#allocation23] ss:$0 sm:$0xff]  ;;  %v6702_v38 = vld [vmem:[#allocation24] ss:$0 sm:$0xff]  ;;  %v6703_v50 = vld [vmem:[#allocation27] ss:$0 sm:$0xff] }
0x1208   : > { %v5807_v1 = vrot.slane %v5806_v32, 2  ;;  %v5813_v52 = vrot.slane %v5812_v63, 2  ;;  %7093 = vmatprep.subr.bf16.mxu0 %v8210_v19 }
0x120a   : > { %v5808_v3 = vadd.f32 %v5807_v1, %v5806_v32  ;;  %v5814_v62 = vadd.f32 %v5813_v52, %v5812_v63 }
0x120b   : > { %7094 = vmatpush3.bf16.msra.mxu0 %v7538_v4 }
0x120c   : > { %v5809_v28 = vrot.slane %v5808_v3, 1  ;;  %v5815_v29 = vrot.slane %v5814_v62, 1  ;;  %7095 = vmatprep.subr.bf16.mxu0 %v8210_v19 }
0x120e   : > { %v5810_v5 = vadd.f32 %v5809_v28, %v5808_v3  ;;  %v5816_v6 = vadd.f32 %v5815_v29, %v5814_v62 }
0x120f   : > { %7096 = vmatpush3.bf16.msra.mxu0 %v7539_v20 }
0x1210   : > { %v5818_v30 = vmul.f32 0.125, %v5810_v5  ;;  %v5819_v8 = vmul.f32 0.125, %v5816_v6  ;;  %7097 = vmatprep.subr.bf16.mxu0 %v8210_v19 }
0x1212   : > { %v5825_v51 = vsel %vm5824_vm9, %v5819_v8, %v5818_v30 }
0x1213   : > { %v5828_v9 = vsel %vm5827_vm10, %v5825_v51, 0.0  ;;  %7098 = vmatpush3.bf16.msra.mxu0 %v7540_v21 }
0x1214   : > { %5829 = vadd.xlane.f32.xlu0 %v5828_v9  ;;  %7099 = vmatprep.subr.bf16.mxu0 %v8210_v19 }
0x1217   : > { %7100 = vmatpush3.bf16.msra.mxu0 %v7541_v22 }
0x1218   : > { %7101 = vmatprep.subr.bf16.mxu0 %v8210_v19 }
0x121b   : > { %7102 = vmatpush3.bf16.msra.mxu0 %v7542_v25 }
0x121c   : > { %7103 = vmatprep.subr.bf16.mxu0 %v8210_v19 }
0x121f   : > { %7104 = vmatpush3.bf16.msra.mxu0 %v7543_v26 }
0x1220   : > { %7105 = vmatprep.subr.bf16.mxu0 %v8210_v19 }
0x1223   : > { %7106 = vmatpush3.bf16.msra.mxu0 %v7544_v27 }
0x129d   : > { %v5830_v31 = vpop.xlane.xlu0 %5829 }
0x129e   : > { %v5831_v58 = vmul.f32 0.0078125, %v5830_v31 }
0x12a0   : > { %v5833_v44 = vrot.slane %v5831_v58, 1  ;;  %v5836_v10 = vsub.f32 %v5818_v30, %v5831_v58 }
0x12a2   : > { %v5837_v11 = vsub.f32 %v5819_v8, %v5833_v44  ;;  %v5838_v7 = vmul.f32 %v5836_v10, %v5836_v10 }
0x12a4   : > { %v5839_v12 = vmul.f32 %v5837_v11, %v5837_v11 }
0x12a6   : > { %v5842_v14 = vrot.slane %v5839_v12, 7 }
0x12a8   : > { %v5843_v15 = vsel %vm5824_vm9, %v5842_v14, %v5838_v7 }
0x12a9   : > { %v5845_v16 = vsel %vm5827_vm10, %v5843_v15, 0.0 }
0x12aa   : > { %5846 = vadd.xlane.f32.xlu0 %v5845_v16 }
0x1333   : > { %v5847_v23 = vpop.xlane.xlu0 %5846 }
0x1334   : > { %v5848_v34 = vmul.f32 0.0078125, %v5847_v23 }
0x1336   : > { %v5849_v35 = vadd.f32 1e-05, %v5848_v34 }
0x1338   : > { %7545 = vrsqrt.f32 %v5849_v35 }
0x1345   : > { %v7546_v60 = vpop.eup %7545 }
0x1346   : > { %v5852_v36 = vrot.slane %v7546_v60, 1  ;;  %v5855_v2 = vmul.f32 %v7546_v60, %v5836_v10 }
0x1348   : > { %v5856_v40 = vmul.f32 %v5852_v36, %v5837_v11  ;;  %v5863_v41 = vmul.f32 %v6701_v0, %v5855_v2 }
0x134a   : > { %v5864_v24 = vmul.f32 %v6701_v0, %v5856_v40  ;;  %v5871_v42 = vadd.f32 %v6702_v38, %v5863_v41 }
0x134c   : > { %v5872_v45 = vadd.f32 %v6702_v38, %v5864_v24  ;;  %v5873_v17 = vpack.c.bf16 %v5871_v42, %v5871_v42 }
0x134e   : > { %v5874_v46 = vpack.c.bf16 %v5872_v45, %v5872_v45  ;;  %v5900_v47 = vunpack.c.l.b16 %v5873_v17 }
0x1350   : > { %v5901_v43 = vunpack.c.l.b16 %v5874_v46 }
0x1352   : > { %v5902_v48 = vrot.slane %v5901_v43, 7 }
0x1354   : > { %v5903_v13 = vsel %vm5824_vm9, %v5902_v48, %v5900_v47 }
0x1355   : > { %v5904_v49 = vpack.c.b16 %v5903_v13, %v5903_v13 }
0x1357   : > { %7108 = vmatmul.mubr.bf16.vlgmr.msra.gmra.mxu0 %v5904_v49 }
0x1417   : > { %v5988_v39 = vpop.f32.mrf.mxu0 }
0x1418   : > { %v5989_v53 = vadd.f32 %v6703_v50, %v5988_v39 }
0x1419   : > { %v7109_v37 = vpop.f32.mrf.mxu0 }
0x141a   : > { %5994 = vst [vmem:[#allocation28] sm:$0x3] %v5989_v53 }
0x141b   : > { %v5991_v33 = vpop.f32.mrf.mxu0 }
0x141d   : > { %v7110_v55 = vpop.f32.mrf.mxu0 }
0x141e PF: > { %s9609_s29 = sld [smem:[#allocation39_spill]]  ;;  %s8212_s1 = smov [#allocation28]  }
0x141f   : > { %s6002_s21 = sshll.u32 %s8212_s1, 4  ;;  %s6003_s21 = int_to_ptr.vmem [resolvable:$true] %s6002_s21 }
0x1420   : > { %s8091_s26 = scalar_lea.vmem %s6003_s21, 32  ;;  %p8098_p11 = scmp.lt.s32.totalorder %s6003_s21, %s6003_s21 }
0x1421   : > { %p8092_p12 = scmp.ne.s32.totalorder %s6003_s21, %s8091_s26  ;;  %p8099_p9 = scmp.lt.s32.totalorder %s8091_s26, %s8091_s26 }
0x1423   : > { %p8100_p1 = por %p8099_p9, %p8098_p11 }
0x1424   : > { %p7256_p6 = scmp.eq.s32.totalorder %s9609_s29, 3 }
0x1426   : > { %p8093_p0 = pnand %p8092_p12, %p7256_p6 }
0x1428   : > { %p8094_p13 = pneg %p8093_p0 }
0x142a   : > { %p8101_p2 = pnand %p8100_p1, %p8094_p13 }
0x142c   : > { %8104 = shalt.err (!%p8101_p2)
}
0x142d   : > { %s9610_s23 = sld [smem:[#allocation60_spill]] }
0x1433   : > { %7174 = dma.vmem_to_hbm [thread:$0]  (%p7256_p6), %s6003_s21, 32, %s9610_s23, [#allocation5]  }
0x1434   : > { %8160 = dma.done.wait (%p7256_p6), [#allocation5], 32  }
0x1435   : > { %8162 = vsyncadd (%p7256_p6), [#allocation5], 4294967264 }
0x1436 PF: > { %s9611_s25 = sld [smem:[#allocation42_spill]] }
0x1437   : > { %s9612_s4 = sld [smem:[#allocation37_spill]] }
0x1438   : > { %s9613_s30 = sld [smem:[#allocation38_spill]] }
0x1439   : > { %s9614_s24 = sld [smem:[#allocation43_spill]] }
0x143c   : > { %p35_p5 = scmp.ge.s32.totalorder %s9611_s25, 6  }
0x143e   :  { %37 = sbr.rel (!%p35_p5) target bundleno = 24 (0x18), region = 309 }
0x1443   :  { %6015 = vsyncpa [#allocation4], 1 }
0x1444   :  { %6017 = vsyncpa [#allocation4 + $0x1], 1 }
0x1445   :  { %6018 = vsyncpa [#allocation7], 1 }
0x1446   :  { %6019 = vsyncpa [#allocation10], 1 }
0x1447   :  { %6020 = vsyncpa [#allocation26], 1 }
0x1448   :  { %6021 = vsyncpa [#allocation5], 1 }
0x1449   :  { %6023 = vsyncpa [#allocation5 + $0x1], 1 }

</bundles_post_ra>
